<compile_context>
chip_gen: v6e
topology: v6e:2x2x1
jax: 0.10.0
libtpu: 0.0.40
codegen_flags: <defaults>
</compile_context>

<pallas_src>
import functools

import jax
import jax.numpy as jnp
from jax.experimental import pallas as pl
from jax.experimental.pallas import tpu as pltpu


# ----------------------------- Pallas kernels ------------------------------


def _ed_block_kernel(x_ref, mask_l_ref, mask_r_ref, w_skip_ref, w3a_ref,
                     prelu_ref, w3b_ref, wfc1_ref, bfc1_ref, wfc2_ref,
                     bfc2_ref, o_ref, pad_ref, *, H, W):
    """Fused EDConvBlock for one image, transposed layout (C, H*W).

    skip = conv1x1(x); res = conv3x3 -> PReLU -> conv3x3;
    res = CA(res) * res + skip            (CA = CALayer-style, avg-pool only)
    """
    M = H * W
    PAD = W + 1                                     # halo width in flat index

    xv = x_ref[...]                                 # (C, M) bf16

    # ---- skip = 1x1 conv (W^T @ x) -----------------------------------------
    skip = jnp.dot(w_skip_ref[...], xv, preferred_element_type=jnp.float32)

    def conv3x3(w9_ref):
        """3x3 'same' conv as 9 shifted matmuls off the padded VMEM scratch."""
        c_out = w9_ref.shape[1]
        acc = jnp.zeros((c_out, M), jnp.float32)
        for t in range(9):                          # static unroll (9 taps)
            dy, dx = divmod(t, 3)
            s = (dy - 1) * W + (dx - 1)             # flat-index shift
            win = pad_ref[:, PAD + s: PAD + s + M]  # (C, M), zeros past edges
            if dx == 0:                             # left neighbour wraps rows
                win = win * mask_l_ref[...]
            elif dx == 2:                           # right neighbour wraps
                win = win * mask_r_ref[...]
            acc = acc + jnp.dot(w9_ref[t], win,
                                preferred_element_type=jnp.float32)
        return acc

    # ---- conv3x3 #1 + PReLU --------------------------------------------------
    pad_ref[...] = jnp.zeros_like(pad_ref)          # zero halo region
    pad_ref[:, PAD:PAD + M] = xv
    mid = conv3x3(w3a_ref)                          # (C, M) f32
    a = prelu_ref[0]                                # scalar slope from SMEM
    mid = jnp.where(mid >= 0, mid, a * mid)

    # ---- conv3x3 #2 (reuse the same padded scratch) --------------------------
    pad_ref[:, PAD:PAD + M] = mid.astype(pad_ref.dtype)
    res = conv3x3(w3b_ref)                          # (C, M) f32

    # ---- channel attention (CALayer) + residual ------------------------------
    avg = jnp.mean(res, axis=1, keepdims=True)      # (C, 1) global avg pool
    h = jnp.maximum(
        jnp.dot(wfc1_ref[...], avg, preferred_element_type=jnp.float32)
        + bfc1_ref[...], 0.0)                       # (C/r, 1)
    att = jax.nn.sigmoid(
        jnp.dot(wfc2_ref[...], h, preferred_element_type=jnp.float32)
        + bfc2_ref[...])                            # (C, 1)

    o_ref[...] = (res * att + skip).astype(o_ref.dtype)


def _conv1x1_kernel(x_ref, w_ref, o_ref):
    """out = W^T @ x  (1x1 conv in transposed layout)."""
    o_ref[...] = jnp.dot(w_ref[...], x_ref[...],
                         preferred_element_type=jnp.float32).astype(o_ref.dtype)


# ------------------------------ wrappers ------------------------------------


def ed_block(x, p, H, W, mask_l, mask_r):
    """x: (N, C, H*W) bf16 -> (N, C, H*W) bf16."""
    N, C, M = x.shape
    Cr = p["wfc1"].shape[0]
    kernel = functools.partial(_ed_block_kernel, H=H, W=W)
    return pl.pallas_call(
        kernel,
        grid=(N,),
        in_specs=[
            pl.BlockSpec((None, C, M), lambda n: (n, 0, 0)),        # x
            pl.BlockSpec((1, M), lambda n: (0, 0)),                 # mask_l
            pl.BlockSpec((1, M), lambda n: (0, 0)),                 # mask_r
            pl.BlockSpec((C, C), lambda n: (0, 0)),                 # w_skip
            pl.BlockSpec((9, C, C), lambda n: (0, 0, 0)),           # w3a
            pl.BlockSpec(memory_space=pltpu.MemorySpace.SMEM),      # prelu_a
            pl.BlockSpec((9, C, C), lambda n: (0, 0, 0)),           # w3b
            pl.BlockSpec((Cr, C), lambda n: (0, 0)),                # wfc1
            pl.BlockSpec((Cr, 1), lambda n: (0, 0)),                # bfc1
            pl.BlockSpec((C, Cr), lambda n: (0, 0)),                # wfc2
            pl.BlockSpec((C, 1), lambda n: (0, 0)),                 # bfc2
        ],
        out_specs=pl.BlockSpec((None, C, M), lambda n: (n, 0, 0)),
        out_shape=jax.ShapeDtypeStruct((N, C, M), jnp.bfloat16),
        scratch_shapes=[pltpu.VMEM((C, M + 2 * (W + 1)), jnp.bfloat16)],
        compiler_params=pltpu.CompilerParams(
            dimension_semantics=("parallel",)),
    )(x, mask_l, mask_r, p["w_skip"], p["w3a"], p["prelu_a"], p["w3b"],
      p["wfc1"], p["bfc1"], p["wfc2"], p["bfc2"])


def downsample(x, w_down, H, W):
    """DownSample: bilinear x0.5 (== 2x2 avg pool for even H, W) + 1x1 conv."""
    N, C, _ = x.shape
    H2, W2 = H // 2, W // 2
    # 2x2 average pool (strided reduce at the reduced resolution; XLA glue).
    pooled = x.reshape(N, C, H2, 2, W2, 2).astype(jnp.float32).mean(axis=(3, 5))
    pooled = pooled.reshape(N, C, H2 * W2).astype(jnp.bfloat16)
    C2 = w_down.shape[0]
    M2 = H2 * W2
    return pl.pallas_call(
        _conv1x1_kernel,
        grid=(N,),
        in_specs=[pl.BlockSpec((None, C, M2), lambda n: (n, 0, 0)),
                  pl.BlockSpec((C2, C), lambda n: (0, 0))],
        out_specs=pl.BlockSpec((None, C2, M2), lambda n: (n, 0, 0)),
        out_shape=jax.ShapeDtypeStruct((N, C2, M2), jnp.bfloat16),
        compiler_params=pltpu.CompilerParams(
            dimension_semantics=("parallel",)),
    )(pooled, w_down)


def _col_masks(H, W):
    """0/1 masks (1, H*W) for output pixels whose left / right 3x3 neighbour
    would wrap across an image row in the flat (C, H*W) layout."""
    col = jnp.arange(H * W, dtype=jnp.int32) % W
    mask_l = (col > 0).astype(jnp.bfloat16).reshape(1, H * W)
    mask_r = (col < W - 1).astype(jnp.bfloat16).reshape(1, H * W)
    return mask_l, mask_r


def encoder_forward(x_nchw, params):
    N, C1, H, W = x_nchw.shape
    x = x_nchw.astype(jnp.bfloat16).reshape(N, C1, H * W)   # NCHW -> (N,C,HW)

    ml, mr = _col_masks(H, W)
    e1 = ed_block(ed_block(x, params["enc1"][0], H, W, ml, mr),
                  params["enc1"][1], H, W, ml, mr)

    H2, W2 = H // 2, W // 2
    x2 = downsample(e1, params["down12"], H, W)
    ml2, mr2 = _col_masks(H2, W2)
    e2 = ed_block(ed_block(x2, params["enc2"][0], H2, W2, ml2, mr2),
                  params["enc2"][1], H2, W2, ml2, mr2)

    H3, W3 = H2 // 2, W2 // 2
    x3 = downsample(e2, params["down23"], H2, W2)
    ml3, mr3 = _col_masks(H3, W3)
    e3 = ed_block(ed_block(x3, params["enc3"][0], H3, W3, ml3, mr3),
                  params["enc3"][1], H3, W3, ml3, mr3)

    C2 = params["down12"].shape[0]
    C3 = params["down23"].shape[0]
    return [e1.reshape(N, C1, H, W).astype(jnp.float32),
            e2.reshape(N, C2, H2, W2).astype(jnp.float32),
            e3.reshape(N, C3, H3, W3).astype(jnp.float32)]


# --------------------------- parameter creation -----------------------------


def init_block_params(key, C, reduction):
    ks = jax.random.split(key, 7)
    Cr = C // reduction
    s = lambda fan_in: 1.0 / jnp.sqrt(jnp.float32(fan_in))
    return dict(
        # 1x1 skip conv: PyTorch (Cout, Cin, 1, 1) -> (Cout, Cin)
        w_skip=(jax.random.normal(ks[0], (C, C), jnp.float32)
                * s(C)).astype(jnp.bfloat16),
        # 3x3 convs: PyTorch (Cout, Cin, 3, 3) -> (9, Cout, Cin), tap-major
        w3a=(jax.random.normal(ks[1], (9, C, C), jnp.float32)
             * s(9 * C)).astype(jnp.bfloat16),
        prelu_a=jnp.full((1,), 0.25, jnp.float32),        # nn.PReLU() default
        w3b=(jax.random.normal(ks[2], (9, C, C), jnp.float32)
             * s(9 * C)).astype(jnp.bfloat16),
        # ChannelAttention (CALayer): 1x1(+b) -> ReLU -> 1x1(+b) -> sigmoid
        wfc1=jax.random.normal(ks[3], (Cr, C), jnp.float32) * s(C),
        bfc1=jax.random.normal(ks[4], (Cr, 1), jnp.float32) * s(C),
        wfc2=jax.random.normal(ks[5], (C, Cr), jnp.float32) * s(Cr),
        bfc2=jax.random.normal(ks[6], (C, 1), jnp.float32) * s(Cr),
    )


def init_params(key, n_feat, reduction, scale_unetfeats):
    keys = jax.random.split(key, 8)
    c1 = n_feat
    c2 = n_feat + scale_unetfeats
    c3 = n_feat + 2 * scale_unetfeats
    dn = lambda k, ci, co: (jax.random.normal(k, (co, ci), jnp.float32)
                            / jnp.sqrt(jnp.float32(ci))).astype(jnp.bfloat16)
    return dict(
        enc1=[init_block_params(keys[0], c1, reduction),
              init_block_params(keys[1], c1, reduction)],
        enc2=[init_block_params(keys[2], c2, reduction),
              init_block_params(keys[3], c2, reduction)],
        enc3=[init_block_params(keys[4], c3, reduction),
              init_block_params(keys[5], c3, reduction)],
        down12=dn(keys[6], c1, c2),
        down23=dn(keys[7], c2, c3),
    )


# ---------------------------------- main -------------------------------------


if __name__ == "__main__":
    key = jax.random.PRNGKey(0)
    kx, kp = jax.random.split(key)

    # Encoder(n_feat=16, kernel_size=3, reduction=4, bias=False, scale_unetfeats=8)
    n_feat, kernel_size, reduction, bias, scale_unetfeats = 16, 3, 4, False, 8
    N, H, W = 2, 16, 16

    x = jax.random.normal(kx, (N, n_feat, H, W), jnp.float32)   # NCHW like PyTorch
    params = init_params(kp, n_feat, reduction, scale_unetfeats)

    fwd = jax.jit(encoder_forward)
    enc1, enc2, enc3 = fwd(x, params)
    jax.block_until_ready((enc1, enc2, enc3))

    assert enc1.shape == (N, n_feat, H, W)
    assert enc2.shape == (N, n_feat + scale_unetfeats, H // 2, W // 2)
    assert enc3.shape == (N, n_feat + 2 * scale_unetfeats, H // 4, W // 4)
    assert all(bool(jnp.isfinite(t).all()) for t in (enc1, enc2, enc3))

    print("KERNEL_OK")
</pallas_src>

<mosaic_0001>
module attributes {stable_mosaic.version = 11 : i64} {
  func.func @_ed_block_kernel(%arg0: i32, %arg1: memref<1x16x256xbf16, #tpu.memory_space<vmem>>, %arg2: memref<1x256xbf16, #tpu.memory_space<vmem>>, %arg3: memref<1x256xbf16, #tpu.memory_space<vmem>>, %arg4: memref<16x16xbf16, #tpu.memory_space<vmem>>, %arg5: memref<9x16x16xbf16, #tpu.memory_space<vmem>>, %arg6: memref<1xf32, #tpu.memory_space<smem>>, %arg7: memref<9x16x16xbf16, #tpu.memory_space<vmem>>, %arg8: memref<4x16xf32, #tpu.memory_space<vmem>>, %arg9: memref<4x1xf32, #tpu.memory_space<vmem>>, %arg10: memref<16x4xf32, #tpu.memory_space<vmem>>, %arg11: memref<16x1xf32, #tpu.memory_space<vmem>>, %arg12: memref<1x16x256xbf16, #tpu.memory_space<vmem>>, %arg13: memref<16x290xbf16, #tpu.memory_space<vmem>>) attributes {dimension_semantics = [#tpu.dimension_semantics<parallel>], iteration_bounds = array<i64: 2>, scalar_prefetch = 0 : i64, scratch_operands = 1 : i64, tpu.core_type = #tpu.core_type<tc>, window_params = [{transform_indices = @transform_0, window_bounds = array<i64: 1, 16, 256>}, {pipeline_mode = #tpu.pipeline_mode<synchronous>, transform_indices = @transform_1, window_bounds = array<i64: 1, 256>}, {pipeline_mode = #tpu.pipeline_mode<synchronous>, transform_indices = @transform_2, window_bounds = array<i64: 1, 256>}, {pipeline_mode = #tpu.pipeline_mode<synchronous>, transform_indices = @transform_3, window_bounds = array<i64: 16, 16>}, {pipeline_mode = #tpu.pipeline_mode<synchronous>, transform_indices = @transform_4, window_bounds = array<i64: 9, 16, 16>}, {transform_indices = @transform_5, window_bounds = array<i64: 1>}, {pipeline_mode = #tpu.pipeline_mode<synchronous>, transform_indices = @transform_6, window_bounds = array<i64: 9, 16, 16>}, {pipeline_mode = #tpu.pipeline_mode<synchronous>, transform_indices = @transform_7, window_bounds = array<i64: 4, 16>}, {pipeline_mode = #tpu.pipeline_mode<synchronous>, transform_indices = @transform_8, window_bounds = array<i64: 4, 1>}, {pipeline_mode = #tpu.pipeline_mode<synchronous>, transform_indices = @transform_9, window_bounds = array<i64: 16, 4>}, {pipeline_mode = #tpu.pipeline_mode<synchronous>, transform_indices = @transform_10, window_bounds = array<i64: 16, 1>}, {transform_indices = @transform_11, window_bounds = array<i64: 1, 16, 256>}]} {
    %c0 = arith.constant 0 : index
    %c0_0 = arith.constant 0 : index
    %c0_1 = arith.constant 0 : index
    %0 = vector.load %arg1[%c0, %c0_0, %c0_1] : memref<1x16x256xbf16, #tpu.memory_space<vmem>>, vector<1x16x256xbf16>
    %1 = vector.shape_cast %0 : vector<1x16x256xbf16> to vector<16x256xbf16>
    %c0_2 = arith.constant 0 : index
    %c0_3 = arith.constant 0 : index
    %2 = vector.load %arg4[%c0_2, %c0_3] : memref<16x16xbf16, #tpu.memory_space<vmem>>, vector<16x16xbf16>
    %cst = arith.constant dense<0.000000e+00> : vector<16x256xf32>
    %3 = tpu.matmul %2, %1, %cst {dimension_numbers = #tpu.dot_dimension_numbers<[1], [0], [0], [1], [0, 0, 1, 1], [], []>} : vector<16x16xbf16>, vector<16x256xbf16>, vector<16x256xf32> -> vector<16x256xf32>
    %cst_4 = arith.constant 0.000000e+00 : bf16
    %4 = vector.broadcast %cst_4 : bf16 to vector<16x290xbf16>
    %c0_5 = arith.constant 0 : index
    %c0_6 = arith.constant 0 : index
    %5 = vector.load %arg13[%c0_5, %c0_6] : memref<16x290xbf16, #tpu.memory_space<vmem>>, vector<16x290xbf16>
    tpu.vector_store %arg13[%c0_5, %c0_6], %4 {strides = array<i32>} : memref<16x290xbf16, #tpu.memory_space<vmem>>, vector<16x290xbf16>,
    %c0_7 = arith.constant 0 : index
    %c17 = arith.constant 17 : index
    %6 = vector.load %arg13[%c0_7, %c17] : memref<16x290xbf16, #tpu.memory_space<vmem>>, vector<16x256xbf16>
    tpu.vector_store %arg13[%c0_7, %c17], %1 {strides = array<i32>} : memref<16x290xbf16, #tpu.memory_space<vmem>>, vector<16x256xbf16>,
    %cst_8 = arith.constant 0.000000e+00 : f32
    %7 = vector.broadcast %cst_8 : f32 to vector<16x256xf32>
    %c0_9 = arith.constant 0 : index
    %c0_10 = arith.constant 0 : index
    %8 = vector.load %arg13[%c0_9, %c0_10] : memref<16x290xbf16, #tpu.memory_space<vmem>>, vector<16x256xbf16>
    %c0_11 = arith.constant 0 : index
    %c0_12 = arith.constant 0 : index
    %9 = vector.load %arg2[%c0_11, %c0_12] : memref<1x256xbf16, #tpu.memory_space<vmem>>, vector<1x256xbf16>
    %10 = vector.broadcast %9 : vector<1x256xbf16> to vector<16x256xbf16>
    %11 = arith.mulf %8, %10 : vector<16x256xbf16>
    %c0_13 = arith.constant 0 : index
    %c0_14 = arith.constant 0 : index
    %c0_15 = arith.constant 0 : index
    %12 = vector.load %arg5[%c0_13, %c0_14, %c0_15] : memref<9x16x16xbf16, #tpu.memory_space<vmem>>, vector<1x16x16xbf16>
    %13 = vector.shape_cast %12 : vector<1x16x16xbf16> to vector<16x16xbf16>
    %cst_16 = arith.constant dense<0.000000e+00> : vector<16x256xf32>
    %14 = tpu.matmul %13, %11, %cst_16 {dimension_numbers = #tpu.dot_dimension_numbers<[1], [0], [0], [1], [0, 0, 1, 1], [], []>} : vector<16x16xbf16>, vector<16x256xbf16>, vector<16x256xf32> -> vector<16x256xf32>
    %15 = arith.addf %7, %14 : vector<16x256xf32>
    %c0_17 = arith.constant 0 : index
    %c1 = arith.constant 1 : index
    %16 = vector.load %arg13[%c0_17, %c1] : memref<16x290xbf16, #tpu.memory_space<vmem>>, vector<16x256xbf16>
    %c1_18 = arith.constant 1 : index
    %c0_19 = arith.constant 0 : index
    %c0_20 = arith.constant 0 : index
    %17 = vector.load %arg5[%c1_18, %c0_19, %c0_20] : memref<9x16x16xbf16, #tpu.memory_space<vmem>>, vector<1x16x16xbf16>
    %18 = vector.shape_cast %17 : vector<1x16x16xbf16> to vector<16x16xbf16>
    %cst_21 = arith.constant dense<0.000000e+00> : vector<16x256xf32>
    %19 = tpu.matmul %18, %16, %cst_21 {dimension_numbers = #tpu.dot_dimension_numbers<[1], [0], [0], [1], [0, 0, 1, 1], [], []>} : vector<16x16xbf16>, vector<16x256xbf16>, vector<16x256xf32> -> vector<16x256xf32>
    %20 = arith.addf %15, %19 : vector<16x256xf32>
    %c0_22 = arith.constant 0 : index
    %c2 = arith.constant 2 : index
    %21 = vector.load %arg13[%c0_22, %c2] : memref<16x290xbf16, #tpu.memory_space<vmem>>, vector<16x256xbf16>
    %c0_23 = arith.constant 0 : index
    %c0_24 = arith.constant 0 : index
    %22 = vector.load %arg3[%c0_23, %c0_24] : memref<1x256xbf16, #tpu.memory_space<vmem>>, vector<1x256xbf16>
    %23 = vector.broadcast %22 : vector<1x256xbf16> to vector<16x256xbf16>
    %24 = arith.mulf %21, %23 : vector<16x256xbf16>
    %c2_25 = arith.constant 2 : index
    %c0_26 = arith.constant 0 : index
    %c0_27 = arith.constant 0 : index
    %25 = vector.load %arg5[%c2_25, %c0_26, %c0_27] : memref<9x16x16xbf16, #tpu.memory_space<vmem>>, vector<1x16x16xbf16>
    %26 = vector.shape_cast %25 : vector<1x16x16xbf16> to vector<16x16xbf16>
    %cst_28 = arith.constant dense<0.000000e+00> : vector<16x256xf32>
    %27 = tpu.matmul %26, %24, %cst_28 {dimension_numbers = #tpu.dot_dimension_numbers<[1], [0], [0], [1], [0, 0, 1, 1], [], []>} : vector<16x16xbf16>, vector<16x256xbf16>, vector<16x256xf32> -> vector<16x256xf32>
    %28 = arith.addf %20, %27 : vector<16x256xf32>
    %c0_29 = arith.constant 0 : index
    %c16 = arith.constant 16 : index
    %29 = vector.load %arg13[%c0_29, %c16] : memref<16x290xbf16, #tpu.memory_space<vmem>>, vector<16x256xbf16>
    %c0_30 = arith.constant 0 : index
    %c0_31 = arith.constant 0 : index
    %30 = vector.load %arg2[%c0_30, %c0_31] : memref<1x256xbf16, #tpu.memory_space<vmem>>, vector<1x256xbf16>
    %31 = vector.broadcast %30 : vector<1x256xbf16> to vector<16x256xbf16>
    %32 = arith.mulf %29, %31 : vector<16x256xbf16>
    %c3 = arith.constant 3 : index
    %c0_32 = arith.constant 0 : index
    %c0_33 = arith.constant 0 : index
    %33 = vector.load %arg5[%c3, %c0_32, %c0_33] : memref<9x16x16xbf16, #tpu.memory_space<vmem>>, vector<1x16x16xbf16>
    %34 = vector.shape_cast %33 : vector<1x16x16xbf16> to vector<16x16xbf16>
    %cst_34 = arith.constant dense<0.000000e+00> : vector<16x256xf32>
    %35 = tpu.matmul %34, %32, %cst_34 {dimension_numbers = #tpu.dot_dimension_numbers<[1], [0], [0], [1], [0, 0, 1, 1], [], []>} : vector<16x16xbf16>, vector<16x256xbf16>, vector<16x256xf32> -> vector<16x256xf32>
    %36 = arith.addf %28, %35 : vector<16x256xf32>
    %c0_35 = arith.constant 0 : index
    %c17_36 = arith.constant 17 : index
    %37 = vector.load %arg13[%c0_35, %c17_36] : memref<16x290xbf16, #tpu.memory_space<vmem>>, vector<16x256xbf16>
    %c4 = arith.constant 4 : index
    %c0_37 = arith.constant 0 : index
    %c0_38 = arith.constant 0 : index
    %38 = vector.load %arg5[%c4, %c0_37, %c0_38] : memref<9x16x16xbf16, #tpu.memory_space<vmem>>, vector<1x16x16xbf16>
    %39 = vector.shape_cast %38 : vector<1x16x16xbf16> to vector<16x16xbf16>
    %cst_39 = arith.constant dense<0.000000e+00> : vector<16x256xf32>
    %40 = tpu.matmul %39, %37, %cst_39 {dimension_numbers = #tpu.dot_dimension_numbers<[1], [0], [0], [1], [0, 0, 1, 1], [], []>} : vector<16x16xbf16>, vector<16x256xbf16>, vector<16x256xf32> -> vector<16x256xf32>
    %41 = arith.addf %36, %40 : vector<16x256xf32>
    %c0_40 = arith.constant 0 : index
    %c18 = arith.constant 18 : index
    %42 = vector.load %arg13[%c0_40, %c18] : memref<16x290xbf16, #tpu.memory_space<vmem>>, vector<16x256xbf16>
    %c0_41 = arith.constant 0 : index
    %c0_42 = arith.constant 0 : index
    %43 = vector.load %arg3[%c0_41, %c0_42] : memref<1x256xbf16, #tpu.memory_space<vmem>>, vector<1x256xbf16>
    %44 = vector.broadcast %43 : vector<1x256xbf16> to vector<16x256xbf16>
    %45 = arith.mulf %42, %44 : vector<16x256xbf16>
    %c5 = arith.constant 5 : index
    %c0_43 = arith.constant 0 : index
    %c0_44 = arith.constant 0 : index
    %46 = vector.load %arg5[%c5, %c0_43, %c0_44] : memref<9x16x16xbf16, #tpu.memory_space<vmem>>, vector<1x16x16xbf16>
    %47 = vector.shape_cast %46 : vector<1x16x16xbf16> to vector<16x16xbf16>
    %cst_45 = arith.constant dense<0.000000e+00> : vector<16x256xf32>
    %48 = tpu.matmul %47, %45, %cst_45 {dimension_numbers = #tpu.dot_dimension_numbers<[1], [0], [0], [1], [0, 0, 1, 1], [], []>} : vector<16x16xbf16>, vector<16x256xbf16>, vector<16x256xf32> -> vector<16x256xf32>
    %49 = arith.addf %41, %48 : vector<16x256xf32>
    %c0_46 = arith.constant 0 : index
    %c32 = arith.constant 32 : index
    %50 = vector.load %arg13[%c0_46, %c32] : memref<16x290xbf16, #tpu.memory_space<vmem>>, vector<16x256xbf16>
    %c0_47 = arith.constant 0 : index
    %c0_48 = arith.constant 0 : index
    %51 = vector.load %arg2[%c0_47, %c0_48] : memref<1x256xbf16, #tpu.memory_space<vmem>>, vector<1x256xbf16>
    %52 = vector.broadcast %51 : vector<1x256xbf16> to vector<16x256xbf16>
    %53 = arith.mulf %50, %52 : vector<16x256xbf16>
    %c6 = arith.constant 6 : index
    %c0_49 = arith.constant 0 : index
    %c0_50 = arith.constant 0 : index
    %54 = vector.load %arg5[%c6, %c0_49, %c0_50] : memref<9x16x16xbf16, #tpu.memory_space<vmem>>, vector<1x16x16xbf16>
    %55 = vector.shape_cast %54 : vector<1x16x16xbf16> to vector<16x16xbf16>
    %cst_51 = arith.constant dense<0.000000e+00> : vector<16x256xf32>
    %56 = tpu.matmul %55, %53, %cst_51 {dimension_numbers = #tpu.dot_dimension_numbers<[1], [0], [0], [1], [0, 0, 1, 1], [], []>} : vector<16x16xbf16>, vector<16x256xbf16>, vector<16x256xf32> -> vector<16x256xf32>
    %57 = arith.addf %49, %56 : vector<16x256xf32>
    %c0_52 = arith.constant 0 : index
    %c33 = arith.constant 33 : index
    %58 = vector.load %arg13[%c0_52, %c33] : memref<16x290xbf16, #tpu.memory_space<vmem>>, vector<16x256xbf16>
    %c7 = arith.constant 7 : index
    %c0_53 = arith.constant 0 : index
    %c0_54 = arith.constant 0 : index
    %59 = vector.load %arg5[%c7, %c0_53, %c0_54] : memref<9x16x16xbf16, #tpu.memory_space<vmem>>, vector<1x16x16xbf16>
    %60 = vector.shape_cast %59 : vector<1x16x16xbf16> to vector<16x16xbf16>
    %cst_55 = arith.constant dense<0.000000e+00> : vector<16x256xf32>
    %61 = tpu.matmul %60, %58, %cst_55 {dimension_numbers = #tpu.dot_dimension_numbers<[1], [0], [0], [1], [0, 0, 1, 1], [], []>} : vector<16x16xbf16>, vector<16x256xbf16>, vector<16x256xf32> -> vector<16x256xf32>
    %62 = arith.addf %57, %61 : vector<16x256xf32>
    %c0_56 = arith.constant 0 : index
    %c34 = arith.constant 34 : index
    %63 = vector.load %arg13[%c0_56, %c34] : memref<16x290xbf16, #tpu.memory_space<vmem>>, vector<16x256xbf16>
    %c0_57 = arith.constant 0 : index
    %c0_58 = arith.constant 0 : index
    %64 = vector.load %arg3[%c0_57, %c0_58] : memref<1x256xbf16, #tpu.memory_space<vmem>>, vector<1x256xbf16>
    %65 = vector.broadcast %64 : vector<1x256xbf16> to vector<16x256xbf16>
    %66 = arith.mulf %63, %65 : vector<16x256xbf16>
    %c8 = arith.constant 8 : index
    %c0_59 = arith.constant 0 : index
    %c0_60 = arith.constant 0 : index
    %67 = vector.load %arg5[%c8, %c0_59, %c0_60] : memref<9x16x16xbf16, #tpu.memory_space<vmem>>, vector<1x16x16xbf16>
    %68 = vector.shape_cast %67 : vector<1x16x16xbf16> to vector<16x16xbf16>
    %cst_61 = arith.constant dense<0.000000e+00> : vector<16x256xf32>
    %69 = tpu.matmul %68, %66, %cst_61 {dimension_numbers = #tpu.dot_dimension_numbers<[1], [0], [0], [1], [0, 0, 1, 1], [], []>} : vector<16x16xbf16>, vector<16x256xbf16>, vector<16x256xf32> -> vector<16x256xf32>
    %70 = arith.addf %62, %69 : vector<16x256xf32>
    %c0_62 = arith.constant 0 : index
    %71 = memref.load %arg6[%c0_62] : memref<1xf32, #tpu.memory_space<smem>>
    %cst_63 = arith.constant 0.000000e+00 : f32
    %72 = vector.broadcast %cst_63 : f32 to vector<16x256xf32>
    %73 = arith.cmpf oge, %70, %72 : vector<16x256xf32>
    %74 = vector.broadcast %71 : f32 to vector<16x256xf32>
    %75 = arith.mulf %74, %70 : vector<16x256xf32>
    %76 = arith.select %73, %70, %75 : vector<16x256xi1>, vector<16x256xf32>
    %77 = arith.truncf %76 : vector<16x256xf32> to vector<16x256xbf16>
    %c0_64 = arith.constant 0 : index
    %c17_65 = arith.constant 17 : index
    %78 = vector.load %arg13[%c0_64, %c17_65] : memref<16x290xbf16, #tpu.memory_space<vmem>>, vector<16x256xbf16>
    tpu.vector_store %arg13[%c0_64, %c17_65], %77 {strides = array<i32>} : memref<16x290xbf16, #tpu.memory_space<vmem>>, vector<16x256xbf16>,
    %cst_66 = arith.constant 0.000000e+00 : f32
    %79 = vector.broadcast %cst_66 : f32 to vector<16x256xf32>
    %c0_67 = arith.constant 0 : index
    %c0_68 = arith.constant 0 : index
    %80 = vector.load %arg13[%c0_67, %c0_68] : memref<16x290xbf16, #tpu.memory_space<vmem>>, vector<16x256xbf16>
    %c0_69 = arith.constant 0 : index
    %c0_70 = arith.constant 0 : index
    %81 = vector.load %arg2[%c0_69, %c0_70] : memref<1x256xbf16, #tpu.memory_space<vmem>>, vector<1x256xbf16>
    %82 = vector.broadcast %81 : vector<1x256xbf16> to vector<16x256xbf16>
    %83 = arith.mulf %80, %82 : vector<16x256xbf16>
    %c0_71 = arith.constant 0 : index
    %c0_72 = arith.constant 0 : index
    %c0_73 = arith.constant 0 : index
    %84 = vector.load %arg7[%c0_71, %c0_72, %c0_73] : memref<9x16x16xbf16, #tpu.memory_space<vmem>>, vector<1x16x16xbf16>
    %85 = vector.shape_cast %84 : vector<1x16x16xbf16> to vector<16x16xbf16>
    %cst_74 = arith.constant dense<0.000000e+00> : vector<16x256xf32>
    %86 = tpu.matmul %85, %83, %cst_74 {dimension_numbers = #tpu.dot_dimension_numbers<[1], [0], [0], [1], [0, 0, 1, 1], [], []>} : vector<16x16xbf16>, vector<16x256xbf16>, vector<16x256xf32> -> vector<16x256xf32>
    %87 = arith.addf %79, %86 : vector<16x256xf32>
    %c0_75 = arith.constant 0 : index
    %c1_76 = arith.constant 1 : index
    %88 = vector.load %arg13[%c0_75, %c1_76] : memref<16x290xbf16, #tpu.memory_space<vmem>>, vector<16x256xbf16>
    %c1_77 = arith.constant 1 : index
    %c0_78 = arith.constant 0 : index
    %c0_79 = arith.constant 0 : index
    %89 = vector.load %arg7[%c1_77, %c0_78, %c0_79] : memref<9x16x16xbf16, #tpu.memory_space<vmem>>, vector<1x16x16xbf16>
    %90 = vector.shape_cast %89 : vector<1x16x16xbf16> to vector<16x16xbf16>
    %cst_80 = arith.constant dense<0.000000e+00> : vector<16x256xf32>
    %91 = tpu.matmul %90, %88, %cst_80 {dimension_numbers = #tpu.dot_dimension_numbers<[1], [0], [0], [1], [0, 0, 1, 1], [], []>} : vector<16x16xbf16>, vector<16x256xbf16>, vector<16x256xf32> -> vector<16x256xf32>
    %92 = arith.addf %87, %91 : vector<16x256xf32>
    %c0_81 = arith.constant 0 : index
    %c2_82 = arith.constant 2 : index
    %93 = vector.load %arg13[%c0_81, %c2_82] : memref<16x290xbf16, #tpu.memory_space<vmem>>, vector<16x256xbf16>
    %c0_83 = arith.constant 0 : index
    %c0_84 = arith.constant 0 : index
    %94 = vector.load %arg3[%c0_83, %c0_84] : memref<1x256xbf16, #tpu.memory_space<vmem>>, vector<1x256xbf16>
    %95 = vector.broadcast %94 : vector<1x256xbf16> to vector<16x256xbf16>
    %96 = arith.mulf %93, %95 : vector<16x256xbf16>
    %c2_85 = arith.constant 2 : index
    %c0_86 = arith.constant 0 : index
    %c0_87 = arith.constant 0 : index
    %97 = vector.load %arg7[%c2_85, %c0_86, %c0_87] : memref<9x16x16xbf16, #tpu.memory_space<vmem>>, vector<1x16x16xbf16>
    %98 = vector.shape_cast %97 : vector<1x16x16xbf16> to vector<16x16xbf16>
    %cst_88 = arith.constant dense<0.000000e+00> : vector<16x256xf32>
    %99 = tpu.matmul %98, %96, %cst_88 {dimension_numbers = #tpu.dot_dimension_numbers<[1], [0], [0], [1], [0, 0, 1, 1], [], []>} : vector<16x16xbf16>, vector<16x256xbf16>, vector<16x256xf32> -> vector<16x256xf32>
    %100 = arith.addf %92, %99 : vector<16x256xf32>
    %c0_89 = arith.constant 0 : index
    %c16_90 = arith.constant 16 : index
    %101 = vector.load %arg13[%c0_89, %c16_90] : memref<16x290xbf16, #tpu.memory_space<vmem>>, vector<16x256xbf16>
    %c0_91 = arith.constant 0 : index
    %c0_92 = arith.constant 0 : index
    %102 = vector.load %arg2[%c0_91, %c0_92] : memref<1x256xbf16, #tpu.memory_space<vmem>>, vector<1x256xbf16>
    %103 = vector.broadcast %102 : vector<1x256xbf16> to vector<16x256xbf16>
    %104 = arith.mulf %101, %103 : vector<16x256xbf16>
    %c3_93 = arith.constant 3 : index
    %c0_94 = arith.constant 0 : index
    %c0_95 = arith.constant 0 : index
    %105 = vector.load %arg7[%c3_93, %c0_94, %c0_95] : memref<9x16x16xbf16, #tpu.memory_space<vmem>>, vector<1x16x16xbf16>
    %106 = vector.shape_cast %105 : vector<1x16x16xbf16> to vector<16x16xbf16>
    %cst_96 = arith.constant dense<0.000000e+00> : vector<16x256xf32>
    %107 = tpu.matmul %106, %104, %cst_96 {dimension_numbers = #tpu.dot_dimension_numbers<[1], [0], [0], [1], [0, 0, 1, 1], [], []>} : vector<16x16xbf16>, vector<16x256xbf16>, vector<16x256xf32> -> vector<16x256xf32>
    %108 = arith.addf %100, %107 : vector<16x256xf32>
    %c0_97 = arith.constant 0 : index
    %c17_98 = arith.constant 17 : index
    %109 = vector.load %arg13[%c0_97, %c17_98] : memref<16x290xbf16, #tpu.memory_space<vmem>>, vector<16x256xbf16>
    %c4_99 = arith.constant 4 : index
    %c0_100 = arith.constant 0 : index
    %c0_101 = arith.constant 0 : index
    %110 = vector.load %arg7[%c4_99, %c0_100, %c0_101] : memref<9x16x16xbf16, #tpu.memory_space<vmem>>, vector<1x16x16xbf16>
    %111 = vector.shape_cast %110 : vector<1x16x16xbf16> to vector<16x16xbf16>
    %cst_102 = arith.constant dense<0.000000e+00> : vector<16x256xf32>
    %112 = tpu.matmul %111, %109, %cst_102 {dimension_numbers = #tpu.dot_dimension_numbers<[1], [0], [0], [1], [0, 0, 1, 1], [], []>} : vector<16x16xbf16>, vector<16x256xbf16>, vector<16x256xf32> -> vector<16x256xf32>
    %113 = arith.addf %108, %112 : vector<16x256xf32>
    %c0_103 = arith.constant 0 : index
    %c18_104 = arith.constant 18 : index
    %114 = vector.load %arg13[%c0_103, %c18_104] : memref<16x290xbf16, #tpu.memory_space<vmem>>, vector<16x256xbf16>
    %c0_105 = arith.constant 0 : index
    %c0_106 = arith.constant 0 : index
    %115 = vector.load %arg3[%c0_105, %c0_106] : memref<1x256xbf16, #tpu.memory_space<vmem>>, vector<1x256xbf16>
    %116 = vector.broadcast %115 : vector<1x256xbf16> to vector<16x256xbf16>
    %117 = arith.mulf %114, %116 : vector<16x256xbf16>
    %c5_107 = arith.constant 5 : index
    %c0_108 = arith.constant 0 : index
    %c0_109 = arith.constant 0 : index
    %118 = vector.load %arg7[%c5_107, %c0_108, %c0_109] : memref<9x16x16xbf16, #tpu.memory_space<vmem>>, vector<1x16x16xbf16>
    %119 = vector.shape_cast %118 : vector<1x16x16xbf16> to vector<16x16xbf16>
    %cst_110 = arith.constant dense<0.000000e+00> : vector<16x256xf32>
    %120 = tpu.matmul %119, %117, %cst_110 {dimension_numbers = #tpu.dot_dimension_numbers<[1], [0], [0], [1], [0, 0, 1, 1], [], []>} : vector<16x16xbf16>, vector<16x256xbf16>, vector<16x256xf32> -> vector<16x256xf32>
    %121 = arith.addf %113, %120 : vector<16x256xf32>
    %c0_111 = arith.constant 0 : index
    %c32_112 = arith.constant 32 : index
    %122 = vector.load %arg13[%c0_111, %c32_112] : memref<16x290xbf16, #tpu.memory_space<vmem>>, vector<16x256xbf16>
    %c0_113 = arith.constant 0 : index
    %c0_114 = arith.constant 0 : index
    %123 = vector.load %arg2[%c0_113, %c0_114] : memref<1x256xbf16, #tpu.memory_space<vmem>>, vector<1x256xbf16>
    %124 = vector.broadcast %123 : vector<1x256xbf16> to vector<16x256xbf16>
    %125 = arith.mulf %122, %124 : vector<16x256xbf16>
    %c6_115 = arith.constant 6 : index
    %c0_116 = arith.constant 0 : index
    %c0_117 = arith.constant 0 : index
    %126 = vector.load %arg7[%c6_115, %c0_116, %c0_117] : memref<9x16x16xbf16, #tpu.memory_space<vmem>>, vector<1x16x16xbf16>
    %127 = vector.shape_cast %126 : vector<1x16x16xbf16> to vector<16x16xbf16>
    %cst_118 = arith.constant dense<0.000000e+00> : vector<16x256xf32>
    %128 = tpu.matmul %127, %125, %cst_118 {dimension_numbers = #tpu.dot_dimension_numbers<[1], [0], [0], [1], [0, 0, 1, 1], [], []>} : vector<16x16xbf16>, vector<16x256xbf16>, vector<16x256xf32> -> vector<16x256xf32>
    %129 = arith.addf %121, %128 : vector<16x256xf32>
    %c0_119 = arith.constant 0 : index
    %c33_120 = arith.constant 33 : index
    %130 = vector.load %arg13[%c0_119, %c33_120] : memref<16x290xbf16, #tpu.memory_space<vmem>>, vector<16x256xbf16>
    %c7_121 = arith.constant 7 : index
    %c0_122 = arith.constant 0 : index
    %c0_123 = arith.constant 0 : index
    %131 = vector.load %arg7[%c7_121, %c0_122, %c0_123] : memref<9x16x16xbf16, #tpu.memory_space<vmem>>, vector<1x16x16xbf16>
    %132 = vector.shape_cast %131 : vector<1x16x16xbf16> to vector<16x16xbf16>
    %cst_124 = arith.constant dense<0.000000e+00> : vector<16x256xf32>
    %133 = tpu.matmul %132, %130, %cst_124 {dimension_numbers = #tpu.dot_dimension_numbers<[1], [0], [0], [1], [0, 0, 1, 1], [], []>} : vector<16x16xbf16>, vector<16x256xbf16>, vector<16x256xf32> -> vector<16x256xf32>
    %134 = arith.addf %129, %133 : vector<16x256xf32>
    %c0_125 = arith.constant 0 : index
    %c34_126 = arith.constant 34 : index
    %135 = vector.load %arg13[%c0_125, %c34_126] : memref<16x290xbf16, #tpu.memory_space<vmem>>, vector<16x256xbf16>
    %c0_127 = arith.constant 0 : index
    %c0_128 = arith.constant 0 : index
    %136 = vector.load %arg3[%c0_127, %c0_128] : memref<1x256xbf16, #tpu.memory_space<vmem>>, vector<1x256xbf16>
    %137 = vector.broadcast %136 : vector<1x256xbf16> to vector<16x256xbf16>
    %138 = arith.mulf %135, %137 : vector<16x256xbf16>
    %c8_129 = arith.constant 8 : index
    %c0_130 = arith.constant 0 : index
    %c0_131 = arith.constant 0 : index
    %139 = vector.load %arg7[%c8_129, %c0_130, %c0_131] : memref<9x16x16xbf16, #tpu.memory_space<vmem>>, vector<1x16x16xbf16>
    %140 = vector.shape_cast %139 : vector<1x16x16xbf16> to vector<16x16xbf16>
    %cst_132 = arith.constant dense<0.000000e+00> : vector<16x256xf32>
    %141 = tpu.matmul %140, %138, %cst_132 {dimension_numbers = #tpu.dot_dimension_numbers<[1], [0], [0], [1], [0, 0, 1, 1], [], []>} : vector<16x16xbf16>, vector<16x256xbf16>, vector<16x256xf32> -> vector<16x256xf32>
    %142 = arith.addf %134, %141 : vector<16x256xf32>
    %cst_133 = arith.constant dense<0.000000e+00> : vector<16xf32>
    %143 = vector.multi_reduction <add>, %142, %cst_133 [1] : vector<16x256xf32> to vector<16xf32>
    %144 = vector.shape_cast %143 : vector<16xf32> to vector<16x1xf32>
    %cst_134 = arith.constant 2.560000e+02 : f32
    %145 = vector.broadcast %cst_134 : f32 to vector<16x1xf32>
    %146 = arith.divf %144, %145 : vector<16x1xf32>
    %c0_135 = arith.constant 0 : index
    %c0_136 = arith.constant 0 : index
    %147 = vector.load %arg8[%c0_135, %c0_136] : memref<4x16xf32, #tpu.memory_space<vmem>>, vector<4x16xf32>
    %cst_137 = arith.constant dense<0.000000e+00> : vector<4x1xf32>
    %148 = tpu.matmul %147, %146, %cst_137 {dimension_numbers = #tpu.dot_dimension_numbers<[1], [0], [0], [1], [0, 0, 1, 1], [], []>} : vector<4x16xf32>, vector<16x1xf32>, vector<4x1xf32> -> vector<4x1xf32>
    %c0_138 = arith.constant 0 : index
    %c0_139 = arith.constant 0 : index
    %149 = vector.load %arg9[%c0_138, %c0_139] : memref<4x1xf32, #tpu.memory_space<vmem>>, vector<4x1xf32>
    %150 = arith.addf %148, %149 : vector<4x1xf32>
    %cst_140 = arith.constant 0.000000e+00 : f32
    %151 = vector.broadcast %cst_140 : f32 to vector<4x1xf32>
    %152 = arith.maximumf %150, %151 : vector<4x1xf32>
    %c0_141 = arith.constant 0 : index
    %c0_142 = arith.constant 0 : index
    %153 = vector.load %arg10[%c0_141, %c0_142] : memref<16x4xf32, #tpu.memory_space<vmem>>, vector<16x4xf32>
    %cst_143 = arith.constant dense<0.000000e+00> : vector<16x1xf32>
    %154 = tpu.matmul %153, %152, %cst_143 {dimension_numbers = #tpu.dot_dimension_numbers<[1], [0], [0], [1], [0, 0, 1, 1], [], []>} : vector<16x4xf32>, vector<4x1xf32>, vector<16x1xf32> -> vector<16x1xf32>
    %c0_144 = arith.constant 0 : index
    %c0_145 = arith.constant 0 : index
    %155 = vector.load %arg11[%c0_144, %c0_145] : memref<16x1xf32, #tpu.memory_space<vmem>>, vector<16x1xf32>
    %156 = arith.addf %154, %155 : vector<16x1xf32>
    %157 = arith.negf %156 : vector<16x1xf32>
    %158 = math.exp %157 : vector<16x1xf32>
    %cst_146 = arith.constant 1.000000e+00 : f32
    %159 = vector.broadcast %cst_146 : f32 to vector<16x1xf32>
    %160 = arith.addf %159, %158 : vector<16x1xf32>
    %161 = arith.divf %159, %160 : vector<16x1xf32>
    %162 = vector.broadcast %161 : vector<16x1xf32> to vector<16x256xf32>
    %163 = arith.mulf %142, %162 : vector<16x256xf32>
    %164 = arith.addf %163, %3 : vector<16x256xf32>
    %165 = arith.truncf %164 : vector<16x256xf32> to vector<16x256xbf16>
    %c0_147 = arith.constant 0 : index
    %c0_148 = arith.constant 0 : index
    %c0_149 = arith.constant 0 : index
    %166 = vector.load %arg12[%c0_147, %c0_148, %c0_149] : memref<1x16x256xbf16, #tpu.memory_space<vmem>>, vector<1x16x256xbf16>
    %167 = vector.shape_cast %166 : vector<1x16x256xbf16> to vector<16x256xbf16>
    %168 = vector.shape_cast %165 : vector<16x256xbf16> to vector<1x16x256xbf16>
    tpu.vector_store %arg12[%c0_147, %c0_148, %c0_149], %168 {strides = array<i32>} : memref<1x16x256xbf16, #tpu.memory_space<vmem>>, vector<1x16x256xbf16>,
    return
  }
  func.func @transform_0(%arg0: i32) -> (i32, i32, i32) {
    %c0_i32 = arith.constant 0 : i32
    %c0_i32_0 = arith.constant 0 : i32
    %c0_i32_1 = arith.constant 0 : i32
    return %arg0, %c0_i32, %c0_i32_0 : i32, i32, i32
  }
  func.func @transform_1(%arg0: i32) -> (i32, i32) {
    %c0_i32 = arith.constant 0 : i32
    %c0_i32_0 = arith.constant 0 : i32
    %c0_i32_1 = arith.constant 0 : i32
    return %c0_i32, %c0_i32_0 : i32, i32
  }
  func.func @transform_2(%arg0: i32) -> (i32, i32) {
    %c0_i32 = arith.constant 0 : i32
    %c0_i32_0 = arith.constant 0 : i32
    %c0_i32_1 = arith.constant 0 : i32
    return %c0_i32, %c0_i32_0 : i32, i32
  }
  func.func @transform_3(%arg0: i32) -> (i32, i32) {
    %c0_i32 = arith.constant 0 : i32
    %c0_i32_0 = arith.constant 0 : i32
    %c0_i32_1 = arith.constant 0 : i32
    return %c0_i32, %c0_i32_0 : i32, i32
  }
  func.func @transform_4(%arg0: i32) -> (i32, i32, i32) {
    %c0_i32 = arith.constant 0 : i32
    %c0_i32_0 = arith.constant 0 : i32
    %c0_i32_1 = arith.constant 0 : i32
    %c0_i32_2 = arith.constant 0 : i32
    return %c0_i32, %c0_i32_0, %c0_i32_1 : i32, i32, i32
  }
  func.func @transform_5(%arg0: i32) -> i32 {
    %c0_i32 = arith.constant 0 : i32
    %c0_i32_0 = arith.constant 0 : i32
    return %c0_i32 : i32
  }
  func.func @transform_6(%arg0: i32) -> (i32, i32, i32) {
    %c0_i32 = arith.constant 0 : i32
    %c0_i32_0 = arith.constant 0 : i32
    %c0_i32_1 = arith.constant 0 : i32
    %c0_i32_2 = arith.constant 0 : i32
    return %c0_i32, %c0_i32_0, %c0_i32_1 : i32, i32, i32
  }
  func.func @transform_7(%arg0: i32) -> (i32, i32) {
    %c0_i32 = arith.constant 0 : i32
    %c0_i32_0 = arith.constant 0 : i32
    %c0_i32_1 = arith.constant 0 : i32
    return %c0_i32, %c0_i32_0 : i32, i32
  }
  func.func @transform_8(%arg0: i32) -> (i32, i32) {
    %c0_i32 = arith.constant 0 : i32
    %c0_i32_0 = arith.constant 0 : i32
    %c0_i32_1 = arith.constant 0 : i32
    return %c0_i32, %c0_i32_0 : i32, i32
  }
  func.func @transform_9(%arg0: i32) -> (i32, i32) {
    %c0_i32 = arith.constant 0 : i32
    %c0_i32_0 = arith.constant 0 : i32
    %c0_i32_1 = arith.constant 0 : i32
    return %c0_i32, %c0_i32_0 : i32, i32
  }
  func.func @transform_10(%arg0: i32) -> (i32, i32) {
    %c0_i32 = arith.constant 0 : i32
    %c0_i32_0 = arith.constant 0 : i32
    %c0_i32_1 = arith.constant 0 : i32
    return %c0_i32, %c0_i32_0 : i32, i32
  }
  func.func @transform_11(%arg0: i32) -> (i32, i32, i32) {
    %c0_i32 = arith.constant 0 : i32
    %c0_i32_0 = arith.constant 0 : i32
    %c0_i32_1 = arith.constant 0 : i32
    return %arg0, %c0_i32, %c0_i32_0 : i32, i32, i32
  }
}

module attributes {stable_mosaic.version = 11 : i64} {
  func.func @_conv1x1_kernel(%arg0: i32, %arg1: memref<1x16x64xbf16, #tpu.memory_space<vmem>>, %arg2: memref<24x16xbf16, #tpu.memory_space<vmem>>, %arg3: memref<1x24x64xbf16, #tpu.memory_space<vmem>>) attributes {dimension_semantics = [#tpu.dimension_semantics<parallel>], iteration_bounds = array<i64: 2>, scalar_prefetch = 0 : i64, scratch_operands = 0 : i64, tpu.core_type = #tpu.core_type<tc>, window_params = [{transform_indices = @transform_0, window_bounds = array<i64: 1, 16, 64>}, {pipeline_mode = #tpu.pipeline_mode<synchronous>, transform_indices = @transform_1, window_bounds = array<i64: 24, 16>}, {transform_indices = @transform_2, window_bounds = array<i64: 1, 24, 64>}]} {
    %c0 = arith.constant 0 : index
    %c0_0 = arith.constant 0 : index
    %0 = vector.load %arg2[%c0, %c0_0] : memref<24x16xbf16, #tpu.memory_space<vmem>>, vector<24x16xbf16>
    %c0_1 = arith.constant 0 : index
    %c0_2 = arith.constant 0 : index
    %c0_3 = arith.constant 0 : index
    %1 = vector.load %arg1[%c0_1, %c0_2, %c0_3] : memref<1x16x64xbf16, #tpu.memory_space<vmem>>, vector<1x16x64xbf16>
    %2 = vector.shape_cast %1 : vector<1x16x64xbf16> to vector<16x64xbf16>
    %cst = arith.constant dense<0.000000e+00> : vector<24x64xf32>
    %3 = tpu.matmul %0, %2, %cst {dimension_numbers = #tpu.dot_dimension_numbers<[1], [0], [0], [1], [0, 0, 1, 1], [], []>} : vector<24x16xbf16>, vector<16x64xbf16>, vector<24x64xf32> -> vector<24x64xf32>
    %4 = arith.truncf %3 : vector<24x64xf32> to vector<24x64xbf16>
    %c0_4 = arith.constant 0 : index
    %c0_5 = arith.constant 0 : index
    %c0_6 = arith.constant 0 : index
    %5 = vector.load %arg3[%c0_4, %c0_5, %c0_6] : memref<1x24x64xbf16, #tpu.memory_space<vmem>>, vector<1x24x64xbf16>
    %6 = vector.shape_cast %5 : vector<1x24x64xbf16> to vector<24x64xbf16>
    %7 = vector.shape_cast %4 : vector<24x64xbf16> to vector<1x24x64xbf16>
    tpu.vector_store %arg3[%c0_4, %c0_5, %c0_6], %7 {strides = array<i32>} : memref<1x24x64xbf16, #tpu.memory_space<vmem>>, vector<1x24x64xbf16>,
    return
  }
  func.func @transform_0(%arg0: i32) -> (i32, i32, i32) {
    %c0_i32 = arith.constant 0 : i32
    %c0_i32_0 = arith.constant 0 : i32
    %c0_i32_1 = arith.constant 0 : i32
    return %arg0, %c0_i32, %c0_i32_0 : i32, i32, i32
  }
  func.func @transform_1(%arg0: i32) -> (i32, i32) {
    %c0_i32 = arith.constant 0 : i32
    %c0_i32_0 = arith.constant 0 : i32
    %c0_i32_1 = arith.constant 0 : i32
    return %c0_i32, %c0_i32_0 : i32, i32
  }
  func.func @transform_2(%arg0: i32) -> (i32, i32, i32) {
    %c0_i32 = arith.constant 0 : i32
    %c0_i32_0 = arith.constant 0 : i32
    %c0_i32_1 = arith.constant 0 : i32
    return %arg0, %c0_i32, %c0_i32_0 : i32, i32, i32
  }
}

module attributes {stable_mosaic.version = 11 : i64} {
  func.func @_ed_block_kernel(%arg0: i32, %arg1: memref<1x24x64xbf16, #tpu.memory_space<vmem>>, %arg2: memref<1x64xbf16, #tpu.memory_space<vmem>>, %arg3: memref<1x64xbf16, #tpu.memory_space<vmem>>, %arg4: memref<24x24xbf16, #tpu.memory_space<vmem>>, %arg5: memref<9x24x24xbf16, #tpu.memory_space<vmem>>, %arg6: memref<1xf32, #tpu.memory_space<smem>>, %arg7: memref<9x24x24xbf16, #tpu.memory_space<vmem>>, %arg8: memref<6x24xf32, #tpu.memory_space<vmem>>, %arg9: memref<6x1xf32, #tpu.memory_space<vmem>>, %arg10: memref<24x6xf32, #tpu.memory_space<vmem>>, %arg11: memref<24x1xf32, #tpu.memory_space<vmem>>, %arg12: memref<1x24x64xbf16, #tpu.memory_space<vmem>>, %arg13: memref<24x82xbf16, #tpu.memory_space<vmem>>) attributes {dimension_semantics = [#tpu.dimension_semantics<parallel>], iteration_bounds = array<i64: 2>, scalar_prefetch = 0 : i64, scratch_operands = 1 : i64, tpu.core_type = #tpu.core_type<tc>, window_params = [{transform_indices = @transform_0, window_bounds = array<i64: 1, 24, 64>}, {pipeline_mode = #tpu.pipeline_mode<synchronous>, transform_indices = @transform_1, window_bounds = array<i64: 1, 64>}, {pipeline_mode = #tpu.pipeline_mode<synchronous>, transform_indices = @transform_2, window_bounds = array<i64: 1, 64>}, {pipeline_mode = #tpu.pipeline_mode<synchronous>, transform_indices = @transform_3, window_bounds = array<i64: 24, 24>}, {pipeline_mode = #tpu.pipeline_mode<synchronous>, transform_indices = @transform_4, window_bounds = array<i64: 9, 24, 24>}, {transform_indices = @transform_5, window_bounds = array<i64: 1>}, {pipeline_mode = #tpu.pipeline_mode<synchronous>, transform_indices = @transform_6, window_bounds = array<i64: 9, 24, 24>}, {pipeline_mode = #tpu.pipeline_mode<synchronous>, transform_indices = @transform_7, window_bounds = array<i64: 6, 24>}, {pipeline_mode = #tpu.pipeline_mode<synchronous>, transform_indices = @transform_8, window_bounds = array<i64: 6, 1>}, {pipeline_mode = #tpu.pipeline_mode<synchronous>, transform_indices = @transform_9, window_bounds = array<i64: 24, 6>}, {pipeline_mode = #tpu.pipeline_mode<synchronous>, transform_indices = @transform_10, window_bounds = array<i64: 24, 1>}, {transform_indices = @transform_11, window_bounds = array<i64: 1, 24, 64>}]} {
    %c0 = arith.constant 0 : index
    %c0_0 = arith.constant 0 : index
    %c0_1 = arith.constant 0 : index
    %0 = vector.load %arg1[%c0, %c0_0, %c0_1] : memref<1x24x64xbf16, #tpu.memory_space<vmem>>, vector<1x24x64xbf16>
    %1 = vector.shape_cast %0 : vector<1x24x64xbf16> to vector<24x64xbf16>
    %c0_2 = arith.constant 0 : index
    %c0_3 = arith.constant 0 : index
    %2 = vector.load %arg4[%c0_2, %c0_3] : memref<24x24xbf16, #tpu.memory_space<vmem>>, vector<24x24xbf16>
    %cst = arith.constant dense<0.000000e+00> : vector<24x64xf32>
    %3 = tpu.matmul %2, %1, %cst {dimension_numbers = #tpu.dot_dimension_numbers<[1], [0], [0], [1], [0, 0, 1, 1], [], []>} : vector<24x24xbf16>, vector<24x64xbf16>, vector<24x64xf32> -> vector<24x64xf32>
    %cst_4 = arith.constant 0.000000e+00 : bf16
    %4 = vector.broadcast %cst_4 : bf16 to vector<24x82xbf16>
    %c0_5 = arith.constant 0 : index
    %c0_6 = arith.constant 0 : index
    %5 = vector.load %arg13[%c0_5, %c0_6] : memref<24x82xbf16, #tpu.memory_space<vmem>>, vector<24x82xbf16>
    tpu.vector_store %arg13[%c0_5, %c0_6], %4 {strides = array<i32>} : memref<24x82xbf16, #tpu.memory_space<vmem>>, vector<24x82xbf16>,
    %c0_7 = arith.constant 0 : index
    %c9 = arith.constant 9 : index
    %6 = vector.load %arg13[%c0_7, %c9] : memref<24x82xbf16, #tpu.memory_space<vmem>>, vector<24x64xbf16>
    tpu.vector_store %arg13[%c0_7, %c9], %1 {strides = array<i32>} : memref<24x82xbf16, #tpu.memory_space<vmem>>, vector<24x64xbf16>,
    %cst_8 = arith.constant 0.000000e+00 : f32
    %7 = vector.broadcast %cst_8 : f32 to vector<24x64xf32>
    %c0_9 = arith.constant 0 : index
    %c0_10 = arith.constant 0 : index
    %8 = vector.load %arg13[%c0_9, %c0_10] : memref<24x82xbf16, #tpu.memory_space<vmem>>, vector<24x64xbf16>
    %c0_11 = arith.constant 0 : index
    %c0_12 = arith.constant 0 : index
    %9 = vector.load %arg2[%c0_11, %c0_12] : memref<1x64xbf16, #tpu.memory_space<vmem>>, vector<1x64xbf16>
    %10 = vector.broadcast %9 : vector<1x64xbf16> to vector<24x64xbf16>
    %11 = arith.mulf %8, %10 : vector<24x64xbf16>
    %c0_13 = arith.constant 0 : index
    %c0_14 = arith.constant 0 : index
    %c0_15 = arith.constant 0 : index
    %12 = vector.load %arg5[%c0_13, %c0_14, %c0_15] : memref<9x24x24xbf16, #tpu.memory_space<vmem>>, vector<1x24x24xbf16>
    %13 = vector.shape_cast %12 : vector<1x24x24xbf16> to vector<24x24xbf16>
    %cst_16 = arith.constant dense<0.000000e+00> : vector<24x64xf32>
    %14 = tpu.matmul %13, %11, %cst_16 {dimension_numbers = #tpu.dot_dimension_numbers<[1], [0], [0], [1], [0, 0, 1, 1], [], []>} : vector<24x24xbf16>, vector<24x64xbf16>, vector<24x64xf32> -> vector<24x64xf32>
    %15 = arith.addf %7, %14 : vector<24x64xf32>
    %c0_17 = arith.constant 0 : index
    %c1 = arith.constant 1 : index
    %16 = vector.load %arg13[%c0_17, %c1] : memref<24x82xbf16, #tpu.memory_space<vmem>>, vector<24x64xbf16>
    %c1_18 = arith.constant 1 : index
    %c0_19 = arith.constant 0 : index
    %c0_20 = arith.constant 0 : index
    %17 = vector.load %arg5[%c1_18, %c0_19, %c0_20] : memref<9x24x24xbf16, #tpu.memory_space<vmem>>, vector<1x24x24xbf16>
    %18 = vector.shape_cast %17 : vector<1x24x24xbf16> to vector<24x24xbf16>
    %cst_21 = arith.constant dense<0.000000e+00> : vector<24x64xf32>
    %19 = tpu.matmul %18, %16, %cst_21 {dimension_numbers = #tpu.dot_dimension_numbers<[1], [0], [0], [1], [0, 0, 1, 1], [], []>} : vector<24x24xbf16>, vector<24x64xbf16>, vector<24x64xf32> -> vector<24x64xf32>
    %20 = arith.addf %15, %19 : vector<24x64xf32>
    %c0_22 = arith.constant 0 : index
    %c2 = arith.constant 2 : index
    %21 = vector.load %arg13[%c0_22, %c2] : memref<24x82xbf16, #tpu.memory_space<vmem>>, vector<24x64xbf16>
    %c0_23 = arith.constant 0 : index
    %c0_24 = arith.constant 0 : index
    %22 = vector.load %arg3[%c0_23, %c0_24] : memref<1x64xbf16, #tpu.memory_space<vmem>>, vector<1x64xbf16>
    %23 = vector.broadcast %22 : vector<1x64xbf16> to vector<24x64xbf16>
    %24 = arith.mulf %21, %23 : vector<24x64xbf16>
    %c2_25 = arith.constant 2 : index
    %c0_26 = arith.constant 0 : index
    %c0_27 = arith.constant 0 : index
    %25 = vector.load %arg5[%c2_25, %c0_26, %c0_27] : memref<9x24x24xbf16, #tpu.memory_space<vmem>>, vector<1x24x24xbf16>
    %26 = vector.shape_cast %25 : vector<1x24x24xbf16> to vector<24x24xbf16>
    %cst_28 = arith.constant dense<0.000000e+00> : vector<24x64xf32>
    %27 = tpu.matmul %26, %24, %cst_28 {dimension_numbers = #tpu.dot_dimension_numbers<[1], [0], [0], [1], [0, 0, 1, 1], [], []>} : vector<24x24xbf16>, vector<24x64xbf16>, vector<24x64xf32> -> vector<24x64xf32>
    %28 = arith.addf %20, %27 : vector<24x64xf32>
    %c0_29 = arith.constant 0 : index
    %c8 = arith.constant 8 : index
    %29 = vector.load %arg13[%c0_29, %c8] : memref<24x82xbf16, #tpu.memory_space<vmem>>, vector<24x64xbf16>
    %c0_30 = arith.constant 0 : index
    %c0_31 = arith.constant 0 : index
    %30 = vector.load %arg2[%c0_30, %c0_31] : memref<1x64xbf16, #tpu.memory_space<vmem>>, vector<1x64xbf16>
    %31 = vector.broadcast %30 : vector<1x64xbf16> to vector<24x64xbf16>
    %32 = arith.mulf %29, %31 : vector<24x64xbf16>
    %c3 = arith.constant 3 : index
    %c0_32 = arith.constant 0 : index
    %c0_33 = arith.constant 0 : index
    %33 = vector.load %arg5[%c3, %c0_32, %c0_33] : memref<9x24x24xbf16, #tpu.memory_space<vmem>>, vector<1x24x24xbf16>
    %34 = vector.shape_cast %33 : vector<1x24x24xbf16> to vector<24x24xbf16>
    %cst_34 = arith.constant dense<0.000000e+00> : vector<24x64xf32>
    %35 = tpu.matmul %34, %32, %cst_34 {dimension_numbers = #tpu.dot_dimension_numbers<[1], [0], [0], [1], [0, 0, 1, 1], [], []>} : vector<24x24xbf16>, vector<24x64xbf16>, vector<24x64xf32> -> vector<24x64xf32>
    %36 = arith.addf %28, %35 : vector<24x64xf32>
    %c0_35 = arith.constant 0 : index
    %c9_36 = arith.constant 9 : index
    %37 = vector.load %arg13[%c0_35, %c9_36] : memref<24x82xbf16, #tpu.memory_space<vmem>>, vector<24x64xbf16>
    %c4 = arith.constant 4 : index
    %c0_37 = arith.constant 0 : index
    %c0_38 = arith.constant 0 : index
    %38 = vector.load %arg5[%c4, %c0_37, %c0_38] : memref<9x24x24xbf16, #tpu.memory_space<vmem>>, vector<1x24x24xbf16>
    %39 = vector.shape_cast %38 : vector<1x24x24xbf16> to vector<24x24xbf16>
    %cst_39 = arith.constant dense<0.000000e+00> : vector<24x64xf32>
    %40 = tpu.matmul %39, %37, %cst_39 {dimension_numbers = #tpu.dot_dimension_numbers<[1], [0], [0], [1], [0, 0, 1, 1], [], []>} : vector<24x24xbf16>, vector<24x64xbf16>, vector<24x64xf32> -> vector<24x64xf32>
    %41 = arith.addf %36, %40 : vector<24x64xf32>
    %c0_40 = arith.constant 0 : index
    %c10 = arith.constant 10 : index
    %42 = vector.load %arg13[%c0_40, %c10] : memref<24x82xbf16, #tpu.memory_space<vmem>>, vector<24x64xbf16>
    %c0_41 = arith.constant 0 : index
    %c0_42 = arith.constant 0 : index
    %43 = vector.load %arg3[%c0_41, %c0_42] : memref<1x64xbf16, #tpu.memory_space<vmem>>, vector<1x64xbf16>
    %44 = vector.broadcast %43 : vector<1x64xbf16> to vector<24x64xbf16>
    %45 = arith.mulf %42, %44 : vector<24x64xbf16>
    %c5 = arith.constant 5 : index
    %c0_43 = arith.constant 0 : index
    %c0_44 = arith.constant 0 : index
    %46 = vector.load %arg5[%c5, %c0_43, %c0_44] : memref<9x24x24xbf16, #tpu.memory_space<vmem>>, vector<1x24x24xbf16>
    %47 = vector.shape_cast %46 : vector<1x24x24xbf16> to vector<24x24xbf16>
    %cst_45 = arith.constant dense<0.000000e+00> : vector<24x64xf32>
    %48 = tpu.matmul %47, %45, %cst_45 {dimension_numbers = #tpu.dot_dimension_numbers<[1], [0], [0], [1], [0, 0, 1, 1], [], []>} : vector<24x24xbf16>, vector<24x64xbf16>, vector<24x64xf32> -> vector<24x64xf32>
    %49 = arith.addf %41, %48 : vector<24x64xf32>
    %c0_46 = arith.constant 0 : index
    %c16 = arith.constant 16 : index
    %50 = vector.load %arg13[%c0_46, %c16] : memref<24x82xbf16, #tpu.memory_space<vmem>>, vector<24x64xbf16>
    %c0_47 = arith.constant 0 : index
    %c0_48 = arith.constant 0 : index
    %51 = vector.load %arg2[%c0_47, %c0_48] : memref<1x64xbf16, #tpu.memory_space<vmem>>, vector<1x64xbf16>
    %52 = vector.broadcast %51 : vector<1x64xbf16> to vector<24x64xbf16>
    %53 = arith.mulf %50, %52 : vector<24x64xbf16>
    %c6 = arith.constant 6 : index
    %c0_49 = arith.constant 0 : index
    %c0_50 = arith.constant 0 : index
    %54 = vector.load %arg5[%c6, %c0_49, %c0_50] : memref<9x24x24xbf16, #tpu.memory_space<vmem>>, vector<1x24x24xbf16>
    %55 = vector.shape_cast %54 : vector<1x24x24xbf16> to vector<24x24xbf16>
    %cst_51 = arith.constant dense<0.000000e+00> : vector<24x64xf32>
    %56 = tpu.matmul %55, %53, %cst_51 {dimension_numbers = #tpu.dot_dimension_numbers<[1], [0], [0], [1], [0, 0, 1, 1], [], []>} : vector<24x24xbf16>, vector<24x64xbf16>, vector<24x64xf32> -> vector<24x64xf32>
    %57 = arith.addf %49, %56 : vector<24x64xf32>
    %c0_52 = arith.constant 0 : index
    %c17 = arith.constant 17 : index
    %58 = vector.load %arg13[%c0_52, %c17] : memref<24x82xbf16, #tpu.memory_space<vmem>>, vector<24x64xbf16>
    %c7 = arith.constant 7 : index
    %c0_53 = arith.constant 0 : index
    %c0_54 = arith.constant 0 : index
    %59 = vector.load %arg5[%c7, %c0_53, %c0_54] : memref<9x24x24xbf16, #tpu.memory_space<vmem>>, vector<1x24x24xbf16>
    %60 = vector.shape_cast %59 : vector<1x24x24xbf16> to vector<24x24xbf16>
    %cst_55 = arith.constant dense<0.000000e+00> : vector<24x64xf32>
    %61 = tpu.matmul %60, %58, %cst_55 {dimension_numbers = #tpu.dot_dimension_numbers<[1], [0], [0], [1], [0, 0, 1, 1], [], []>} : vector<24x24xbf16>, vector<24x64xbf16>, vector<24x64xf32> -> vector<24x64xf32>
    %62 = arith.addf %57, %61 : vector<24x64xf32>
    %c0_56 = arith.constant 0 : index
    %c18 = arith.constant 18 : index
    %63 = vector.load %arg13[%c0_56, %c18] : memref<24x82xbf16, #tpu.memory_space<vmem>>, vector<24x64xbf16>
    %c0_57 = arith.constant 0 : index
    %c0_58 = arith.constant 0 : index
    %64 = vector.load %arg3[%c0_57, %c0_58] : memref<1x64xbf16, #tpu.memory_space<vmem>>, vector<1x64xbf16>
    %65 = vector.broadcast %64 : vector<1x64xbf16> to vector<24x64xbf16>
    %66 = arith.mulf %63, %65 : vector<24x64xbf16>
    %c8_59 = arith.constant 8 : index
    %c0_60 = arith.constant 0 : index
    %c0_61 = arith.constant 0 : index
    %67 = vector.load %arg5[%c8_59, %c0_60, %c0_61] : memref<9x24x24xbf16, #tpu.memory_space<vmem>>, vector<1x24x24xbf16>
    %68 = vector.shape_cast %67 : vector<1x24x24xbf16> to vector<24x24xbf16>
    %cst_62 = arith.constant dense<0.000000e+00> : vector<24x64xf32>
    %69 = tpu.matmul %68, %66, %cst_62 {dimension_numbers = #tpu.dot_dimension_numbers<[1], [0], [0], [1], [0, 0, 1, 1], [], []>} : vector<24x24xbf16>, vector<24x64xbf16>, vector<24x64xf32> -> vector<24x64xf32>
    %70 = arith.addf %62, %69 : vector<24x64xf32>
    %c0_63 = arith.constant 0 : index
    %71 = memref.load %arg6[%c0_63] : memref<1xf32, #tpu.memory_space<smem>>
    %cst_64 = arith.constant 0.000000e+00 : f32
    %72 = vector.broadcast %cst_64 : f32 to vector<24x64xf32>
    %73 = arith.cmpf oge, %70, %72 : vector<24x64xf32>
    %74 = vector.broadcast %71 : f32 to vector<24x64xf32>
    %75 = arith.mulf %74, %70 : vector<24x64xf32>
    %76 = arith.select %73, %70, %75 : vector<24x64xi1>, vector<24x64xf32>
    %77 = arith.truncf %76 : vector<24x64xf32> to vector<24x64xbf16>
    %c0_65 = arith.constant 0 : index
    %c9_66 = arith.constant 9 : index
    %78 = vector.load %arg13[%c0_65, %c9_66] : memref<24x82xbf16, #tpu.memory_space<vmem>>, vector<24x64xbf16>
    tpu.vector_store %arg13[%c0_65, %c9_66], %77 {strides = array<i32>} : memref<24x82xbf16, #tpu.memory_space<vmem>>, vector<24x64xbf16>,
    %cst_67 = arith.constant 0.000000e+00 : f32
    %79 = vector.broadcast %cst_67 : f32 to vector<24x64xf32>
    %c0_68 = arith.constant 0 : index
    %c0_69 = arith.constant 0 : index
    %80 = vector.load %arg13[%c0_68, %c0_69] : memref<24x82xbf16, #tpu.memory_space<vmem>>, vector<24x64xbf16>
    %c0_70 = arith.constant 0 : index
    %c0_71 = arith.constant 0 : index
    %81 = vector.load %arg2[%c0_70, %c0_71] : memref<1x64xbf16, #tpu.memory_space<vmem>>, vector<1x64xbf16>
    %82 = vector.broadcast %81 : vector<1x64xbf16> to vector<24x64xbf16>
    %83 = arith.mulf %80, %82 : vector<24x64xbf16>
    %c0_72 = arith.constant 0 : index
    %c0_73 = arith.constant 0 : index
    %c0_74 = arith.constant 0 : index
    %84 = vector.load %arg7[%c0_72, %c0_73, %c0_74] : memref<9x24x24xbf16, #tpu.memory_space<vmem>>, vector<1x24x24xbf16>
    %85 = vector.shape_cast %84 : vector<1x24x24xbf16> to vector<24x24xbf16>
    %cst_75 = arith.constant dense<0.000000e+00> : vector<24x64xf32>
    %86 = tpu.matmul %85, %83, %cst_75 {dimension_numbers = #tpu.dot_dimension_numbers<[1], [0], [0], [1], [0, 0, 1, 1], [], []>} : vector<24x24xbf16>, vector<24x64xbf16>, vector<24x64xf32> -> vector<24x64xf32>
    %87 = arith.addf %79, %86 : vector<24x64xf32>
    %c0_76 = arith.constant 0 : index
    %c1_77 = arith.constant 1 : index
    %88 = vector.load %arg13[%c0_76, %c1_77] : memref<24x82xbf16, #tpu.memory_space<vmem>>, vector<24x64xbf16>
    %c1_78 = arith.constant 1 : index
    %c0_79 = arith.constant 0 : index
    %c0_80 = arith.constant 0 : index
    %89 = vector.load %arg7[%c1_78, %c0_79, %c0_80] : memref<9x24x24xbf16, #tpu.memory_space<vmem>>, vector<1x24x24xbf16>
    %90 = vector.shape_cast %89 : vector<1x24x24xbf16> to vector<24x24xbf16>
    %cst_81 = arith.constant dense<0.000000e+00> : vector<24x64xf32>
    %91 = tpu.matmul %90, %88, %cst_81 {dimension_numbers = #tpu.dot_dimension_numbers<[1], [0], [0], [1], [0, 0, 1, 1], [], []>} : vector<24x24xbf16>, vector<24x64xbf16>, vector<24x64xf32> -> vector<24x64xf32>
    %92 = arith.addf %87, %91 : vector<24x64xf32>
    %c0_82 = arith.constant 0 : index
    %c2_83 = arith.constant 2 : index
    %93 = vector.load %arg13[%c0_82, %c2_83] : memref<24x82xbf16, #tpu.memory_space<vmem>>, vector<24x64xbf16>
    %c0_84 = arith.constant 0 : index
    %c0_85 = arith.constant 0 : index
    %94 = vector.load %arg3[%c0_84, %c0_85] : memref<1x64xbf16, #tpu.memory_space<vmem>>, vector<1x64xbf16>
    %95 = vector.broadcast %94 : vector<1x64xbf16> to vector<24x64xbf16>
    %96 = arith.mulf %93, %95 : vector<24x64xbf16>
    %c2_86 = arith.constant 2 : index
    %c0_87 = arith.constant 0 : index
    %c0_88 = arith.constant 0 : index
    %97 = vector.load %arg7[%c2_86, %c0_87, %c0_88] : memref<9x24x24xbf16, #tpu.memory_space<vmem>>, vector<1x24x24xbf16>
    %98 = vector.shape_cast %97 : vector<1x24x24xbf16> to vector<24x24xbf16>
    %cst_89 = arith.constant dense<0.000000e+00> : vector<24x64xf32>
    %99 = tpu.matmul %98, %96, %cst_89 {dimension_numbers = #tpu.dot_dimension_numbers<[1], [0], [0], [1], [0, 0, 1, 1], [], []>} : vector<24x24xbf16>, vector<24x64xbf16>, vector<24x64xf32> -> vector<24x64xf32>
    %100 = arith.addf %92, %99 : vector<24x64xf32>
    %c0_90 = arith.constant 0 : index
    %c8_91 = arith.constant 8 : index
    %101 = vector.load %arg13[%c0_90, %c8_91] : memref<24x82xbf16, #tpu.memory_space<vmem>>, vector<24x64xbf16>
    %c0_92 = arith.constant 0 : index
    %c0_93 = arith.constant 0 : index
    %102 = vector.load %arg2[%c0_92, %c0_93] : memref<1x64xbf16, #tpu.memory_space<vmem>>, vector<1x64xbf16>
    %103 = vector.broadcast %102 : vector<1x64xbf16> to vector<24x64xbf16>
    %104 = arith.mulf %101, %103 : vector<24x64xbf16>
    %c3_94 = arith.constant 3 : index
    %c0_95 = arith.constant 0 : index
    %c0_96 = arith.constant 0 : index
    %105 = vector.load %arg7[%c3_94, %c0_95, %c0_96] : memref<9x24x24xbf16, #tpu.memory_space<vmem>>, vector<1x24x24xbf16>
    %106 = vector.shape_cast %105 : vector<1x24x24xbf16> to vector<24x24xbf16>
    %cst_97 = arith.constant dense<0.000000e+00> : vector<24x64xf32>
    %107 = tpu.matmul %106, %104, %cst_97 {dimension_numbers = #tpu.dot_dimension_numbers<[1], [0], [0], [1], [0, 0, 1, 1], [], []>} : vector<24x24xbf16>, vector<24x64xbf16>, vector<24x64xf32> -> vector<24x64xf32>
    %108 = arith.addf %100, %107 : vector<24x64xf32>
    %c0_98 = arith.constant 0 : index
    %c9_99 = arith.constant 9 : index
    %109 = vector.load %arg13[%c0_98, %c9_99] : memref<24x82xbf16, #tpu.memory_space<vmem>>, vector<24x64xbf16>
    %c4_100 = arith.constant 4 : index
    %c0_101 = arith.constant 0 : index
    %c0_102 = arith.constant 0 : index
    %110 = vector.load %arg7[%c4_100, %c0_101, %c0_102] : memref<9x24x24xbf16, #tpu.memory_space<vmem>>, vector<1x24x24xbf16>
    %111 = vector.shape_cast %110 : vector<1x24x24xbf16> to vector<24x24xbf16>
    %cst_103 = arith.constant dense<0.000000e+00> : vector<24x64xf32>
    %112 = tpu.matmul %111, %109, %cst_103 {dimension_numbers = #tpu.dot_dimension_numbers<[1], [0], [0], [1], [0, 0, 1, 1], [], []>} : vector<24x24xbf16>, vector<24x64xbf16>, vector<24x64xf32> -> vector<24x64xf32>
    %113 = arith.addf %108, %112 : vector<24x64xf32>
    %c0_104 = arith.constant 0 : index
    %c10_105 = arith.constant 10 : index
    %114 = vector.load %arg13[%c0_104, %c10_105] : memref<24x82xbf16, #tpu.memory_space<vmem>>, vector<24x64xbf16>
    %c0_106 = arith.constant 0 : index
    %c0_107 = arith.constant 0 : index
    %115 = vector.load %arg3[%c0_106, %c0_107] : memref<1x64xbf16, #tpu.memory_space<vmem>>, vector<1x64xbf16>
    %116 = vector.broadcast %115 : vector<1x64xbf16> to vector<24x64xbf16>
    %117 = arith.mulf %114, %116 : vector<24x64xbf16>
    %c5_108 = arith.constant 5 : index
    %c0_109 = arith.constant 0 : index
    %c0_110 = arith.constant 0 : index
    %118 = vector.load %arg7[%c5_108, %c0_109, %c0_110] : memref<9x24x24xbf16, #tpu.memory_space<vmem>>, vector<1x24x24xbf16>
    %119 = vector.shape_cast %118 : vector<1x24x24xbf16> to vector<24x24xbf16>
    %cst_111 = arith.constant dense<0.000000e+00> : vector<24x64xf32>
    %120 = tpu.matmul %119, %117, %cst_111 {dimension_numbers = #tpu.dot_dimension_numbers<[1], [0], [0], [1], [0, 0, 1, 1], [], []>} : vector<24x24xbf16>, vector<24x64xbf16>, vector<24x64xf32> -> vector<24x64xf32>
    %121 = arith.addf %113, %120 : vector<24x64xf32>
    %c0_112 = arith.constant 0 : index
    %c16_113 = arith.constant 16 : index
    %122 = vector.load %arg13[%c0_112, %c16_113] : memref<24x82xbf16, #tpu.memory_space<vmem>>, vector<24x64xbf16>
    %c0_114 = arith.constant 0 : index
    %c0_115 = arith.constant 0 : index
    %123 = vector.load %arg2[%c0_114, %c0_115] : memref<1x64xbf16, #tpu.memory_space<vmem>>, vector<1x64xbf16>
    %124 = vector.broadcast %123 : vector<1x64xbf16> to vector<24x64xbf16>
    %125 = arith.mulf %122, %124 : vector<24x64xbf16>
    %c6_116 = arith.constant 6 : index
    %c0_117 = arith.constant 0 : index
    %c0_118 = arith.constant 0 : index
    %126 = vector.load %arg7[%c6_116, %c0_117, %c0_118] : memref<9x24x24xbf16, #tpu.memory_space<vmem>>, vector<1x24x24xbf16>
    %127 = vector.shape_cast %126 : vector<1x24x24xbf16> to vector<24x24xbf16>
    %cst_119 = arith.constant dense<0.000000e+00> : vector<24x64xf32>
    %128 = tpu.matmul %127, %125, %cst_119 {dimension_numbers = #tpu.dot_dimension_numbers<[1], [0], [0], [1], [0, 0, 1, 1], [], []>} : vector<24x24xbf16>, vector<24x64xbf16>, vector<24x64xf32> -> vector<24x64xf32>
    %129 = arith.addf %121, %128 : vector<24x64xf32>
    %c0_120 = arith.constant 0 : index
    %c17_121 = arith.constant 17 : index
    %130 = vector.load %arg13[%c0_120, %c17_121] : memref<24x82xbf16, #tpu.memory_space<vmem>>, vector<24x64xbf16>
    %c7_122 = arith.constant 7 : index
    %c0_123 = arith.constant 0 : index
    %c0_124 = arith.constant 0 : index
    %131 = vector.load %arg7[%c7_122, %c0_123, %c0_124] : memref<9x24x24xbf16, #tpu.memory_space<vmem>>, vector<1x24x24xbf16>
    %132 = vector.shape_cast %131 : vector<1x24x24xbf16> to vector<24x24xbf16>
    %cst_125 = arith.constant dense<0.000000e+00> : vector<24x64xf32>
    %133 = tpu.matmul %132, %130, %cst_125 {dimension_numbers = #tpu.dot_dimension_numbers<[1], [0], [0], [1], [0, 0, 1, 1], [], []>} : vector<24x24xbf16>, vector<24x64xbf16>, vector<24x64xf32> -> vector<24x64xf32>
    %134 = arith.addf %129, %133 : vector<24x64xf32>
    %c0_126 = arith.constant 0 : index
    %c18_127 = arith.constant 18 : index
    %135 = vector.load %arg13[%c0_126, %c18_127] : memref<24x82xbf16, #tpu.memory_space<vmem>>, vector<24x64xbf16>
    %c0_128 = arith.constant 0 : index
    %c0_129 = arith.constant 0 : index
    %136 = vector.load %arg3[%c0_128, %c0_129] : memref<1x64xbf16, #tpu.memory_space<vmem>>, vector<1x64xbf16>
    %137 = vector.broadcast %136 : vector<1x64xbf16> to vector<24x64xbf16>
    %138 = arith.mulf %135, %137 : vector<24x64xbf16>
    %c8_130 = arith.constant 8 : index
    %c0_131 = arith.constant 0 : index
    %c0_132 = arith.constant 0 : index
    %139 = vector.load %arg7[%c8_130, %c0_131, %c0_132] : memref<9x24x24xbf16, #tpu.memory_space<vmem>>, vector<1x24x24xbf16>
    %140 = vector.shape_cast %139 : vector<1x24x24xbf16> to vector<24x24xbf16>
    %cst_133 = arith.constant dense<0.000000e+00> : vector<24x64xf32>
    %141 = tpu.matmul %140, %138, %cst_133 {dimension_numbers = #tpu.dot_dimension_numbers<[1], [0], [0], [1], [0, 0, 1, 1], [], []>} : vector<24x24xbf16>, vector<24x64xbf16>, vector<24x64xf32> -> vector<24x64xf32>
    %142 = arith.addf %134, %141 : vector<24x64xf32>
    %cst_134 = arith.constant dense<0.000000e+00> : vector<24xf32>
    %143 = vector.multi_reduction <add>, %142, %cst_134 [1] : vector<24x64xf32> to vector<24xf32>
    %144 = vector.shape_cast %143 : vector<24xf32> to vector<24x1xf32>
    %cst_135 = arith.constant 6.400000e+01 : f32
    %145 = vector.broadcast %cst_135 : f32 to vector<24x1xf32>
    %146 = arith.divf %144, %145 : vector<24x1xf32>
    %c0_136 = arith.constant 0 : index
    %c0_137 = arith.constant 0 : index
    %147 = vector.load %arg8[%c0_136, %c0_137] : memref<6x24xf32, #tpu.memory_space<vmem>>, vector<6x24xf32>
    %cst_138 = arith.constant dense<0.000000e+00> : vector<6x1xf32>
    %148 = tpu.matmul %147, %146, %cst_138 {dimension_numbers = #tpu.dot_dimension_numbers<[1], [0], [0], [1], [0, 0, 1, 1], [], []>} : vector<6x24xf32>, vector<24x1xf32>, vector<6x1xf32> -> vector<6x1xf32>
    %c0_139 = arith.constant 0 : index
    %c0_140 = arith.constant 0 : index
    %149 = vector.load %arg9[%c0_139, %c0_140] : memref<6x1xf32, #tpu.memory_space<vmem>>, vector<6x1xf32>
    %150 = arith.addf %148, %149 : vector<6x1xf32>
    %cst_141 = arith.constant 0.000000e+00 : f32
    %151 = vector.broadcast %cst_141 : f32 to vector<6x1xf32>
    %152 = arith.maximumf %150, %151 : vector<6x1xf32>
    %c0_142 = arith.constant 0 : index
    %c0_143 = arith.constant 0 : index
    %153 = vector.load %arg10[%c0_142, %c0_143] : memref<24x6xf32, #tpu.memory_space<vmem>>, vector<24x6xf32>
    %cst_144 = arith.constant dense<0.000000e+00> : vector<24x1xf32>
    %154 = tpu.matmul %153, %152, %cst_144 {dimension_numbers = #tpu.dot_dimension_numbers<[1], [0], [0], [1], [0, 0, 1, 1], [], []>} : vector<24x6xf32>, vector<6x1xf32>, vector<24x1xf32> -> vector<24x1xf32>
    %c0_145 = arith.constant 0 : index
    %c0_146 = arith.constant 0 : index
    %155 = vector.load %arg11[%c0_145, %c0_146] : memref<24x1xf32, #tpu.memory_space<vmem>>, vector<24x1xf32>
    %156 = arith.addf %154, %155 : vector<24x1xf32>
    %157 = arith.negf %156 : vector<24x1xf32>
    %158 = math.exp %157 : vector<24x1xf32>
    %cst_147 = arith.constant 1.000000e+00 : f32
    %159 = vector.broadcast %cst_147 : f32 to vector<24x1xf32>
    %160 = arith.addf %159, %158 : vector<24x1xf32>
    %161 = arith.divf %159, %160 : vector<24x1xf32>
    %162 = vector.broadcast %161 : vector<24x1xf32> to vector<24x64xf32>
    %163 = arith.mulf %142, %162 : vector<24x64xf32>
    %164 = arith.addf %163, %3 : vector<24x64xf32>
    %165 = arith.truncf %164 : vector<24x64xf32> to vector<24x64xbf16>
    %c0_148 = arith.constant 0 : index
    %c0_149 = arith.constant 0 : index
    %c0_150 = arith.constant 0 : index
    %166 = vector.load %arg12[%c0_148, %c0_149, %c0_150] : memref<1x24x64xbf16, #tpu.memory_space<vmem>>, vector<1x24x64xbf16>
    %167 = vector.shape_cast %166 : vector<1x24x64xbf16> to vector<24x64xbf16>
    %168 = vector.shape_cast %165 : vector<24x64xbf16> to vector<1x24x64xbf16>
    tpu.vector_store %arg12[%c0_148, %c0_149, %c0_150], %168 {strides = array<i32>} : memref<1x24x64xbf16, #tpu.memory_space<vmem>>, vector<1x24x64xbf16>,
    return
  }
  func.func @transform_0(%arg0: i32) -> (i32, i32, i32) {
    %c0_i32 = arith.constant 0 : i32
    %c0_i32_0 = arith.constant 0 : i32
    %c0_i32_1 = arith.constant 0 : i32
    return %arg0, %c0_i32, %c0_i32_0 : i32, i32, i32
  }
  func.func @transform_1(%arg0: i32) -> (i32, i32) {
    %c0_i32 = arith.constant 0 : i32
    %c0_i32_0 = arith.constant 0 : i32
    %c0_i32_1 = arith.constant 0 : i32
    return %c0_i32, %c0_i32_0 : i32, i32
  }
  func.func @transform_2(%arg0: i32) -> (i32, i32) {
    %c0_i32 = arith.constant 0 : i32
    %c0_i32_0 = arith.constant 0 : i32
    %c0_i32_1 = arith.constant 0 : i32
    return %c0_i32, %c0_i32_0 : i32, i32
  }
  func.func @transform_3(%arg0: i32) -> (i32, i32) {
    %c0_i32 = arith.constant 0 : i32
    %c0_i32_0 = arith.constant 0 : i32
    %c0_i32_1 = arith.constant 0 : i32
    return %c0_i32, %c0_i32_0 : i32, i32
  }
  func.func @transform_4(%arg0: i32) -> (i32, i32, i32) {
    %c0_i32 = arith.constant 0 : i32
    %c0_i32_0 = arith.constant 0 : i32
    %c0_i32_1 = arith.constant 0 : i32
    %c0_i32_2 = arith.constant 0 : i32
    return %c0_i32, %c0_i32_0, %c0_i32_1 : i32, i32, i32
  }
  func.func @transform_5(%arg0: i32) -> i32 {
    %c0_i32 = arith.constant 0 : i32
    %c0_i32_0 = arith.constant 0 : i32
    return %c0_i32 : i32
  }
  func.func @transform_6(%arg0: i32) -> (i32, i32, i32) {
    %c0_i32 = arith.constant 0 : i32
    %c0_i32_0 = arith.constant 0 : i32
    %c0_i32_1 = arith.constant 0 : i32
    %c0_i32_2 = arith.constant 0 : i32
    return %c0_i32, %c0_i32_0, %c0_i32_1 : i32, i32, i32
  }
  func.func @transform_7(%arg0: i32) -> (i32, i32) {
    %c0_i32 = arith.constant 0 : i32
    %c0_i32_0 = arith.constant 0 : i32
    %c0_i32_1 = arith.constant 0 : i32
    return %c0_i32, %c0_i32_0 : i32, i32
  }
  func.func @transform_8(%arg0: i32) -> (i32, i32) {
    %c0_i32 = arith.constant 0 : i32
    %c0_i32_0 = arith.constant 0 : i32
    %c0_i32_1 = arith.constant 0 : i32
    return %c0_i32, %c0_i32_0 : i32, i32
  }
  func.func @transform_9(%arg0: i32) -> (i32, i32) {
    %c0_i32 = arith.constant 0 : i32
    %c0_i32_0 = arith.constant 0 : i32
    %c0_i32_1 = arith.constant 0 : i32
    return %c0_i32, %c0_i32_0 : i32, i32
  }
  func.func @transform_10(%arg0: i32) -> (i32, i32) {
    %c0_i32 = arith.constant 0 : i32
    %c0_i32_0 = arith.constant 0 : i32
    %c0_i32_1 = arith.constant 0 : i32
    return %c0_i32, %c0_i32_0 : i32, i32
  }
  func.func @transform_11(%arg0: i32) -> (i32, i32, i32) {
    %c0_i32 = arith.constant 0 : i32
    %c0_i32_0 = arith.constant 0 : i32
    %c0_i32_1 = arith.constant 0 : i32
    return %arg0, %c0_i32, %c0_i32_0 : i32, i32, i32
  }
}

module attributes {stable_mosaic.version = 11 : i64} {
  func.func @_conv1x1_kernel(%arg0: i32, %arg1: memref<1x24x16xbf16, #tpu.memory_space<vmem>>, %arg2: memref<32x24xbf16, #tpu.memory_space<vmem>>, %arg3: memref<1x32x16xbf16, #tpu.memory_space<vmem>>) attributes {dimension_semantics = [#tpu.dimension_semantics<parallel>], iteration_bounds = array<i64: 2>, scalar_prefetch = 0 : i64, scratch_operands = 0 : i64, tpu.core_type = #tpu.core_type<tc>, window_params = [{transform_indices = @transform_0, window_bounds = array<i64: 1, 24, 16>}, {pipeline_mode = #tpu.pipeline_mode<synchronous>, transform_indices = @transform_1, window_bounds = array<i64: 32, 24>}, {transform_indices = @transform_2, window_bounds = array<i64: 1, 32, 16>}]} {
    %c0 = arith.constant 0 : index
    %c0_0 = arith.constant 0 : index
    %0 = vector.load %arg2[%c0, %c0_0] : memref<32x24xbf16, #tpu.memory_space<vmem>>, vector<32x24xbf16>
    %c0_1 = arith.constant 0 : index
    %c0_2 = arith.constant 0 : index
    %c0_3 = arith.constant 0 : index
    %1 = vector.load %arg1[%c0_1, %c0_2, %c0_3] : memref<1x24x16xbf16, #tpu.memory_space<vmem>>, vector<1x24x16xbf16>
    %2 = vector.shape_cast %1 : vector<1x24x16xbf16> to vector<24x16xbf16>
    %cst = arith.constant dense<0.000000e+00> : vector<32x16xf32>
    %3 = tpu.matmul %0, %2, %cst {dimension_numbers = #tpu.dot_dimension_numbers<[1], [0], [0], [1], [0, 0, 1, 1], [], []>} : vector<32x24xbf16>, vector<24x16xbf16>, vector<32x16xf32> -> vector<32x16xf32>
    %4 = arith.truncf %3 : vector<32x16xf32> to vector<32x16xbf16>
    %c0_4 = arith.constant 0 : index
    %c0_5 = arith.constant 0 : index
    %c0_6 = arith.constant 0 : index
    %5 = vector.load %arg3[%c0_4, %c0_5, %c0_6] : memref<1x32x16xbf16, #tpu.memory_space<vmem>>, vector<1x32x16xbf16>
    %6 = vector.shape_cast %5 : vector<1x32x16xbf16> to vector<32x16xbf16>
    %7 = vector.shape_cast %4 : vector<32x16xbf16> to vector<1x32x16xbf16>
    tpu.vector_store %arg3[%c0_4, %c0_5, %c0_6], %7 {strides = array<i32>} : memref<1x32x16xbf16, #tpu.memory_space<vmem>>, vector<1x32x16xbf16>,
    return
  }
  func.func @transform_0(%arg0: i32) -> (i32, i32, i32) {
    %c0_i32 = arith.constant 0 : i32
    %c0_i32_0 = arith.constant 0 : i32
    %c0_i32_1 = arith.constant 0 : i32
    return %arg0, %c0_i32, %c0_i32_0 : i32, i32, i32
  }
  func.func @transform_1(%arg0: i32) -> (i32, i32) {
    %c0_i32 = arith.constant 0 : i32
    %c0_i32_0 = arith.constant 0 : i32
    %c0_i32_1 = arith.constant 0 : i32
    return %c0_i32, %c0_i32_0 : i32, i32
  }
  func.func @transform_2(%arg0: i32) -> (i32, i32, i32) {
    %c0_i32 = arith.constant 0 : i32
    %c0_i32_0 = arith.constant 0 : i32
    %c0_i32_1 = arith.constant 0 : i32
    return %arg0, %c0_i32, %c0_i32_0 : i32, i32, i32
  }
}

module attributes {stable_mosaic.version = 11 : i64} {
  func.func @_ed_block_kernel(%arg0: i32, %arg1: memref<1x32x16xbf16, #tpu.memory_space<vmem>>, %arg2: memref<1x16xbf16, #tpu.memory_space<vmem>>, %arg3: memref<1x16xbf16, #tpu.memory_space<vmem>>, %arg4: memref<32x32xbf16, #tpu.memory_space<vmem>>, %arg5: memref<9x32x32xbf16, #tpu.memory_space<vmem>>, %arg6: memref<1xf32, #tpu.memory_space<smem>>, %arg7: memref<9x32x32xbf16, #tpu.memory_space<vmem>>, %arg8: memref<8x32xf32, #tpu.memory_space<vmem>>, %arg9: memref<8x1xf32, #tpu.memory_space<vmem>>, %arg10: memref<32x8xf32, #tpu.memory_space<vmem>>, %arg11: memref<32x1xf32, #tpu.memory_space<vmem>>, %arg12: memref<1x32x16xbf16, #tpu.memory_space<vmem>>, %arg13: memref<32x26xbf16, #tpu.memory_space<vmem>>) attributes {dimension_semantics = [#tpu.dimension_semantics<parallel>], iteration_bounds = array<i64: 2>, scalar_prefetch = 0 : i64, scratch_operands = 1 : i64, tpu.core_type = #tpu.core_type<tc>, window_params = [{transform_indices = @transform_0, window_bounds = array<i64: 1, 32, 16>}, {pipeline_mode = #tpu.pipeline_mode<synchronous>, transform_indices = @transform_1, window_bounds = array<i64: 1, 16>}, {pipeline_mode = #tpu.pipeline_mode<synchronous>, transform_indices = @transform_2, window_bounds = array<i64: 1, 16>}, {pipeline_mode = #tpu.pipeline_mode<synchronous>, transform_indices = @transform_3, window_bounds = array<i64: 32, 32>}, {pipeline_mode = #tpu.pipeline_mode<synchronous>, transform_indices = @transform_4, window_bounds = array<i64: 9, 32, 32>}, {transform_indices = @transform_5, window_bounds = array<i64: 1>}, {pipeline_mode = #tpu.pipeline_mode<synchronous>, transform_indices = @transform_6, window_bounds = array<i64: 9, 32, 32>}, {pipeline_mode = #tpu.pipeline_mode<synchronous>, transform_indices = @transform_7, window_bounds = array<i64: 8, 32>}, {pipeline_mode = #tpu.pipeline_mode<synchronous>, transform_indices = @transform_8, window_bounds = array<i64: 8, 1>}, {pipeline_mode = #tpu.pipeline_mode<synchronous>, transform_indices = @transform_9, window_bounds = array<i64: 32, 8>}, {pipeline_mode = #tpu.pipeline_mode<synchronous>, transform_indices = @transform_10, window_bounds = array<i64: 32, 1>}, {transform_indices = @transform_11, window_bounds = array<i64: 1, 32, 16>}]} {
    %c0 = arith.constant 0 : index
    %c0_0 = arith.constant 0 : index
    %c0_1 = arith.constant 0 : index
    %0 = vector.load %arg1[%c0, %c0_0, %c0_1] : memref<1x32x16xbf16, #tpu.memory_space<vmem>>, vector<1x32x16xbf16>
    %1 = vector.shape_cast %0 : vector<1x32x16xbf16> to vector<32x16xbf16>
    %c0_2 = arith.constant 0 : index
    %c0_3 = arith.constant 0 : index
    %2 = vector.load %arg4[%c0_2, %c0_3] : memref<32x32xbf16, #tpu.memory_space<vmem>>, vector<32x32xbf16>
    %cst = arith.constant dense<0.000000e+00> : vector<32x16xf32>
    %3 = tpu.matmul %2, %1, %cst {dimension_numbers = #tpu.dot_dimension_numbers<[1], [0], [0], [1], [0, 0, 1, 1], [], []>} : vector<32x32xbf16>, vector<32x16xbf16>, vector<32x16xf32> -> vector<32x16xf32>
    %cst_4 = arith.constant 0.000000e+00 : bf16
    %4 = vector.broadcast %cst_4 : bf16 to vector<32x26xbf16>
    %c0_5 = arith.constant 0 : index
    %c0_6 = arith.constant 0 : index
    %5 = vector.load %arg13[%c0_5, %c0_6] : memref<32x26xbf16, #tpu.memory_space<vmem>>, vector<32x26xbf16>
    tpu.vector_store %arg13[%c0_5, %c0_6], %4 {strides = array<i32>} : memref<32x26xbf16, #tpu.memory_space<vmem>>, vector<32x26xbf16>,
    %c0_7 = arith.constant 0 : index
    %c5 = arith.constant 5 : index
    %6 = vector.load %arg13[%c0_7, %c5] : memref<32x26xbf16, #tpu.memory_space<vmem>>, vector<32x16xbf16>
    tpu.vector_store %arg13[%c0_7, %c5], %1 {strides = array<i32>} : memref<32x26xbf16, #tpu.memory_space<vmem>>, vector<32x16xbf16>,
    %cst_8 = arith.constant 0.000000e+00 : f32
    %7 = vector.broadcast %cst_8 : f32 to vector<32x16xf32>
    %c0_9 = arith.constant 0 : index
    %c0_10 = arith.constant 0 : index
    %8 = vector.load %arg13[%c0_9, %c0_10] : memref<32x26xbf16, #tpu.memory_space<vmem>>, vector<32x16xbf16>
    %c0_11 = arith.constant 0 : index
    %c0_12 = arith.constant 0 : index
    %9 = vector.load %arg2[%c0_11, %c0_12] : memref<1x16xbf16, #tpu.memory_space<vmem>>, vector<1x16xbf16>
    %10 = vector.broadcast %9 : vector<1x16xbf16> to vector<32x16xbf16>
    %11 = arith.mulf %8, %10 : vector<32x16xbf16>
    %c0_13 = arith.constant 0 : index
    %c0_14 = arith.constant 0 : index
    %c0_15 = arith.constant 0 : index
    %12 = vector.load %arg5[%c0_13, %c0_14, %c0_15] : memref<9x32x32xbf16, #tpu.memory_space<vmem>>, vector<1x32x32xbf16>
    %13 = vector.shape_cast %12 : vector<1x32x32xbf16> to vector<32x32xbf16>
    %cst_16 = arith.constant dense<0.000000e+00> : vector<32x16xf32>
    %14 = tpu.matmul %13, %11, %cst_16 {dimension_numbers = #tpu.dot_dimension_numbers<[1], [0], [0], [1], [0, 0, 1, 1], [], []>} : vector<32x32xbf16>, vector<32x16xbf16>, vector<32x16xf32> -> vector<32x16xf32>
    %15 = arith.addf %7, %14 : vector<32x16xf32>
    %c0_17 = arith.constant 0 : index
    %c1 = arith.constant 1 : index
    %16 = vector.load %arg13[%c0_17, %c1] : memref<32x26xbf16, #tpu.memory_space<vmem>>, vector<32x16xbf16>
    %c1_18 = arith.constant 1 : index
    %c0_19 = arith.constant 0 : index
    %c0_20 = arith.constant 0 : index
    %17 = vector.load %arg5[%c1_18, %c0_19, %c0_20] : memref<9x32x32xbf16, #tpu.memory_space<vmem>>, vector<1x32x32xbf16>
    %18 = vector.shape_cast %17 : vector<1x32x32xbf16> to vector<32x32xbf16>
    %cst_21 = arith.constant dense<0.000000e+00> : vector<32x16xf32>
    %19 = tpu.matmul %18, %16, %cst_21 {dimension_numbers = #tpu.dot_dimension_numbers<[1], [0], [0], [1], [0, 0, 1, 1], [], []>} : vector<32x32xbf16>, vector<32x16xbf16>, vector<32x16xf32> -> vector<32x16xf32>
    %20 = arith.addf %15, %19 : vector<32x16xf32>
    %c0_22 = arith.constant 0 : index
    %c2 = arith.constant 2 : index
    %21 = vector.load %arg13[%c0_22, %c2] : memref<32x26xbf16, #tpu.memory_space<vmem>>, vector<32x16xbf16>
    %c0_23 = arith.constant 0 : index
    %c0_24 = arith.constant 0 : index
    %22 = vector.load %arg3[%c0_23, %c0_24] : memref<1x16xbf16, #tpu.memory_space<vmem>>, vector<1x16xbf16>
    %23 = vector.broadcast %22 : vector<1x16xbf16> to vector<32x16xbf16>
    %24 = arith.mulf %21, %23 : vector<32x16xbf16>
    %c2_25 = arith.constant 2 : index
    %c0_26 = arith.constant 0 : index
    %c0_27 = arith.constant 0 : index
    %25 = vector.load %arg5[%c2_25, %c0_26, %c0_27] : memref<9x32x32xbf16, #tpu.memory_space<vmem>>, vector<1x32x32xbf16>
    %26 = vector.shape_cast %25 : vector<1x32x32xbf16> to vector<32x32xbf16>
    %cst_28 = arith.constant dense<0.000000e+00> : vector<32x16xf32>
    %27 = tpu.matmul %26, %24, %cst_28 {dimension_numbers = #tpu.dot_dimension_numbers<[1], [0], [0], [1], [0, 0, 1, 1], [], []>} : vector<32x32xbf16>, vector<32x16xbf16>, vector<32x16xf32> -> vector<32x16xf32>
    %28 = arith.addf %20, %27 : vector<32x16xf32>
    %c0_29 = arith.constant 0 : index
    %c4 = arith.constant 4 : index
    %29 = vector.load %arg13[%c0_29, %c4] : memref<32x26xbf16, #tpu.memory_space<vmem>>, vector<32x16xbf16>
    %c0_30 = arith.constant 0 : index
    %c0_31 = arith.constant 0 : index
    %30 = vector.load %arg2[%c0_30, %c0_31] : memref<1x16xbf16, #tpu.memory_space<vmem>>, vector<1x16xbf16>
    %31 = vector.broadcast %30 : vector<1x16xbf16> to vector<32x16xbf16>
    %32 = arith.mulf %29, %31 : vector<32x16xbf16>
    %c3 = arith.constant 3 : index
    %c0_32 = arith.constant 0 : index
    %c0_33 = arith.constant 0 : index
    %33 = vector.load %arg5[%c3, %c0_32, %c0_33] : memref<9x32x32xbf16, #tpu.memory_space<vmem>>, vector<1x32x32xbf16>
    %34 = vector.shape_cast %33 : vector<1x32x32xbf16> to vector<32x32xbf16>
    %cst_34 = arith.constant dense<0.000000e+00> : vector<32x16xf32>
    %35 = tpu.matmul %34, %32, %cst_34 {dimension_numbers = #tpu.dot_dimension_numbers<[1], [0], [0], [1], [0, 0, 1, 1], [], []>} : vector<32x32xbf16>, vector<32x16xbf16>, vector<32x16xf32> -> vector<32x16xf32>
    %36 = arith.addf %28, %35 : vector<32x16xf32>
    %c0_35 = arith.constant 0 : index
    %c5_36 = arith.constant 5 : index
    %37 = vector.load %arg13[%c0_35, %c5_36] : memref<32x26xbf16, #tpu.memory_space<vmem>>, vector<32x16xbf16>
    %c4_37 = arith.constant 4 : index
    %c0_38 = arith.constant 0 : index
    %c0_39 = arith.constant 0 : index
    %38 = vector.load %arg5[%c4_37, %c0_38, %c0_39] : memref<9x32x32xbf16, #tpu.memory_space<vmem>>, vector<1x32x32xbf16>
    %39 = vector.shape_cast %38 : vector<1x32x32xbf16> to vector<32x32xbf16>
    %cst_40 = arith.constant dense<0.000000e+00> : vector<32x16xf32>
    %40 = tpu.matmul %39, %37, %cst_40 {dimension_numbers = #tpu.dot_dimension_numbers<[1], [0], [0], [1], [0, 0, 1, 1], [], []>} : vector<32x32xbf16>, vector<32x16xbf16>, vector<32x16xf32> -> vector<32x16xf32>
    %41 = arith.addf %36, %40 : vector<32x16xf32>
    %c0_41 = arith.constant 0 : index
    %c6 = arith.constant 6 : index
    %42 = vector.load %arg13[%c0_41, %c6] : memref<32x26xbf16, #tpu.memory_space<vmem>>, vector<32x16xbf16>
    %c0_42 = arith.constant 0 : index
    %c0_43 = arith.constant 0 : index
    %43 = vector.load %arg3[%c0_42, %c0_43] : memref<1x16xbf16, #tpu.memory_space<vmem>>, vector<1x16xbf16>
    %44 = vector.broadcast %43 : vector<1x16xbf16> to vector<32x16xbf16>
    %45 = arith.mulf %42, %44 : vector<32x16xbf16>
    %c5_44 = arith.constant 5 : index
    %c0_45 = arith.constant 0 : index
    %c0_46 = arith.constant 0 : index
    %46 = vector.load %arg5[%c5_44, %c0_45, %c0_46] : memref<9x32x32xbf16, #tpu.memory_space<vmem>>, vector<1x32x32xbf16>
    %47 = vector.shape_cast %46 : vector<1x32x32xbf16> to vector<32x32xbf16>
    %cst_47 = arith.constant dense<0.000000e+00> : vector<32x16xf32>
    %48 = tpu.matmul %47, %45, %cst_47 {dimension_numbers = #tpu.dot_dimension_numbers<[1], [0], [0], [1], [0, 0, 1, 1], [], []>} : vector<32x32xbf16>, vector<32x16xbf16>, vector<32x16xf32> -> vector<32x16xf32>
    %49 = arith.addf %41, %48 : vector<32x16xf32>
    %c0_48 = arith.constant 0 : index
    %c8 = arith.constant 8 : index
    %50 = vector.load %arg13[%c0_48, %c8] : memref<32x26xbf16, #tpu.memory_space<vmem>>, vector<32x16xbf16>
    %c0_49 = arith.constant 0 : index
    %c0_50 = arith.constant 0 : index
    %51 = vector.load %arg2[%c0_49, %c0_50] : memref<1x16xbf16, #tpu.memory_space<vmem>>, vector<1x16xbf16>
    %52 = vector.broadcast %51 : vector<1x16xbf16> to vector<32x16xbf16>
    %53 = arith.mulf %50, %52 : vector<32x16xbf16>
    %c6_51 = arith.constant 6 : index
    %c0_52 = arith.constant 0 : index
    %c0_53 = arith.constant 0 : index
    %54 = vector.load %arg5[%c6_51, %c0_52, %c0_53] : memref<9x32x32xbf16, #tpu.memory_space<vmem>>, vector<1x32x32xbf16>
    %55 = vector.shape_cast %54 : vector<1x32x32xbf16> to vector<32x32xbf16>
    %cst_54 = arith.constant dense<0.000000e+00> : vector<32x16xf32>
    %56 = tpu.matmul %55, %53, %cst_54 {dimension_numbers = #tpu.dot_dimension_numbers<[1], [0], [0], [1], [0, 0, 1, 1], [], []>} : vector<32x32xbf16>, vector<32x16xbf16>, vector<32x16xf32> -> vector<32x16xf32>
    %57 = arith.addf %49, %56 : vector<32x16xf32>
    %c0_55 = arith.constant 0 : index
    %c9 = arith.constant 9 : index
    %58 = vector.load %arg13[%c0_55, %c9] : memref<32x26xbf16, #tpu.memory_space<vmem>>, vector<32x16xbf16>
    %c7 = arith.constant 7 : index
    %c0_56 = arith.constant 0 : index
    %c0_57 = arith.constant 0 : index
    %59 = vector.load %arg5[%c7, %c0_56, %c0_57] : memref<9x32x32xbf16, #tpu.memory_space<vmem>>, vector<1x32x32xbf16>
    %60 = vector.shape_cast %59 : vector<1x32x32xbf16> to vector<32x32xbf16>
    %cst_58 = arith.constant dense<0.000000e+00> : vector<32x16xf32>
    %61 = tpu.matmul %60, %58, %cst_58 {dimension_numbers = #tpu.dot_dimension_numbers<[1], [0], [0], [1], [0, 0, 1, 1], [], []>} : vector<32x32xbf16>, vector<32x16xbf16>, vector<32x16xf32> -> vector<32x16xf32>
    %62 = arith.addf %57, %61 : vector<32x16xf32>
    %c0_59 = arith.constant 0 : index
    %c10 = arith.constant 10 : index
    %63 = vector.load %arg13[%c0_59, %c10] : memref<32x26xbf16, #tpu.memory_space<vmem>>, vector<32x16xbf16>
    %c0_60 = arith.constant 0 : index
    %c0_61 = arith.constant 0 : index
    %64 = vector.load %arg3[%c0_60, %c0_61] : memref<1x16xbf16, #tpu.memory_space<vmem>>, vector<1x16xbf16>
    %65 = vector.broadcast %64 : vector<1x16xbf16> to vector<32x16xbf16>
    %66 = arith.mulf %63, %65 : vector<32x16xbf16>
    %c8_62 = arith.constant 8 : index
    %c0_63 = arith.constant 0 : index
    %c0_64 = arith.constant 0 : index
    %67 = vector.load %arg5[%c8_62, %c0_63, %c0_64] : memref<9x32x32xbf16, #tpu.memory_space<vmem>>, vector<1x32x32xbf16>
    %68 = vector.shape_cast %67 : vector<1x32x32xbf16> to vector<32x32xbf16>
    %cst_65 = arith.constant dense<0.000000e+00> : vector<32x16xf32>
    %69 = tpu.matmul %68, %66, %cst_65 {dimension_numbers = #tpu.dot_dimension_numbers<[1], [0], [0], [1], [0, 0, 1, 1], [], []>} : vector<32x32xbf16>, vector<32x16xbf16>, vector<32x16xf32> -> vector<32x16xf32>
    %70 = arith.addf %62, %69 : vector<32x16xf32>
    %c0_66 = arith.constant 0 : index
    %71 = memref.load %arg6[%c0_66] : memref<1xf32, #tpu.memory_space<smem>>
    %cst_67 = arith.constant 0.000000e+00 : f32
    %72 = vector.broadcast %cst_67 : f32 to vector<32x16xf32>
    %73 = arith.cmpf oge, %70, %72 : vector<32x16xf32>
    %74 = vector.broadcast %71 : f32 to vector<32x16xf32>
    %75 = arith.mulf %74, %70 : vector<32x16xf32>
    %76 = arith.select %73, %70, %75 : vector<32x16xi1>, vector<32x16xf32>
    %77 = arith.truncf %76 : vector<32x16xf32> to vector<32x16xbf16>
    %c0_68 = arith.constant 0 : index
    %c5_69 = arith.constant 5 : index
    %78 = vector.load %arg13[%c0_68, %c5_69] : memref<32x26xbf16, #tpu.memory_space<vmem>>, vector<32x16xbf16>
    tpu.vector_store %arg13[%c0_68, %c5_69], %77 {strides = array<i32>} : memref<32x26xbf16, #tpu.memory_space<vmem>>, vector<32x16xbf16>,
    %cst_70 = arith.constant 0.000000e+00 : f32
    %79 = vector.broadcast %cst_70 : f32 to vector<32x16xf32>
    %c0_71 = arith.constant 0 : index
    %c0_72 = arith.constant 0 : index
    %80 = vector.load %arg13[%c0_71, %c0_72] : memref<32x26xbf16, #tpu.memory_space<vmem>>, vector<32x16xbf16>
    %c0_73 = arith.constant 0 : index
    %c0_74 = arith.constant 0 : index
    %81 = vector.load %arg2[%c0_73, %c0_74] : memref<1x16xbf16, #tpu.memory_space<vmem>>, vector<1x16xbf16>
    %82 = vector.broadcast %81 : vector<1x16xbf16> to vector<32x16xbf16>
    %83 = arith.mulf %80, %82 : vector<32x16xbf16>
    %c0_75 = arith.constant 0 : index
    %c0_76 = arith.constant 0 : index
    %c0_77 = arith.constant 0 : index
    %84 = vector.load %arg7[%c0_75, %c0_76, %c0_77] : memref<9x32x32xbf16, #tpu.memory_space<vmem>>, vector<1x32x32xbf16>
    %85 = vector.shape_cast %84 : vector<1x32x32xbf16> to vector<32x32xbf16>
    %cst_78 = arith.constant dense<0.000000e+00> : vector<32x16xf32>
    %86 = tpu.matmul %85, %83, %cst_78 {dimension_numbers = #tpu.dot_dimension_numbers<[1], [0], [0], [1], [0, 0, 1, 1], [], []>} : vector<32x32xbf16>, vector<32x16xbf16>, vector<32x16xf32> -> vector<32x16xf32>
    %87 = arith.addf %79, %86 : vector<32x16xf32>
    %c0_79 = arith.constant 0 : index
    %c1_80 = arith.constant 1 : index
    %88 = vector.load %arg13[%c0_79, %c1_80] : memref<32x26xbf16, #tpu.memory_space<vmem>>, vector<32x16xbf16>
    %c1_81 = arith.constant 1 : index
    %c0_82 = arith.constant 0 : index
    %c0_83 = arith.constant 0 : index
    %89 = vector.load %arg7[%c1_81, %c0_82, %c0_83] : memref<9x32x32xbf16, #tpu.memory_space<vmem>>, vector<1x32x32xbf16>
    %90 = vector.shape_cast %89 : vector<1x32x32xbf16> to vector<32x32xbf16>
    %cst_84 = arith.constant dense<0.000000e+00> : vector<32x16xf32>
    %91 = tpu.matmul %90, %88, %cst_84 {dimension_numbers = #tpu.dot_dimension_numbers<[1], [0], [0], [1], [0, 0, 1, 1], [], []>} : vector<32x32xbf16>, vector<32x16xbf16>, vector<32x16xf32> -> vector<32x16xf32>
    %92 = arith.addf %87, %91 : vector<32x16xf32>
    %c0_85 = arith.constant 0 : index
    %c2_86 = arith.constant 2 : index
    %93 = vector.load %arg13[%c0_85, %c2_86] : memref<32x26xbf16, #tpu.memory_space<vmem>>, vector<32x16xbf16>
    %c0_87 = arith.constant 0 : index
    %c0_88 = arith.constant 0 : index
    %94 = vector.load %arg3[%c0_87, %c0_88] : memref<1x16xbf16, #tpu.memory_space<vmem>>, vector<1x16xbf16>
    %95 = vector.broadcast %94 : vector<1x16xbf16> to vector<32x16xbf16>
    %96 = arith.mulf %93, %95 : vector<32x16xbf16>
    %c2_89 = arith.constant 2 : index
    %c0_90 = arith.constant 0 : index
    %c0_91 = arith.constant 0 : index
    %97 = vector.load %arg7[%c2_89, %c0_90, %c0_91] : memref<9x32x32xbf16, #tpu.memory_space<vmem>>, vector<1x32x32xbf16>
    %98 = vector.shape_cast %97 : vector<1x32x32xbf16> to vector<32x32xbf16>
    %cst_92 = arith.constant dense<0.000000e+00> : vector<32x16xf32>
    %99 = tpu.matmul %98, %96, %cst_92 {dimension_numbers = #tpu.dot_dimension_numbers<[1], [0], [0], [1], [0, 0, 1, 1], [], []>} : vector<32x32xbf16>, vector<32x16xbf16>, vector<32x16xf32> -> vector<32x16xf32>
    %100 = arith.addf %92, %99 : vector<32x16xf32>
    %c0_93 = arith.constant 0 : index
    %c4_94 = arith.constant 4 : index
    %101 = vector.load %arg13[%c0_93, %c4_94] : memref<32x26xbf16, #tpu.memory_space<vmem>>, vector<32x16xbf16>
    %c0_95 = arith.constant 0 : index
    %c0_96 = arith.constant 0 : index
    %102 = vector.load %arg2[%c0_95, %c0_96] : memref<1x16xbf16, #tpu.memory_space<vmem>>, vector<1x16xbf16>
    %103 = vector.broadcast %102 : vector<1x16xbf16> to vector<32x16xbf16>
    %104 = arith.mulf %101, %103 : vector<32x16xbf16>
    %c3_97 = arith.constant 3 : index
    %c0_98 = arith.constant 0 : index
    %c0_99 = arith.constant 0 : index
    %105 = vector.load %arg7[%c3_97, %c0_98, %c0_99] : memref<9x32x32xbf16, #tpu.memory_space<vmem>>, vector<1x32x32xbf16>
    %106 = vector.shape_cast %105 : vector<1x32x32xbf16> to vector<32x32xbf16>
    %cst_100 = arith.constant dense<0.000000e+00> : vector<32x16xf32>
    %107 = tpu.matmul %106, %104, %cst_100 {dimension_numbers = #tpu.dot_dimension_numbers<[1], [0], [0], [1], [0, 0, 1, 1], [], []>} : vector<32x32xbf16>, vector<32x16xbf16>, vector<32x16xf32> -> vector<32x16xf32>
    %108 = arith.addf %100, %107 : vector<32x16xf32>
    %c0_101 = arith.constant 0 : index
    %c5_102 = arith.constant 5 : index
    %109 = vector.load %arg13[%c0_101, %c5_102] : memref<32x26xbf16, #tpu.memory_space<vmem>>, vector<32x16xbf16>
    %c4_103 = arith.constant 4 : index
    %c0_104 = arith.constant 0 : index
    %c0_105 = arith.constant 0 : index
    %110 = vector.load %arg7[%c4_103, %c0_104, %c0_105] : memref<9x32x32xbf16, #tpu.memory_space<vmem>>, vector<1x32x32xbf16>
    %111 = vector.shape_cast %110 : vector<1x32x32xbf16> to vector<32x32xbf16>
    %cst_106 = arith.constant dense<0.000000e+00> : vector<32x16xf32>
    %112 = tpu.matmul %111, %109, %cst_106 {dimension_numbers = #tpu.dot_dimension_numbers<[1], [0], [0], [1], [0, 0, 1, 1], [], []>} : vector<32x32xbf16>, vector<32x16xbf16>, vector<32x16xf32> -> vector<32x16xf32>
    %113 = arith.addf %108, %112 : vector<32x16xf32>
    %c0_107 = arith.constant 0 : index
    %c6_108 = arith.constant 6 : index
    %114 = vector.load %arg13[%c0_107, %c6_108] : memref<32x26xbf16, #tpu.memory_space<vmem>>, vector<32x16xbf16>
    %c0_109 = arith.constant 0 : index
    %c0_110 = arith.constant 0 : index
    %115 = vector.load %arg3[%c0_109, %c0_110] : memref<1x16xbf16, #tpu.memory_space<vmem>>, vector<1x16xbf16>
    %116 = vector.broadcast %115 : vector<1x16xbf16> to vector<32x16xbf16>
    %117 = arith.mulf %114, %116 : vector<32x16xbf16>
    %c5_111 = arith.constant 5 : index
    %c0_112 = arith.constant 0 : index
    %c0_113 = arith.constant 0 : index
    %118 = vector.load %arg7[%c5_111, %c0_112, %c0_113] : memref<9x32x32xbf16, #tpu.memory_space<vmem>>, vector<1x32x32xbf16>
    %119 = vector.shape_cast %118 : vector<1x32x32xbf16> to vector<32x32xbf16>
    %cst_114 = arith.constant dense<0.000000e+00> : vector<32x16xf32>
    %120 = tpu.matmul %119, %117, %cst_114 {dimension_numbers = #tpu.dot_dimension_numbers<[1], [0], [0], [1], [0, 0, 1, 1], [], []>} : vector<32x32xbf16>, vector<32x16xbf16>, vector<32x16xf32> -> vector<32x16xf32>
    %121 = arith.addf %113, %120 : vector<32x16xf32>
    %c0_115 = arith.constant 0 : index
    %c8_116 = arith.constant 8 : index
    %122 = vector.load %arg13[%c0_115, %c8_116] : memref<32x26xbf16, #tpu.memory_space<vmem>>, vector<32x16xbf16>
    %c0_117 = arith.constant 0 : index
    %c0_118 = arith.constant 0 : index
    %123 = vector.load %arg2[%c0_117, %c0_118] : memref<1x16xbf16, #tpu.memory_space<vmem>>, vector<1x16xbf16>
    %124 = vector.broadcast %123 : vector<1x16xbf16> to vector<32x16xbf16>
    %125 = arith.mulf %122, %124 : vector<32x16xbf16>
    %c6_119 = arith.constant 6 : index
    %c0_120 = arith.constant 0 : index
    %c0_121 = arith.constant 0 : index
    %126 = vector.load %arg7[%c6_119, %c0_120, %c0_121] : memref<9x32x32xbf16, #tpu.memory_space<vmem>>, vector<1x32x32xbf16>
    %127 = vector.shape_cast %126 : vector<1x32x32xbf16> to vector<32x32xbf16>
    %cst_122 = arith.constant dense<0.000000e+00> : vector<32x16xf32>
    %128 = tpu.matmul %127, %125, %cst_122 {dimension_numbers = #tpu.dot_dimension_numbers<[1], [0], [0], [1], [0, 0, 1, 1], [], []>} : vector<32x32xbf16>, vector<32x16xbf16>, vector<32x16xf32> -> vector<32x16xf32>
    %129 = arith.addf %121, %128 : vector<32x16xf32>
    %c0_123 = arith.constant 0 : index
    %c9_124 = arith.constant 9 : index
    %130 = vector.load %arg13[%c0_123, %c9_124] : memref<32x26xbf16, #tpu.memory_space<vmem>>, vector<32x16xbf16>
    %c7_125 = arith.constant 7 : index
    %c0_126 = arith.constant 0 : index
    %c0_127 = arith.constant 0 : index
    %131 = vector.load %arg7[%c7_125, %c0_126, %c0_127] : memref<9x32x32xbf16, #tpu.memory_space<vmem>>, vector<1x32x32xbf16>
    %132 = vector.shape_cast %131 : vector<1x32x32xbf16> to vector<32x32xbf16>
    %cst_128 = arith.constant dense<0.000000e+00> : vector<32x16xf32>
    %133 = tpu.matmul %132, %130, %cst_128 {dimension_numbers = #tpu.dot_dimension_numbers<[1], [0], [0], [1], [0, 0, 1, 1], [], []>} : vector<32x32xbf16>, vector<32x16xbf16>, vector<32x16xf32> -> vector<32x16xf32>
    %134 = arith.addf %129, %133 : vector<32x16xf32>
    %c0_129 = arith.constant 0 : index
    %c10_130 = arith.constant 10 : index
    %135 = vector.load %arg13[%c0_129, %c10_130] : memref<32x26xbf16, #tpu.memory_space<vmem>>, vector<32x16xbf16>
    %c0_131 = arith.constant 0 : index
    %c0_132 = arith.constant 0 : index
    %136 = vector.load %arg3[%c0_131, %c0_132] : memref<1x16xbf16, #tpu.memory_space<vmem>>, vector<1x16xbf16>
    %137 = vector.broadcast %136 : vector<1x16xbf16> to vector<32x16xbf16>
    %138 = arith.mulf %135, %137 : vector<32x16xbf16>
    %c8_133 = arith.constant 8 : index
    %c0_134 = arith.constant 0 : index
    %c0_135 = arith.constant 0 : index
    %139 = vector.load %arg7[%c8_133, %c0_134, %c0_135] : memref<9x32x32xbf16, #tpu.memory_space<vmem>>, vector<1x32x32xbf16>
    %140 = vector.shape_cast %139 : vector<1x32x32xbf16> to vector<32x32xbf16>
    %cst_136 = arith.constant dense<0.000000e+00> : vector<32x16xf32>
    %141 = tpu.matmul %140, %138, %cst_136 {dimension_numbers = #tpu.dot_dimension_numbers<[1], [0], [0], [1], [0, 0, 1, 1], [], []>} : vector<32x32xbf16>, vector<32x16xbf16>, vector<32x16xf32> -> vector<32x16xf32>
    %142 = arith.addf %134, %141 : vector<32x16xf32>
    %cst_137 = arith.constant dense<0.000000e+00> : vector<32xf32>
    %143 = vector.multi_reduction <add>, %142, %cst_137 [1] : vector<32x16xf32> to vector<32xf32>
    %144 = vector.shape_cast %143 : vector<32xf32> to vector<32x1xf32>
    %cst_138 = arith.constant 1.600000e+01 : f32
    %145 = vector.broadcast %cst_138 : f32 to vector<32x1xf32>
    %146 = arith.divf %144, %145 : vector<32x1xf32>
    %c0_139 = arith.constant 0 : index
    %c0_140 = arith.constant 0 : index
    %147 = vector.load %arg8[%c0_139, %c0_140] : memref<8x32xf32, #tpu.memory_space<vmem>>, vector<8x32xf32>
    %cst_141 = arith.constant dense<0.000000e+00> : vector<8x1xf32>
    %148 = tpu.matmul %147, %146, %cst_141 {dimension_numbers = #tpu.dot_dimension_numbers<[1], [0], [0], [1], [0, 0, 1, 1], [], []>} : vector<8x32xf32>, vector<32x1xf32>, vector<8x1xf32> -> vector<8x1xf32>
    %c0_142 = arith.constant 0 : index
    %c0_143 = arith.constant 0 : index
    %149 = vector.load %arg9[%c0_142, %c0_143] : memref<8x1xf32, #tpu.memory_space<vmem>>, vector<8x1xf32>
    %150 = arith.addf %148, %149 : vector<8x1xf32>
    %cst_144 = arith.constant 0.000000e+00 : f32
    %151 = vector.broadcast %cst_144 : f32 to vector<8x1xf32>
    %152 = arith.maximumf %150, %151 : vector<8x1xf32>
    %c0_145 = arith.constant 0 : index
    %c0_146 = arith.constant 0 : index
    %153 = vector.load %arg10[%c0_145, %c0_146] : memref<32x8xf32, #tpu.memory_space<vmem>>, vector<32x8xf32>
    %cst_147 = arith.constant dense<0.000000e+00> : vector<32x1xf32>
    %154 = tpu.matmul %153, %152, %cst_147 {dimension_numbers = #tpu.dot_dimension_numbers<[1], [0], [0], [1], [0, 0, 1, 1], [], []>} : vector<32x8xf32>, vector<8x1xf32>, vector<32x1xf32> -> vector<32x1xf32>
    %c0_148 = arith.constant 0 : index
    %c0_149 = arith.constant 0 : index
    %155 = vector.load %arg11[%c0_148, %c0_149] : memref<32x1xf32, #tpu.memory_space<vmem>>, vector<32x1xf32>
    %156 = arith.addf %154, %155 : vector<32x1xf32>
    %157 = arith.negf %156 : vector<32x1xf32>
    %158 = math.exp %157 : vector<32x1xf32>
    %cst_150 = arith.constant 1.000000e+00 : f32
    %159 = vector.broadcast %cst_150 : f32 to vector<32x1xf32>
    %160 = arith.addf %159, %158 : vector<32x1xf32>
    %161 = arith.divf %159, %160 : vector<32x1xf32>
    %162 = vector.broadcast %161 : vector<32x1xf32> to vector<32x16xf32>
    %163 = arith.mulf %142, %162 : vector<32x16xf32>
    %164 = arith.addf %163, %3 : vector<32x16xf32>
    %165 = arith.truncf %164 : vector<32x16xf32> to vector<32x16xbf16>
    %c0_151 = arith.constant 0 : index
    %c0_152 = arith.constant 0 : index
    %c0_153 = arith.constant 0 : index
    %166 = vector.load %arg12[%c0_151, %c0_152, %c0_153] : memref<1x32x16xbf16, #tpu.memory_space<vmem>>, vector<1x32x16xbf16>
    %167 = vector.shape_cast %166 : vector<1x32x16xbf16> to vector<32x16xbf16>
    %168 = vector.shape_cast %165 : vector<32x16xbf16> to vector<1x32x16xbf16>
    tpu.vector_store %arg12[%c0_151, %c0_152, %c0_153], %168 {strides = array<i32>} : memref<1x32x16xbf16, #tpu.memory_space<vmem>>, vector<1x32x16xbf16>,
    return
  }
  func.func @transform_0(%arg0: i32) -> (i32, i32, i32) {
    %c0_i32 = arith.constant 0 : i32
    %c0_i32_0 = arith.constant 0 : i32
    %c0_i32_1 = arith.constant 0 : i32
    return %arg0, %c0_i32, %c0_i32_0 : i32, i32, i32
  }
  func.func @transform_1(%arg0: i32) -> (i32, i32) {
    %c0_i32 = arith.constant 0 : i32
    %c0_i32_0 = arith.constant 0 : i32
    %c0_i32_1 = arith.constant 0 : i32
    return %c0_i32, %c0_i32_0 : i32, i32
  }
  func.func @transform_2(%arg0: i32) -> (i32, i32) {
    %c0_i32 = arith.constant 0 : i32
    %c0_i32_0 = arith.constant 0 : i32
    %c0_i32_1 = arith.constant 0 : i32
    return %c0_i32, %c0_i32_0 : i32, i32
  }
  func.func @transform_3(%arg0: i32) -> (i32, i32) {
    %c0_i32 = arith.constant 0 : i32
    %c0_i32_0 = arith.constant 0 : i32
    %c0_i32_1 = arith.constant 0 : i32
    return %c0_i32, %c0_i32_0 : i32, i32
  }
  func.func @transform_4(%arg0: i32) -> (i32, i32, i32) {
    %c0_i32 = arith.constant 0 : i32
    %c0_i32_0 = arith.constant 0 : i32
    %c0_i32_1 = arith.constant 0 : i32
    %c0_i32_2 = arith.constant 0 : i32
    return %c0_i32, %c0_i32_0, %c0_i32_1 : i32, i32, i32
  }
  func.func @transform_5(%arg0: i32) -> i32 {
    %c0_i32 = arith.constant 0 : i32
    %c0_i32_0 = arith.constant 0 : i32
    return %c0_i32 : i32
  }
  func.func @transform_6(%arg0: i32) -> (i32, i32, i32) {
    %c0_i32 = arith.constant 0 : i32
    %c0_i32_0 = arith.constant 0 : i32
    %c0_i32_1 = arith.constant 0 : i32
    %c0_i32_2 = arith.constant 0 : i32
    return %c0_i32, %c0_i32_0, %c0_i32_1 : i32, i32, i32
  }
  func.func @transform_7(%arg0: i32) -> (i32, i32) {
    %c0_i32 = arith.constant 0 : i32
    %c0_i32_0 = arith.constant 0 : i32
    %c0_i32_1 = arith.constant 0 : i32
    return %c0_i32, %c0_i32_0 : i32, i32
  }
  func.func @transform_8(%arg0: i32) -> (i32, i32) {
    %c0_i32 = arith.constant 0 : i32
    %c0_i32_0 = arith.constant 0 : i32
    %c0_i32_1 = arith.constant 0 : i32
    return %c0_i32, %c0_i32_0 : i32, i32
  }
  func.func @transform_9(%arg0: i32) -> (i32, i32) {
    %c0_i32 = arith.constant 0 : i32
    %c0_i32_0 = arith.constant 0 : i32
    %c0_i32_1 = arith.constant 0 : i32
    return %c0_i32, %c0_i32_0 : i32, i32
  }
  func.func @transform_10(%arg0: i32) -> (i32, i32) {
    %c0_i32 = arith.constant 0 : i32
    %c0_i32_0 = arith.constant 0 : i32
    %c0_i32_1 = arith.constant 0 : i32
    return %c0_i32, %c0_i32_0 : i32, i32
  }
  func.func @transform_11(%arg0: i32) -> (i32, i32, i32) {
    %c0_i32 = arith.constant 0 : i32
    %c0_i32_0 = arith.constant 0 : i32
    %c0_i32_1 = arith.constant 0 : i32
    return %arg0, %c0_i32, %c0_i32_0 : i32, i32, i32
  }
}

</mosaic_0001>

<bundles_post_ra>
// kernel: encoder_forward.10
= control target key start
LH: loop header
LB: loop body
LE: loop exit
PB: predicated region body
PF: predicated region fallthrough
CT: control target
= control target key end

     0   :  { %s357_s9 = smov 0   ;;  %s380_s0 = inlined_call_operand.vmem [shape: bf16[2,16,64], index: 0, kind: input, shape index: {}]   ;;  %s381_s1 = inlined_call_operand.vmem [shape: bf16[24,16], index: 1, kind: input, shape index: {}]   ;;  %s382_s2 = inlined_call_operand.vmem [shape: bf16[2,24,64], index: 2, kind: output, shape index: {}]  }
   0x1 LB: > { %s291_s10 = sadd.s32 4294967295, %s340_s9   ;;  %p295_p0 = scmp.ge.s32.totalorder %s340_s9, 1  ;;  %s340_s9 = sphi %s357_s9, %s12_s9  }
   0x2   : > { %p112_p1 = scmp.lt.s32.totalorder %s340_s9, 3 }
   0x4   : > { %p113_p2 = pnand %p295_p0, %p112_p1 }
   0x5   : > { %p134_p3 = scmp.lt.s32.totalorder (!%p113_p2), %s291_s10, 1 }
   0x6   : > { %116 = sbr.rel (%p113_p2) target bundleno = 221 (0xdd), region = 28 }
   0xb   : > { %v332_v0 = vld [vmem:[%s381_s1] sm:$0xff]   ;;  %vm164_vm0 = vcmask 130048   ;;  %s384_s10 = smov (!%p134_p3, %s291_s10), 1  ;;  %v333_v2 = vld [vmem:[%s381_s1 + $0x8] ss:$0 sps:$4 sm:$0xff]   ;;  %vm232_vm1 = vcmask 519168  }
   0xc   : > { %318 = vmatprep.mubr.msk.bf16.mxu0 %vm164_vm0, %v332_v0  ;;  %s309_s13 = sshll.u32 %s384_s10, 3  ;;  %s322_s19 = smul.u32 12, %s384_s10 }
   0xd   : > { %s138_s16 = scalar_lea.vmem %s380_s0, %s309_s13 }
   0xe   : > { %v331_v1 = vld [vmem:[%s138_s16] sm:$0xff]   ;;  %s143_s22 = scalar_lea.vmem %s382_s2, %s322_s19 }
   0xf   : > { %316 = vmatprep.subr.bf16.mxu0 %v331_v1 }
  0x10   : > { %317 = vmatpush3.bf16.msra.mxu0 %v331_v1 }
  0x13   : > { %319 = vmatmul.mubr.msk.bf16.vlgmr.msra.gmra.mxu0 %vm164_vm0, %v333_v2 }
  0xd3   : > { %v320_v3 = vpop.f32.mrf.mxu0 }
  0xd4   : > { %v312_v4 = vpack.c.bf16 %v320_v3, %v320_v3 }
  0xd5   : > { %v205_v5 = vpop.f32.mrf.mxu0 }
  0xd6   : > { %235 = vst.msk [vmem:[%s143_s22 + $0x8] sm:$0xf] %vm232_vm1, %v312_v4  ;;  %v310_v6 = vpack.c.bf16 %v205_v5, %v205_v5 }
  0xd7   : > { %v321_v7 = vpop.f32.mrf.mxu0 }
  0xd8   : > { %233 = vst.msk [vmem:[%s143_s22] sm:$0xf] %vm232_vm1, %v310_v6 }
  0xd9   : > { %v208_v8 = vpop.f32.mrf.mxu0 }
  0xda   : > { %v311_v9 = vpack.c.bf16 %v208_v8, %v208_v8 }
  0xdc   : > { %234 = vst.msk [vmem:[%s143_s22 + $0x4] sm:$0xf] %vm232_vm1, %v311_v9 }
  0xdd PF: > { %s12_s9 = sadd.s32 1, %s340_s9  }
  0xde   : > { %p9_p4 = scmp.ge.s32.totalorder %s12_s9, 4  }
  0xe0   :  { %11 = sbr.rel (!%p9_p4) target bundleno = 1 (0x1), region = 58 }

// kernel: encoder_forward.8
= control target key start
LH: loop header
LB: loop body
LE: loop exit
PB: predicated region body
PF: predicated region fallthrough
CT: control target
= control target key end

     0   :  { %s2813_s19 = smov 0   ;;  %s3216_s0 = inlined_call_operand.vmem [shape: bf16[2,16,256], index: 0, kind: input, shape index: {}]   ;;  %s3217_s1 = inlined_call_operand.vmem [shape: bf16[1,256], index: 1, kind: input, shape index: {}]   ;;  %s3218_s2 = inlined_call_operand.vmem [shape: bf16[1,256], index: 2, kind: input, shape index: {}]   ;;  %s3219_s3 = inlined_call_operand.vmem [shape: bf16[16,16], index: 3, kind: input, shape index: {}]   ;;  %s3220_s4 = inlined_call_operand.vmem [shape: bf16[9,16,16], index: 4, kind: input, shape index: {}]   ;;  %s3221_s5 = inlined_call_operand.<no memory space> [shape: f32[1], index: 5, kind: input, shape index: {}]   ;;  %s3222_s6 = inlined_call_operand.vmem [shape: bf16[9,16,16], index: 6, kind: input, shape index: {}]   ;;  %s3223_s7 = inlined_call_operand.vmem [shape: f32[4,16], index: 7, kind: input, shape index: {}]   ;;  %s3224_s8 = inlined_call_operand.vmem [shape: f32[4,1], index: 8, kind: input, shape index: {}]   ;;  %s3225_s9 = inlined_call_operand.vmem [shape: f32[16,4], index: 9, kind: input, shape index: {}]   ;;  %s3226_s10 = inlined_call_operand.vmem [shape: f32[16,1], index: 10, kind: input, shape index: {}]   ;;  %s3227_s11 = inlined_call_operand.vmem [shape: bf16[2,16,256], index: 11, kind: output, shape index: {}]  }
   0x1   :  { %16 = sst [smem:[#allocation3]] %s3221_s5 }
   0x2 LB: > { %s2490_s20 = sadd.s32 4294967295, %s2730_s19   ;;  %p2494_p0 = scmp.ge.s32.totalorder %s2730_s19, 1  ;;  %s2730_s19 = sphi %s2813_s19, %s22_s19  }
   0x3   : > { %p338_p1 = scmp.lt.s32.totalorder %s2730_s19, 3 }
   0x5   : > { %p339_p2 = pnand %p2494_p0, %p338_p1 }
   0x6   : > { %p378_p3 = scmp.lt.s32.totalorder (!%p339_p2), %s2490_s20, 1  ;;  %s2734_s28 = smov (!%p339_p2), 17  }
   0x7   : > { %342 = sbr.rel (%p339_p2) target bundleno = 1714 (0x6b2), region = 64  ;;  %s2735_s12 = smov (!%p339_p2), 2  }
   0x8   : > { %s2736_s13 = smov (!%p339_p2), 18   ;;  %s2737_s14 = smov (!%p339_p2), 16  }
   0x9   : > { %s2738_s15 = smov (!%p339_p2), 34   ;;  %s2739_s16 = smov (!%p339_p2), 32  }
   0xa   : > { %s2740_s17 = smov (!%p339_p2), 111   ;;  %s2741_s18 = smov (!%p339_p2), 127  }
   0xb   : > { %s2742_s22 = smov (!%p339_p2), 112   ;;  %s2743_s23 = smov (!%p339_p2), 126  }
   0xc   : > { %v496_v0 = vlaneseq  ;;  %vm456_vm0 = vcmask 273408   ;;  %v2732_v1 = vmov 1966171168   ;;  %v2733_v4 = vmov 0   ;;  %s3245_s20 = smov (!%p378_p3, %s2490_s20), 1  ;;  %v2692_v29 = vld [vmem:[%s3219_s3] sm:$0xff]  }
   0xd   : > { %v494_v2 = vunpack.c.l.s4 %v2732_v1  ;;  %v2516_v3 = vld.sshfl [vmem:[%s3218_s2] sm:$0x11 pattern:$0x75316420]  ;;  %455 = vst [vmem:[#allocation2] sm:$0xff] %v2733_v4  ;;  %458 = vst [vmem:[#allocation2 + $0xc] sm:$0xff] %v2733_v4  ;;  %444 = vmatprep.mubr.bf16.mxu0 %v2733_v4  ;;  %600 = vmatprep.mubr.bf16.mxu1 %v2733_v4 }
   0xe   : > { %457 = vst.msk [vmem:[#allocation2 + $0x8] sm:$0xf] %vm456_vm0, %v2733_v4  ;;  %459 = vst.msk [vmem:[#allocation2 + $0x14] sm:$0xf] %vm456_vm0, %v2733_v4  ;;  %v497_v5 = vshrl.u32 %v496_v0, 7  ;;  %2688 = vset.pattern.permute.xlu1 %v2733_v4  ;;  %2687 = vset.pattern.permute.xlu0 %v2733_v4  ;;  %v681_v8 = vcombine.high %v2516_v3, %v2516_v3  ;;  %s3228_s24 = sshll.u32 %s3245_s20, 4 }
   0xf   : > { %v2503_v6 = vld.sshfl [vmem:[%s3217_s1] sm:$0x11 pattern:$0x75316420]  ;;  %v495_v7 = vunpack.c.0.s8 %v494_v2  ;;  %s382_s27 = scalar_lea.vmem %s3216_s0, %s3228_s24  ;;  %vm408_vm1 = vcmask 130048   ;;  %vm473_vm2 = vcmask 1043592  }
  0x10   : > { %v492_v9 = vcombine.high %v2503_v6, %v2503_v6  ;;  %v389_v11 = vld [vmem:[%s382_s27] sm:$0xff]  ;;  %v390_v12 = vld [vmem:[%s382_s27 + $0x8] sm:$0xff]  ;;  %v512_v13 = vsub.s32 0, %v497_v5  ;;  %vm474_vm3 = vcmask 1047556   ;;  %vm466_vm4 = vcmask 138240   ;;  %s2744_s25 = smov 96  }
  0x11   : > { %v498_v10 = vsub.s32 %v495_v7, %v497_v5  ;;  %460 = vrot.lane.b32.xlu0 %v389_v11, %s2734_s28  ;;  %v2501_v18 = vcombine.high %v389_v11, %v390_v12  ;;  %v2500_v23 = vcombine.low %v389_v11, %v390_v12  ;;  %vm477_vm5 = vcmask 134144   ;;  %vm2864_vm6 = vmor %vm474_vm3, %vm473_vm2  ;;  %v2695_v55 = vld [vmem:[%s3220_s4] sm:$0xff]   ;;  %s2745_s26 = smov 110   ;;  %s2746_s27 = smov 95  }
  0x12   : > { %vm718_vm7 = vcmask 15360   ;;  %vm990_vm8 = vcmask 146432   ;;  %vm1083_vm9 = vcmask 261120   ;;  %vm1245_vm10 = vcmask 277504   ;;  %s2747_s29 = smov 94   ;;  %s1335_s24 = sld [smem:[#allocation3]] }
  0x13   : > { %v688_v14 = vrot.slane %v2516_v3, %v498_v10  ;;  %v695_v15 = vrot.slane %v681_v8, %v498_v10  ;;  %v499_v16 = vrot.slane %v2503_v6, %v498_v10  ;;  %v506_v17 = vrot.slane %v492_v9, %v498_v10  ;;  %426 = vmatprep.subr.bf16.mxu0 %v2501_v18 }
  0x14   : > { %427 = vmatpush1.bf16.msra.mxu0 %v2500_v23  ;;  %vm560_vm11 = vcmask 1039360   ;;  %vm753_vm12 = vcmask 1031168   ;;  %vm932_vm13 = vcmask 908288   ;;  %vm850_vm14 = vcmask 916480  }
  0x15   : > { %v697_v19 = vpack.i.b16 %v688_v14, %v688_v14  ;;  %v704_v20 = vpack.i.b16 %v695_v15, %v695_v15  ;;  %v508_v21 = vpack.i.b16 %v499_v16, %v499_v16  ;;  %v515_v22 = vpack.i.b16 %v506_v17, %v506_v17  ;;  %462 = vrot.lane.b32.xlu0 %v390_v12, %s2734_s28 }
  0x16   : > { %vm3232_vm15 = vcmask 900096   ;;  %vm3231_vm0 = vcmask 785408   ;;  %vm3230_vm2 = vcmask 777216   ;;  %vm3229_vm3 = vcmask 769024  }
  0x17   : > { %v702_v24 = vrot.slane %v697_v19, %v512_v13  ;;  %v709_v25 = vrot.slane %v704_v20, %v512_v13  ;;  %v513_v26 = vrot.slane %v508_v21, %v512_v13  ;;  %v520_v27 = vrot.slane %v515_v22, %v512_v13  ;;  %2502 = vmatmul.mubr.msk.bf16.vlgmr.msra.gmra.mxu0 %vm408_vm1, %v2692_v29 }
  0x18   : > { %661 = vmatprep.mubr.bf16.mxu0 %v2733_v4 }
  0x19   : > { %v2845_v28 = vcombine.low %v702_v24, %v709_v25  ;;  %v2854_v30 = vcombine.low %v513_v26, %v520_v27 }
  0x1b   : > { %715 = vrot.lane.b32.xlu1 %v2845_v28, %s2735_s12  ;;  %987 = vrot.lane.b32.xlu0 %v2845_v28, %s2736_s13 }
  0x1f   : > { %812 = vrot.lane.b32.xlu1 %v2854_v30, %s2737_s14  ;;  %1242 = vrot.lane.b32.xlu0 %v2845_v28, %s2738_s15 }
  0x23   : > { %1080 = vrot.lane.b32.xlu1 %v2854_v30, %s2739_s16 }
  0x83   : > { %v461_v31 = vpop.permute.xlu0 %460 }
  0x84   : > { %v464_v33 = vrot.slane %v461_v31, 4 }
  0x86   : > { %v467_v34 = vsel %vm466_vm4, %v464_v33, %v461_v31  ;;  %478 = vst.msk [vmem:[#allocation2 + $0x8] sm:$0xf] %vm477_vm5, %v464_v33 }
  0x87   : > { %476 = vst.msk [vmem:[#allocation2] sm:$0xff] %vm2864_vm6, %v467_v34  ;;  %v463_v35 = vpop.permute.xlu0 %462 }
  0x88   : > { %v465_v36 = vrot.slane %v463_v35, 4 }
  0x8a   : > { %v468_v37 = vsel %vm466_vm4, %v465_v36, %v463_v35  ;;  %480 = vst.msk [vmem:[#allocation2 + $0x14] sm:$0xf] %vm477_vm5, %v465_v36 }
  0x8b   : > { %479 = vst.msk [vmem:[#allocation2 + $0xc] sm:$0xff] %vm2864_vm6, %v468_v37 }
  0x8d   : > { %v716_v38 = vpop.permute.xlu1 %715  ;;  %v2876_v39 = vld [vmem:[#allocation2 + $0x8] sm:$0xf]  ;;  %v988_v8 = vpop.permute.xlu0 %987 }
  0x8e   : > { %v531_v40 = vld [vmem:[#allocation2 + $0x8] sm:$0xf]  ;;  %v2878_v41 = vld [vmem:[#allocation2] sm:$0xff]  ;;  %v717_v56 = vrot.slane %v716_v38, 4  ;;  %v989_v13 = vrot.slane %v988_v8, 4 }
  0x8f   : > { %v527_v48 = vmul.bf16 %v2854_v30, %v2878_v41 }
  0x90   : > { %v719_v62 = vsel %vm718_vm7, %v717_v56, %v716_v38  ;;  %v723_v63 = vmul.bf16 %v717_v56, %v531_v40  ;;  %v995_v17 = vmul.bf16 %v989_v13, %v2876_v39  ;;  %v991_v18 = vsel %vm990_vm8, %v989_v13, %v988_v8 }
  0x91   : > { %v2880_v42 = vld [vmem:[#allocation2 + $0x14] sm:$0xf]  ;;  %v813_v45 = vpop.permute.xlu1 %812  ;;  %v722_v6 = vmul.bf16 %v719_v62, %v2878_v41  ;;  %v1243_v23 = vpop.permute.xlu0 %1242  ;;  %v994_v24 = vmul.bf16 %v991_v18, %v2878_v41 }
  0x92   : > { %v532_v43 = vld [vmem:[#allocation2 + $0x14] sm:$0xf]  ;;  %v2882_v44 = vld [vmem:[#allocation2 + $0xc] sm:$0xff]  ;;  %v2886_v46 = vcombine.low %v2876_v39, %v2880_v42  ;;  %v814_v50 = vrot.slane %v813_v45, 4  ;;  %v997_v15 = vmul.bf16 %v989_v13, %v2880_v42  ;;  %v1244_v27 = vrot.slane %v1243_v23, 4 }
  0x93   : > { %v2510_v47 = vcombine.low %v531_v40, %v532_v43  ;;  %v528_v49 = vmul.bf16 %v2854_v30, %v2882_v44  ;;  %v2897_v52 = vcombine.high %v2878_v41, %v2882_v44  ;;  %v2908_v57 = vcombine.low %v2878_v41, %v2882_v44  ;;  %v2699_v13 = vld [vmem:[%s3220_s4 + $0x28] sm:$0xff]  }
  0x94   : > { %930 = vrot.lane.b32.xlu1 %v2886_v46, %s2740_s17  ;;  %v820_v58 = vmul.bf16 %v814_v50, %v2876_v39  ;;  %v822_v59 = vmul.bf16 %v814_v50, %v2880_v42  ;;  %v725_v61 = vmul.bf16 %v717_v56, %v532_v43  ;;  %v724_v0 = vmul.bf16 %v719_v62, %v2882_v44 }
  0x95   : > { %558 = vrot.lane.b32.xlu0 %v2510_v47, %s2741_s18  ;;  %v2514_v51 = vcombine.high %v527_v48, %v528_v49  ;;  %v2513_v53 = vcombine.low %v527_v48, %v528_v49  ;;  %v1081_v54 = vpop.permute.xlu1 %1080  ;;  %v816_v7 = vsel %vm408_vm1, %v814_v50, %v813_v45  ;;  %v2544_v19 = vcombine.low %v995_v17, %v997_v15  ;;  %v2700_v17 = vld [vmem:[%s3220_s4 + $0x30] sm:$0xff]  }
  0x96   : > { %v1082_v60 = vrot.slane %v1081_v54, 4  ;;  %v2530_v1 = vcombine.low %v820_v58, %v822_v59  ;;  %v2523_v2 = vcombine.low %v723_v63, %v725_v61  ;;  %v2522_v9 = vcombine.high %v722_v6, %v724_v0 }
  0x97   : > { %643 = vmatprep.subr.bf16.mxu0 %v2514_v51  ;;  %v819_v10 = vmul.bf16 %v816_v7, %v2878_v41  ;;  %v821_v11 = vmul.bf16 %v816_v7, %v2882_v44  ;;  %v2521_v14 = vcombine.low %v722_v6, %v724_v0  ;;  %v996_v20 = vmul.bf16 %v991_v18, %v2882_v44  ;;  %v2694_v51 = vld [vmem:[%s3220_s4 + $0x8] sm:$0xff]   ;;  %v2698_v7 = vld [vmem:[%s3220_s4 + $0x20] sm:$0xff]  }
  0x98   : > { %556 = vrot.lane.b32.xlu1 %v2897_v52, %s2741_s18  ;;  %644 = vmatpush1.bf16.msra.mxu0 %v2513_v53  ;;  %v1088_v3 = vmul.bf16 %v1082_v60, %v2876_v39  ;;  %v1090_v5 = vmul.bf16 %v1082_v60, %v2880_v42  ;;  %v1084_v21 = vsel %vm1083_vm9, %v1082_v60, %v1081_v54  ;;  %v2696_v60 = vld [vmem:[%s3220_s4 + $0x10] sm:$0xff]  }
  0x99   : > { %928 = vrot.lane.b32.xlu0 %v2897_v52, %s2740_s17  ;;  %v2529_v16 = vcombine.high %v819_v10, %v821_v11  ;;  %v2528_v22 = vcombine.low %v819_v10, %v821_v11  ;;  %v1087_v25 = vmul.bf16 %v1084_v21, %v2878_v41  ;;  %v1089_v26 = vmul.bf16 %v1084_v21, %v2882_v44 }
  0x9a   : > { %v2551_v12 = vcombine.low %v1088_v3, %v1090_v5  ;;  %v2543_v29 = vcombine.high %v994_v24, %v996_v20  ;;  %v1246_v33 = vsel %vm1245_vm10, %v1244_v27, %v1243_v23  ;;  %v2542_v34 = vcombine.low %v994_v24, %v996_v20  ;;  %v2697_v3 = vld [vmem:[%s3220_s4 + $0x18] sm:$0xff]  }
  0x9b   : > { %2515 = vmatmul.mubr.msk.bf16.vlgmr.msra.gmra.mxu0 %vm408_vm1, %v2695_v55  ;;  %v2550_v31 = vcombine.high %v1087_v25, %v1089_v26  ;;  %v1249_v35 = vmul.bf16 %v1246_v33, %v2878_v41  ;;  %v1251_v36 = vmul.bf16 %v1246_v33, %v2882_v44  ;;  %v2549_v37 = vcombine.low %v1087_v25, %v1089_v26 }
  0x9c   : > { %554 = vrot.lane.b32.xlu1 %v2908_v57, %s2741_s18  ;;  %890 = vmatprep.mubr.bf16.mxu0 %v2733_v4  ;;  %v1250_v40 = vmul.bf16 %v1244_v27, %v2876_v39  ;;  %v1252_v43 = vmul.bf16 %v1244_v27, %v2880_v42  ;;  %v2702_v27 = vld [vmem:[%s3220_s4 + $0x40] sm:$0xff]  }
  0x9d   : > { %926 = vrot.lane.b32.xlu0 %v2908_v57, %s2740_s17  ;;  %v2561_v38 = vcombine.high %v1249_v35, %v1251_v36  ;;  %v2560_v41 = vcombine.low %v1249_v35, %v1251_v36 }
  0x9e   : > { %v2562_v45 = vcombine.low %v1250_v40, %v1252_v43 }
  0xa0   : > { %751 = vrot.lane.b32.xlu1 %v2523_v2, %s2743_s23 }
  0xa1   : > { %848 = vrot.lane.b32.xlu0 %v2530_v1, %s2742_s22 }
  0xa4   : > { %1116 = vrot.lane.b32.xlu1 %v2551_v12, %s2744_s25 }
  0xa5   : > { %749 = vrot.lane.b32.xlu0 %v2522_v9, %s2743_s23 }
  0xa8   : > { %846 = vrot.lane.b32.xlu1 %v2529_v16, %s2742_s22 }
  0xa9   : > { %747 = vrot.lane.b32.xlu0 %v2521_v14, %s2743_s23 }
  0xac   : > { %844 = vrot.lane.b32.xlu1 %v2528_v22, %s2742_s22  ;;  %v2701_v22 = vld [vmem:[%s3220_s4 + $0x38] sm:$0xff]  }
  0xad   : > { %1023 = vrot.lane.b32.xlu0 %v2544_v19, %s2745_s26 }
  0xb0   : > { %1021 = vrot.lane.b32.xlu1 %v2543_v29, %s2745_s26 }
  0xb1   : > { %1185 = vrot.lane.b32.xlu0 %v2886_v46, %s2746_s27 }
  0xb4   : > { %1019 = vrot.lane.b32.xlu1 %v2542_v34, %s2745_s26 }
  0xb5   : > { %1114 = vrot.lane.b32.xlu0 %v2550_v31, %s2744_s25 }
  0xb8   : > { %1183 = vrot.lane.b32.xlu1 %v2897_v52, %s2746_s27 }
  0xb9   : > { %1112 = vrot.lane.b32.xlu0 %v2549_v37, %s2744_s25 }
  0xbc   : > { %1181 = vrot.lane.b32.xlu1 %v2908_v57, %s2746_s27 }
  0xbd   : > { %1276 = vrot.lane.b32.xlu0 %v2561_v38, %s2747_s29 }
  0xc0   : > { %1278 = vrot.lane.b32.xlu1 %v2562_v45, %s2747_s29 }
  0xc1   : > { %1274 = vrot.lane.b32.xlu0 %v2560_v41, %s2747_s29 }
  0xd7   : > { %v3016_v29 = vpop.f32.mrf.mxu0 }
  0xd9   : > { %v3018_v31 = vpop.f32.mrf.mxu0 }
  0xdb   : > { %v3020_v33 = vpop.f32.mrf.mxu0 }
  0xdd   : > { %v3022_v34 = vpop.f32.mrf.mxu0 }
 0x106   : > { %v931_v44 = vpop.permute.xlu1 %930 }
 0x107   : > { %v559_v46 = vpop.permute.xlu0 %558 }
 0x10a   : > { %v557_v48 = vpop.permute.xlu1 %556 }
 0x10b   : > { %v929_v47 = vpop.permute.xlu0 %928  ;;  %v562_v39 = vsel %vm560_vm11, %v557_v48, %v559_v46 }
 0x10c   : > { %582 = vmatprep.subr.bf16.mxu1 %v562_v39  ;;  %v934_v62 = vsel %vm932_vm13, %v929_v47, %v931_v44 }
 0x10e   : > { %v555_v49 = vpop.permute.xlu1 %554 }
 0x10f   : > { %v927_v42 = vpop.permute.xlu0 %926  ;;  %v561_v50 = vsel %vm560_vm11, %v555_v49, %v557_v48 }
 0x110   : > { %583 = vmatpush1.bf16.msra.mxu1 %v561_v50  ;;  %v933_v0 = vsel %vm932_vm13, %v927_v42, %v929_v47 }
 0x112   : > { %v752_v53 = vpop.permute.xlu1 %751 }
 0x113   : > { %v849_v52 = vpop.permute.xlu0 %848  ;;  %2511 = vmatmul.mubr.msk.bf16.vlgmr.msra.gmra.mxu1 %vm408_vm1, %v2694_v51 }
 0x114   : > { %793 = vmatprep.mubr.bf16.mxu1 %v2733_v4 }
 0x116   : > { %v1117_v55 = vpop.permute.xlu1 %1116 }
 0x117   : > { %v750_v54 = vpop.permute.xlu0 %749 }
 0x118   : > { %v755_v56 = vsel %vm753_vm12, %v750_v54, %v752_v53 }
 0x119   : > { %775 = vmatprep.subr.bf16.mxu1 %v755_v56 }
 0x11a   : > { %v847_v58 = vpop.permute.xlu1 %846 }
 0x11b   : > { %v748_v57 = vpop.permute.xlu0 %747  ;;  %v852_v61 = vsel %vm850_vm14, %v847_v58, %v849_v52 }
 0x11c   : > { %v754_v59 = vsel %vm753_vm12, %v748_v57, %v750_v54  ;;  %872 = vmatprep.subr.bf16.mxu0 %v852_v61 }
 0x11d   : > { %776 = vmatpush1.bf16.msra.mxu1 %v754_v59 }
 0x11e   : > { %954 = vmatprep.subr.bf16.mxu1 %v934_v62  ;;  %v845_v1 = vpop.permute.xlu1 %844 }
 0x11f   : > { %v1024_v63 = vpop.permute.xlu0 %1023  ;;  %v851_v2 = vsel %vm850_vm14, %v845_v1, %v847_v58 }
 0x120   : > { %2524 = vmatmul.mubr.msk.bf16.vlgmr.msra.gmra.mxu1 %vm408_vm1, %v2696_v60  ;;  %873 = vmatpush1.bf16.msra.mxu0 %v851_v2 }
 0x121   : > { %955 = vmatpush1.bf16.msra.mxu1 %v933_v0  ;;  %972 = vmatprep.mubr.bf16.mxu1 %v2733_v4 }
 0x122   : > { %v1022_v6 = vpop.permute.xlu1 %1021 }
 0x123   : > { %v1186_v5 = vpop.permute.xlu0 %1185  ;;  %2531 = vmatmul.mubr.msk.bf16.vlgmr.msra.gmra.mxu0 %vm408_vm1, %v2697_v3  ;;  %v1027_v8 = vsel %vm3232_vm15, %v1022_v6, %v1024_v63 }
 0x124   : > { %1047 = vmatprep.subr.bf16.mxu0 %v1027_v8  ;;  %1065 = vmatprep.mubr.bf16.mxu0 %v2733_v4 }
 0x126   : > { %v1020_v10 = vpop.permute.xlu1 %1019 }
 0x127   : > { %v1115_v9 = vpop.permute.xlu0 %1114  ;;  %v1026_v12 = vsel %vm3232_vm15, %v1020_v10, %v1022_v6 }
 0x128   : > { %2538 = vmatmul.mubr.msk.bf16.vlgmr.msra.gmra.mxu1 %vm408_vm1, %v2698_v7  ;;  %v1120_v11 = vsel %vm3231_vm0, %v1115_v9, %v1117_v55  ;;  %1048 = vmatpush1.bf16.msra.mxu0 %v1026_v12 }
 0x129   : > { %1140 = vmatprep.subr.bf16.mxu1 %v1120_v11  ;;  %1158 = vmatprep.mubr.bf16.mxu1 %v2733_v4 }
 0x12a   : > { %v1184_v15 = vpop.permute.xlu1 %1183 }
 0x12b   : > { %v1113_v14 = vpop.permute.xlu0 %1112  ;;  %2545 = vmatmul.mubr.msk.bf16.vlgmr.msra.gmra.mxu0 %vm408_vm1, %v2699_v13  ;;  %v1189_v18 = vsel %vm3230_vm2, %v1184_v15, %v1186_v5 }
 0x12c   : > { %v1119_v16 = vsel %vm3231_vm0, %v1113_v14, %v1115_v9  ;;  %1209 = vmatprep.subr.bf16.mxu0 %v1189_v18  ;;  %1227 = vmatprep.mubr.bf16.mxu0 %v2733_v4 }
 0x12d   : > { %1141 = vmatpush1.bf16.msra.mxu1 %v1119_v16 }
 0x12e   : > { %v1182_v20 = vpop.permute.xlu1 %1181 }
 0x12f   : > { %v1277_v19 = vpop.permute.xlu0 %1276  ;;  %v1188_v21 = vsel %vm3230_vm2, %v1182_v20, %v1184_v15 }
 0x130   : > { %2552 = vmatmul.mubr.msk.bf16.vlgmr.msra.gmra.mxu1 %vm408_vm1, %v2700_v17  ;;  %1210 = vmatpush1.bf16.msra.mxu0 %v1188_v21 }
 0x131   : > { %1320 = vmatprep.mubr.bf16.mxu1 %v2733_v4 }
 0x132   : > { %v1279_v24 = vpop.permute.xlu1 %1278 }
 0x133   : > { %v1275_v23 = vpop.permute.xlu0 %1274  ;;  %2556 = vmatmul.mubr.msk.bf16.vlgmr.msra.gmra.mxu0 %vm408_vm1, %v2701_v22  ;;  %v1282_v26 = vsel %vm3229_vm3, %v1277_v19, %v1279_v24 }
 0x134   : > { %v1281_v25 = vsel %vm3229_vm3, %v1275_v23, %v1277_v19  ;;  %1302 = vmatprep.subr.bf16.mxu1 %v1282_v26  ;;  %1493 = vmatprep.mubr.bf16.mxu0 %v2733_v4  ;;  %v1340_v26 = vstv %s1335_s24 }
 0x135   : > { %1303 = vmatpush1.bf16.msra.mxu1 %v1281_v25 }
 0x138   : > { %2563 = vmatmul.mubr.msk.bf16.vlgmr.msra.gmra.mxu1 %vm408_vm1, %v2702_v27 }
 0x139   : > { %1554 = vmatprep.mubr.bf16.mxu1 %v2733_v4 }
 0x15b   : > { %v663_v36 = vpop.f32.mrf.mxu0 }
 0x15d   : > { %v665_v40 = vpop.f32.mrf.mxu0 }
 0x15f   : > { %v667_v41 = vpop.f32.mrf.mxu0 }
 0x161   : > { %v669_v46 = vpop.f32.mrf.mxu0 }
 0x1d3   : > { %v602_v35 = vpop.f32.mrf.mxu1 }
 0x1d4   : > { %v664_v54 = vadd.f32 %v663_v36, %v602_v35 }
 0x1d5   : > { %v604_v37 = vpop.f32.mrf.mxu1 }
 0x1d6   : > { %v666_v57 = vadd.f32 %v665_v40, %v604_v37 }
 0x1d7   : > { %v606_v38 = vpop.f32.mrf.mxu1 }
 0x1d8   : > { %v668_v61 = vadd.f32 %v667_v41, %v606_v38 }
 0x1d9   : > { %v608_v43 = vpop.f32.mrf.mxu1 }
 0x1da   : > { %v670_v2 = vadd.f32 %v669_v46, %v608_v43 }
 0x1e0   : > { %v795_v45 = vpop.f32.mrf.mxu1 }
 0x1e1   : > { %v804_v58 = vadd.f32 %v795_v45, %v664_v54 }
 0x1e2   : > { %v797_v44 = vpop.f32.mrf.mxu1 }
 0x1e3   : > { %v892_v48 = vpop.f32.mrf.mxu0  ;;  %v805_v62 = vadd.f32 %v797_v44, %v666_v57 }
 0x1e4   : > { %v799_v47 = vpop.f32.mrf.mxu1  ;;  %v901_v63 = vadd.f32 %v892_v48, %v804_v58 }
 0x1e5   : > { %v894_v42 = vpop.f32.mrf.mxu0  ;;  %v806_v3 = vadd.f32 %v799_v47, %v668_v61 }
 0x1e6   : > { %v801_v39 = vpop.f32.mrf.mxu1  ;;  %v902_v5 = vadd.f32 %v894_v42, %v805_v62 }
 0x1e7   : > { %v896_v50 = vpop.f32.mrf.mxu0  ;;  %v807_v9 = vadd.f32 %v801_v39, %v670_v2 }
 0x1e8   : > { %v974_v49 = vpop.f32.mrf.mxu1  ;;  %v903_v10 = vadd.f32 %v896_v50, %v806_v3 }
 0x1e9   : > { %v898_v52 = vpop.f32.mrf.mxu0  ;;  %v983_v6 = vadd.f32 %v974_v49, %v901_v63 }
 0x1ea   : > { %v976_v51 = vpop.f32.mrf.mxu1  ;;  %v904_v15 = vadd.f32 %v898_v52, %v807_v9 }
 0x1eb   : > { %v1067_v55 = vpop.f32.mrf.mxu0  ;;  %v984_v11 = vadd.f32 %v976_v51, %v902_v5 }
 0x1ec   : > { %v978_v53 = vpop.f32.mrf.mxu1  ;;  %v1076_v12 = vadd.f32 %v1067_v55, %v983_v6 }
 0x1ed   : > { %v1069_v59 = vpop.f32.mrf.mxu0  ;;  %v985_v16 = vadd.f32 %v978_v53, %v903_v10 }
 0x1ee   : > { %v980_v56 = vpop.f32.mrf.mxu1  ;;  %v1077_v17 = vadd.f32 %v1069_v59, %v984_v11 }
 0x1ef   : > { %v1071_v0 = vpop.f32.mrf.mxu0  ;;  %v986_v20 = vadd.f32 %v980_v56, %v904_v15 }
 0x1f0   : > { %v1160_v60 = vpop.f32.mrf.mxu1  ;;  %v1078_v21 = vadd.f32 %v1071_v0, %v985_v16 }
 0x1f1   : > { %v1073_v7 = vpop.f32.mrf.mxu0  ;;  %v1169_v18 = vadd.f32 %v1160_v60, %v1076_v12 }
 0x1f2   : > { %v1162_v1 = vpop.f32.mrf.mxu1  ;;  %v1079_v27 = vadd.f32 %v1073_v7, %v986_v20 }
 0x1f3   : > { %v1229_v13 = vpop.f32.mrf.mxu0  ;;  %v1170_v22 = vadd.f32 %v1162_v1, %v1077_v17 }
 0x1f4   : > { %v1164_v8 = vpop.f32.mrf.mxu1  ;;  %v1238_v23 = vadd.f32 %v1229_v13, %v1169_v18 }
 0x1f5   : > { %v1231_v19 = vpop.f32.mrf.mxu0  ;;  %v1171_v35 = vadd.f32 %v1164_v8, %v1078_v21 }
 0x1f6   : > { %v1166_v14 = vpop.f32.mrf.mxu1  ;;  %v1239_v36 = vadd.f32 %v1231_v19, %v1170_v22 }
 0x1f7   : > { %v1233_v24 = vpop.f32.mrf.mxu0  ;;  %v1172_v43 = vadd.f32 %v1166_v14, %v1079_v27 }
 0x1f8   : > { %v1322_v25 = vpop.f32.mrf.mxu1  ;;  %v1240_v41 = vadd.f32 %v1233_v24, %v1171_v35 }
 0x1f9   : > { %v1331_v37 = vadd.f32 %v1322_v25, %v1238_v23  ;;  %v1235_v38 = vpop.f32.mrf.mxu0 }
 0x1fa   : > { %v1324_v40 = vpop.f32.mrf.mxu1  ;;  %v1241_v47 = vadd.f32 %v1235_v38, %v1172_v43 }
 0x1fb   : > { %v1341_v45 = vmul.f32 %v1340_v26, %v1331_v37  ;;  %v1332_v44 = vadd.f32 %v1324_v40, %v1239_v36  ;;  %vm1336_vm3 = vcmp.ge.f32.partialorder %v1331_v37, 0.0 }
 0x1fc   : > { %v1326_v46 = vpop.f32.mrf.mxu1 }
 0x1fd   : > { %vm1337_vm2 = vcmp.ge.f32.partialorder %v1332_v44, 0.0  ;;  %v1342_v48 = vmul.f32 %v1340_v26, %v1332_v44  ;;  %v1333_v39 = vadd.f32 %v1326_v46, %v1240_v41  ;;  %v1345_v51 = vsel %vm1336_vm3, %v1331_v37, %v1341_v45 }
 0x1fe   : > { %v1328_v42 = vpop.f32.mrf.mxu1 }
 0x1ff   : > { %v1343_v49 = vmul.f32 %v1340_v26, %v1333_v39  ;;  %v1334_v50 = vadd.f32 %v1328_v42, %v1241_v47  ;;  %v1346_v52 = vsel %vm1337_vm2, %v1332_v44, %v1342_v48  ;;  %vm1338_vm0 = vcmp.ge.f32.partialorder %v1333_v39, 0.0 }
 0x200   : > { %v2639_v53 = vpack.c.bf16 %v1346_v52, %v1345_v51 }
 0x201   : > { %vm1339_vm15 = vcmp.ge.f32.partialorder %v1334_v50, 0.0  ;;  %v1344_v54 = vmul.f32 %v1340_v26, %v1334_v50  ;;  %v1347_v55 = vsel %vm1338_vm0, %v1333_v39, %v1343_v49 }
 0x202   : > { %1359 = vrot.lane.b32.xlu1 %v2639_v53, %s2734_s28 }
 0x203   : > { %v1348_v56 = vsel %vm1339_vm15, %v1334_v50, %v1344_v54 }
 0x204   : > { %v2640_v57 = vpack.c.bf16 %v1348_v56, %v1347_v55 }
 0x206   : > { %1361 = vrot.lane.b32.xlu0 %v2640_v57, %s2734_s28  ;;  %1608 = vrot.lane.b32.xlu1 %v2845_v28, %s2735_s12 }
 0x20a   : > { %1703 = vrot.lane.b32.xlu0 %v2854_v30, %s2737_s14  ;;  %1875 = vrot.lane.b32.xlu1 %v2845_v28, %s2736_s13 }
 0x20e   : > { %1966 = vrot.lane.b32.xlu0 %v2854_v30, %s2739_s16  ;;  %2125 = vrot.lane.b32.xlu1 %v2845_v28, %s2738_s15 }
 0x274   : > { %v1360_v58 = vpop.permute.xlu1 %1359 }
 0x275   : > { %v1363_v59 = vrot.slane %v1360_v58, 4 }
 0x277   : > { %v1365_v60 = vsel %vm466_vm4, %v1363_v59, %v1360_v58  ;;  %1372 = vst.msk [vmem:[#allocation2 + $0x8] sm:$0xf] %vm477_vm5, %v1363_v59 }
 0x278   : > { %1371 = vst.msk [vmem:[#allocation2] sm:$0xff] %vm2864_vm6, %v1365_v60  ;;  %v1362_v61 = vpop.permute.xlu0 %1361  ;;  %v1609_v11 = vpop.permute.xlu1 %1608 }
 0x279   : > { %v1364_v62 = vrot.slane %v1362_v61, 4  ;;  %v1610_v15 = vrot.slane %v1609_v11, 4 }
 0x27b   : > { %v1366_v63 = vsel %vm466_vm4, %v1364_v62, %v1362_v61  ;;  %1374 = vst.msk [vmem:[#allocation2 + $0x14] sm:$0xf] %vm477_vm5, %v1364_v62  ;;  %v1611_v21 = vsel %vm718_vm7, %v1610_v15, %v1609_v11  ;;  %vm3235_vm4 = vcmask 900096  }
 0x27c   : > { %1373 = vst.msk [vmem:[#allocation2 + $0xc] sm:$0xff] %vm2864_vm6, %v1366_v63  ;;  %v1704_v28 = vpop.permute.xlu0 %1703  ;;  %v1876_v38 = vpop.permute.xlu1 %1875  ;;  %vm3236_vm5 = vmmov %vm3235_vm4  ;;  %vm3237_vm6 = vcmask 785408  }
 0x27d   : > { %v1705_v16 = vrot.slane %v1704_v28, 4  ;;  %v1877_v44 = vrot.slane %v1876_v38, 4  ;;  %vm3238_vm7 = vmmov %vm3237_vm6 }
 0x27e   : > { %v3044_v0 = vld [vmem:[#allocation2 + $0x8] sm:$0xf] }
 0x27f   : > { %v1425_v2 = vld [vmem:[#allocation2 + $0x8] sm:$0xf]  ;;  %v3048_v5 = vld [vmem:[#allocation2] sm:$0xff]  ;;  %v1710_v22 = vmul.bf16 %v1705_v16, %v3044_v0  ;;  %v1706_v37 = vsel %vm408_vm1, %v1705_v16, %v1704_v28  ;;  %v1882_v39 = vmul.bf16 %v1877_v44, %v3044_v0  ;;  %v1878_v42 = vsel %vm990_vm8, %v1877_v44, %v1876_v38 }
 0x280   : > { %v1421_v32 = vmul.bf16 %v2854_v30, %v3048_v5  ;;  %v1967_v12 = vpop.permute.xlu0 %1966  ;;  %v1615_v23 = vmul.bf16 %v1610_v15, %v1425_v2  ;;  %v1614_v36 = vmul.bf16 %v1611_v21, %v3048_v5  ;;  %v1709_v45 = vmul.bf16 %v1706_v37, %v3048_v5  ;;  %v2126_v54 = vpop.permute.xlu1 %2125 }
 0x281   : > { %v1968_v17 = vrot.slane %v1967_v12, 4  ;;  %v1881_v53 = vmul.bf16 %v1878_v42, %v3048_v5  ;;  %v2127_v58 = vrot.slane %v2126_v54, 4  ;;  %vm3239_vm8 = vcmask 777216  }
 0x282   : > { %v3046_v1 = vld [vmem:[#allocation2 + $0x14] sm:$0xf] }
 0x283   : > { %v1426_v3 = vld [vmem:[#allocation2 + $0x14] sm:$0xf]  ;;  %v3050_v6 = vld [vmem:[#allocation2 + $0xc] sm:$0xff]  ;;  %v3054_v7 = vcombine.low %v3044_v0, %v3046_v1  ;;  %v1712_v19 = vmul.bf16 %v1705_v16, %v3046_v1  ;;  %v1973_v27 = vmul.bf16 %v1968_v17, %v3044_v0  ;;  %v1975_v35 = vmul.bf16 %v1968_v17, %v3046_v1 }
 0x284   : > { %v2573_v8 = vcombine.low %v1425_v2, %v1426_v3  ;;  %v1422_v9 = vmul.bf16 %v2854_v30, %v3050_v6  ;;  %v3065_v10 = vcombine.high %v3048_v5, %v3050_v6  ;;  %v2708_v30 = vld [vmem:[%s3222_s6] sm:$0xff]   ;;  %v2598_v18 = vcombine.low %v3048_v5, %v3050_v6 }
 0x285   : > { %1819 = vrot.lane.b32.xlu0 %v3054_v7, %s2740_s17  ;;  %v1617_v20 = vmul.bf16 %v1610_v15, %v1426_v3  ;;  %v1616_v24 = vmul.bf16 %v1611_v21, %v3050_v6  ;;  %v2593_v25 = vcombine.low %v1710_v22, %v1712_v19  ;;  %v1711_v40 = vmul.bf16 %v1706_v37, %v3050_v6  ;;  %v2709_v22 = vld [vmem:[%s3222_s6 + $0x10] sm:$0xff]  }
 0x286   : > { %1452 = vrot.lane.b32.xlu1 %v2573_v8, %s2741_s18  ;;  %v2577_v13 = vcombine.high %v1421_v32, %v1422_v9  ;;  %v2576_v14 = vcombine.low %v1421_v32, %v1422_v9  ;;  %v2614_v43 = vcombine.low %v1973_v27, %v1975_v35  ;;  %v1884_v48 = vmul.bf16 %v1877_v44, %v3046_v1  ;;  %v2710_v35 = vld [vmem:[%s3222_s6 + $0x18] sm:$0xff]  }
 0x287   : > { %v2586_v26 = vcombine.low %v1615_v23, %v1617_v20  ;;  %v2585_v41 = vcombine.high %v1614_v36, %v1616_v24  ;;  %v2592_v46 = vcombine.high %v1709_v45, %v1711_v40  ;;  %v2584_v47 = vcombine.low %v1614_v36, %v1616_v24 }
 0x288   : > { %1536 = vmatprep.subr.bf16.mxu1 %v2577_v13  ;;  %v1883_v49 = vmul.bf16 %v1878_v42, %v3050_v6  ;;  %v2591_v50 = vcombine.low %v1709_v45, %v1711_v40  ;;  %v2607_v51 = vcombine.low %v1882_v39, %v1884_v48  ;;  %v1969_v52 = vsel %vm1083_vm9, %v1968_v17, %v1967_v12  ;;  %v2707_v13 = vld [vmem:[%s3222_s6 + $0x8] sm:$0xff]   ;;  %v2711_v40 = vld [vmem:[%s3222_s6 + $0x20] sm:$0xff]   ;;  %vm3240_vm9 = vmmov %vm3239_vm8 }
 0x289   : > { %1450 = vrot.lane.b32.xlu0 %v3065_v10, %s2741_s18  ;;  %1537 = vmatpush1.bf16.msra.mxu1 %v2576_v14  ;;  %v1972_v55 = vmul.bf16 %v1969_v52, %v3048_v5  ;;  %v1974_v56 = vmul.bf16 %v1969_v52, %v3050_v6  ;;  %v2128_v61 = vsel %vm1245_vm10, %v2127_v58, %v2126_v54  ;;  %vm3241_vm10 = vcmask 769024  }
 0x28a   : > { %1817 = vrot.lane.b32.xlu1 %v3065_v10, %s2740_s17  ;;  %v2606_v57 = vcombine.high %v1881_v53, %v1883_v49  ;;  %v2605_v60 = vcombine.low %v1881_v53, %v1883_v49  ;;  %v2131_v62 = vmul.bf16 %v2128_v61, %v3048_v5  ;;  %v2133_v63 = vmul.bf16 %v2128_v61, %v3050_v6  ;;  %v2713_v49 = vld [vmem:[%s3222_s6 + $0x30] sm:$0xff]   ;;  %v2714_v53 = vld [vmem:[%s3222_s6 + $0x38] sm:$0xff]  }
 0x28b   : > { %v2613_v59 = vcombine.high %v1972_v55, %v1974_v56  ;;  %v2612_v28 = vcombine.low %v1972_v55, %v1974_v56  ;;  %v2132_v3 = vmul.bf16 %v2127_v58, %v3044_v0 }
 0x28c   : > { %2578 = vmatmul.mubr.msk.bf16.vlgmr.msra.gmra.mxu1 %vm408_vm1, %v2708_v30  ;;  %v2624_v2 = vcombine.high %v2131_v62, %v2133_v63  ;;  %v2623_v32 = vcombine.low %v2131_v62, %v2133_v63 }
 0x28d   : > { %1448 = vrot.lane.b32.xlu0 %v2598_v18, %s2741_s18  ;;  %1779 = vmatprep.mubr.bf16.mxu1 %v2733_v4 }
 0x28e   : > { %1815 = vrot.lane.b32.xlu1 %v2598_v18, %s2740_s17 }
 0x291   : > { %1643 = vrot.lane.b32.xlu0 %v2586_v26, %s2743_s23 }
 0x292   : > { %1738 = vrot.lane.b32.xlu1 %v2593_v25, %s2742_s22 }
 0x295   : > { %2001 = vrot.lane.b32.xlu0 %v2614_v43, %s2744_s25 }
 0x296   : > { %1641 = vrot.lane.b32.xlu1 %v2585_v41, %s2743_s23 }
 0x299   : > { %1736 = vrot.lane.b32.xlu0 %v2592_v46, %s2742_s22  ;;  %v2712_v46 = vld [vmem:[%s3222_s6 + $0x28] sm:$0xff]  }
 0x29a   : > { %1639 = vrot.lane.b32.xlu1 %v2584_v47, %s2743_s23 }
 0x29d   : > { %1734 = vrot.lane.b32.xlu0 %v2591_v50, %s2742_s22 }
 0x29e   : > { %1910 = vrot.lane.b32.xlu1 %v2607_v51, %s2745_s26 }
 0x2a1   : > { %1908 = vrot.lane.b32.xlu0 %v2606_v57, %s2745_s26 }
 0x2a2   : > { %2069 = vrot.lane.b32.xlu1 %v3054_v7, %s2746_s27  ;;  %v2134_v7 = vmul.bf16 %v2127_v58, %v3046_v1  ;;  %v2715_v58 = vld [vmem:[%s3222_s6 + $0x40] sm:$0xff]  }
 0x2a4   : > { %v2625_v8 = vcombine.low %v2132_v3, %v2134_v7 }
 0x2a5   : > { %1906 = vrot.lane.b32.xlu0 %v2605_v60, %s2745_s26 }
 0x2a6   : > { %1999 = vrot.lane.b32.xlu1 %v2613_v59, %s2744_s25 }
 0x2a9   : > { %2067 = vrot.lane.b32.xlu0 %v3065_v10, %s2746_s27 }
 0x2aa   : > { %1997 = vrot.lane.b32.xlu1 %v2612_v28, %s2744_s25 }
 0x2ad   : > { %2065 = vrot.lane.b32.xlu0 %v2598_v18, %s2746_s27  ;;  %s3243_s27 = sshll.u32 %s3245_s20, 4 }
 0x2ae   : > { %2158 = vrot.lane.b32.xlu1 %v2624_v2, %s2747_s29  ;;  %s387_s21 = scalar_lea.vmem %s3227_s11, %s3243_s27 }
 0x2b1   : > { %2160 = vrot.lane.b32.xlu0 %v2625_v8, %s2747_s29 }
 0x2b2   : > { %2156 = vrot.lane.b32.xlu1 %v2623_v32, %s2747_s29 }
 0x2f7   : > { %v1820_v5 = vpop.permute.xlu0 %1819 }
 0x2f8   : > { %v1453_v6 = vpop.permute.xlu1 %1452 }
 0x2fb   : > { %v1451_v9 = vpop.permute.xlu0 %1450 }
 0x2fc   : > { %v1818_v11 = vpop.permute.xlu1 %1817  ;;  %v1455_v10 = vsel %vm560_vm11, %v1451_v9, %v1453_v6 }
 0x2fd   : > { %1475 = vmatprep.subr.bf16.mxu0 %v1455_v10  ;;  %v1822_v23 = vsel %vm932_vm13, %v1818_v11, %v1820_v5 }
 0x2ff   : > { %v1449_v0 = vpop.permute.xlu0 %1448 }
 0x300   : > { %v1816_v12 = vpop.permute.xlu1 %1815  ;;  %v1454_v1 = vsel %vm560_vm11, %v1449_v0, %v1451_v9  ;;  %vm3242_vm11 = vmmov %vm3241_vm10 }
 0x301   : > { %1476 = vmatpush1.bf16.msra.mxu0 %v1454_v1  ;;  %v1821_v26 = vsel %vm932_vm13, %v1816_v12, %v1818_v11  ;;  %vm2305_vm13 = vcmask 31744  }
 0x303   : > { %v1644_v14 = vpop.permute.xlu0 %1643 }
 0x304   : > { %v1739_v15 = vpop.permute.xlu1 %1738  ;;  %2574 = vmatmul.mubr.msk.bf16.vlgmr.msra.gmra.mxu0 %vm408_vm1, %v2707_v13 }
 0x305   : > { %1684 = vmatprep.mubr.bf16.mxu0 %v2733_v4 }
 0x307   : > { %v2002_v16 = vpop.permute.xlu0 %2001 }
 0x308   : > { %v1642_v30 = vpop.permute.xlu1 %1641 }
 0x309   : > { %v1646_v17 = vsel %vm753_vm12, %v1642_v30, %v1644_v14 }
 0x30a   : > { %1666 = vmatprep.subr.bf16.mxu0 %v1646_v17 }
 0x30b   : > { %v1737_v18 = vpop.permute.xlu0 %1736 }
 0x30c   : > { %v1640_v19 = vpop.permute.xlu1 %1639  ;;  %v1741_v21 = vsel %vm850_vm14, %v1737_v18, %v1739_v15 }
 0x30d   : > { %v1645_v20 = vsel %vm753_vm12, %v1640_v19, %v1642_v30  ;;  %1761 = vmatprep.subr.bf16.mxu1 %v1741_v21  ;;  %vm2749_vm12 = vmmov 0  }
 0x30e   : > { %1667 = vmatpush1.bf16.msra.mxu0 %v1645_v20 }
 0x30f   : > { %1842 = vmatprep.subr.bf16.mxu0 %v1822_v23  ;;  %v1735_v24 = vpop.permute.xlu0 %1734 }
 0x310   : > { %v1911_v25 = vpop.permute.xlu1 %1910  ;;  %v1740_v27 = vsel %vm850_vm14, %v1735_v24, %v1737_v18  ;;  %vm2312_vm14 = vcmask 1043456  }
 0x311   : > { %2587 = vmatmul.mubr.msk.bf16.vlgmr.msra.gmra.mxu0 %vm408_vm1, %v2709_v22  ;;  %1762 = vmatpush1.bf16.msra.mxu1 %v1740_v27 }
 0x312   : > { %1843 = vmatpush1.bf16.msra.mxu0 %v1821_v26  ;;  %1860 = vmatprep.mubr.bf16.mxu0 %v2733_v4 }
 0x313   : > { %v1909_v36 = vpop.permute.xlu0 %1908 }
 0x314   : > { %v2070_v37 = vpop.permute.xlu1 %2069  ;;  %2594 = vmatmul.mubr.msk.bf16.vlgmr.msra.gmra.mxu1 %vm408_vm1, %v2710_v35  ;;  %v1913_v38 = vsel %vm3235_vm4, %v1909_v36, %v1911_v25 }
 0x315   : > { %1933 = vmatprep.subr.bf16.mxu1 %v1913_v38  ;;  %1951 = vmatprep.mubr.bf16.mxu1 %v2733_v4 }
 0x317   : > { %v1907_v43 = vpop.permute.xlu0 %1906 }
 0x318   : > { %v2000_v41 = vpop.permute.xlu1 %1999  ;;  %v1912_v45 = vsel %vm3236_vm5, %v1907_v43, %v1909_v36 }
 0x319   : > { %2601 = vmatmul.mubr.msk.bf16.vlgmr.msra.gmra.mxu0 %vm408_vm1, %v2711_v40  ;;  %v2004_v44 = vsel %vm3237_vm6, %v2000_v41, %v2002_v16  ;;  %1934 = vmatpush1.bf16.msra.mxu1 %v1912_v45 }
 0x31a   : > { %2024 = vmatprep.subr.bf16.mxu0 %v2004_v44  ;;  %2042 = vmatprep.mubr.bf16.mxu0 %v2733_v4 }
 0x31b   : > { %v2068_v47 = vpop.permute.xlu0 %2067 }
 0x31c   : > { %v1998_v48 = vpop.permute.xlu1 %1997  ;;  %2608 = vmatmul.mubr.msk.bf16.vlgmr.msra.gmra.mxu1 %vm408_vm1, %v2712_v46  ;;  %v2072_v42 = vsel %vm3239_vm8, %v2068_v47, %v2070_v37 }
 0x31d   : > { %v2003_v39 = vsel %vm3238_vm7, %v1998_v48, %v2000_v41  ;;  %2092 = vmatprep.subr.bf16.mxu1 %v2072_v42  ;;  %2110 = vmatprep.mubr.bf16.mxu1 %v2733_v4 }
 0x31e   : > { %2025 = vmatpush1.bf16.msra.mxu0 %v2003_v39 }
 0x31f   : > { %v2066_v50 = vpop.permute.xlu0 %2065 }
 0x320   : > { %v2159_v51 = vpop.permute.xlu1 %2158  ;;  %v2071_v52 = vsel %vm3240_vm9, %v2066_v50, %v2068_v47 }
 0x321   : > { %2615 = vmatmul.mubr.msk.bf16.vlgmr.msra.gmra.mxu0 %vm408_vm1, %v2713_v49  ;;  %2093 = vmatpush1.bf16.msra.mxu1 %v2071_v52 }
 0x322   : > { %2201 = vmatprep.mubr.bf16.mxu0 %v2733_v4 }
 0x323   : > { %v2161_v54 = vpop.permute.xlu0 %2160 }
 0x324   : > { %v2157_v55 = vpop.permute.xlu1 %2156  ;;  %2619 = vmatmul.mubr.msk.bf16.vlgmr.msra.gmra.mxu1 %vm408_vm1, %v2714_v53  ;;  %v2163_v57 = vsel %vm3242_vm11, %v2159_v51, %v2161_v54 }
 0x325   : > { %v2162_v56 = vsel %vm3241_vm10, %v2157_v55, %v2159_v51  ;;  %2183 = vmatprep.subr.bf16.mxu0 %v2163_v57 }
 0x326   : > { %2184 = vmatpush1.bf16.msra.mxu0 %v2162_v56 }
 0x329   : > { %2626 = vmatmul.mubr.msk.bf16.vlgmr.msra.gmra.mxu0 %vm408_vm1, %v2715_v58 }
 0x34c   : > { %v1556_v60 = vpop.f32.mrf.mxu1 }
 0x34e   : > { %v1558_v4 = vpop.f32.mrf.mxu1 }
 0x350   : > { %v1560_v63 = vpop.f32.mrf.mxu1 }
 0x352   : > { %v1562_v3 = vpop.f32.mrf.mxu1 }
 0x3c4   : > { %v1495_v59 = vpop.f32.mrf.mxu0 }
 0x3c5   : > { %v1557_v13 = vadd.f32 %v1556_v60, %v1495_v59 }
 0x3c6   : > { %v1497_v61 = vpop.f32.mrf.mxu0 }
 0x3c7   : > { %v1559_v14 = vadd.f32 %v1558_v4, %v1497_v61 }
 0x3c8   : > { %v1499_v62 = vpop.f32.mrf.mxu0 }
 0x3c9   : > { %v1561_v20 = vadd.f32 %v1560_v63, %v1499_v62 }
 0x3ca   : > { %v1501_v28 = vpop.f32.mrf.mxu0 }
 0x3cb   : > { %v1563_v21 = vadd.f32 %v1562_v3, %v1501_v28 }
 0x3d1   : > { %v1686_v2 = vpop.f32.mrf.mxu0 }
 0x3d2   : > { %v1695_v30 = vadd.f32 %v1686_v2, %v1557_v13 }
 0x3d3   : > { %v1688_v7 = vpop.f32.mrf.mxu0 }
 0x3d4   : > { %v1781_v32 = vpop.f32.mrf.mxu1  ;;  %v1696_v17 = vadd.f32 %v1688_v7, %v1559_v14 }
 0x3d5   : > { %v1690_v8 = vpop.f32.mrf.mxu0  ;;  %v1790_v22 = vadd.f32 %v1781_v32, %v1695_v30 }
 0x3d6   : > { %v1783_v6 = vpop.f32.mrf.mxu1  ;;  %v1697_v26 = vadd.f32 %v1690_v8, %v1561_v20  ;;  %v2748_v8 = vmov 0.0  }
 0x3d7   : > { %v1692_v5 = vpop.f32.mrf.mxu0  ;;  %v1791_v23 = vadd.f32 %v1783_v6, %v1696_v17  ;;  %2649 = vmatprep.subr.mxu1 %v2748_v8  ;;  %2653 = vmatprep.mubr.msk.f32.mxu1 %vm2749_vm12, %v2748_v8  ;;  %v2303_v17 = vld [vmem:[%s3226_s10] sm:$0xff] }
 0x3d8   : > { %v1785_v9 = vpop.f32.mrf.mxu1  ;;  %v1698_v27 = vadd.f32 %v1692_v5, %v1563_v21 }
 0x3d9   : > { %v1862_v11 = vpop.f32.mrf.mxu0  ;;  %v1792_v40 = vadd.f32 %v1785_v9, %v1697_v26 }
 0x3da   : > { %v1787_v10 = vpop.f32.mrf.mxu1  ;;  %v1871_v35 = vadd.f32 %v1862_v11, %v1790_v22  ;;  %v2225_v11 = vld [vmem:[%s3223_s7] sm:$0xf] }
 0x3db   : > { %v1864_v0 = vpop.f32.mrf.mxu0  ;;  %v1793_v43 = vadd.f32 %v1787_v10, %v1698_v27  ;;  %v2301_v10 = vld [vmem:[%s3225_s9] sm:$0xff] }
 0x3dc   : > { %v1953_v1 = vpop.f32.mrf.mxu1  ;;  %v1872_v36 = vadd.f32 %v1864_v0, %v1791_v23  ;;  %v2226_v0 = vld [vmem:[%s3224_s8] sm:$0xf] }
 0x3dd   : > { %v1866_v12 = vpop.f32.mrf.mxu0  ;;  %v1962_v41 = vadd.f32 %v1953_v1, %v1871_v35 }
 0x3de   : > { %v1955_v16 = vpop.f32.mrf.mxu1  ;;  %v1873_v47 = vadd.f32 %v1866_v12, %v1792_v40 }
 0x3df   : > { %v1868_v15 = vpop.f32.mrf.mxu0  ;;  %v1963_v45 = vadd.f32 %v1955_v16, %v1872_v36  ;;  %v2304_v16 = vld [vmem:[%s3226_s10 + $0x8] sm:$0xff] }
 0x3e0   : > { %v1957_v18 = vpop.f32.mrf.mxu1  ;;  %v1874_v48 = vadd.f32 %v1868_v15, %v1793_v43  ;;  %v2302_v15 = vld [vmem:[%s3225_s9 + $0x8] sm:$0xff] }
 0x3e1   : > { %v2044_v19 = vpop.f32.mrf.mxu0  ;;  %v1964_v51 = vadd.f32 %v1957_v18, %v1873_v47 }
 0x3e2   : > { %v1959_v24 = vpop.f32.mrf.mxu1  ;;  %v2053_v39 = vadd.f32 %v2044_v19, %v1962_v41 }
 0x3e3   : > { %v2046_v25 = vpop.f32.mrf.mxu0  ;;  %v1965_v52 = vadd.f32 %v1959_v24, %v1874_v48 }
 0x3e4   : > { %v2112_v38 = vpop.f32.mrf.mxu1  ;;  %v2054_v42 = vadd.f32 %v2046_v25, %v1963_v45 }
 0x3e5   : > { %v2048_v37 = vpop.f32.mrf.mxu0  ;;  %v2121_v53 = vadd.f32 %v2112_v38, %v2053_v39 }
 0x3e6   : > { %v2114_v46 = vpop.f32.mrf.mxu1  ;;  %v2055_v57 = vadd.f32 %v2048_v37, %v1964_v51 }
 0x3e7   : > { %v2050_v44 = vpop.f32.mrf.mxu0  ;;  %v2122_v54 = vadd.f32 %v2114_v46, %v2054_v42 }
 0x3e8   : > { %v2116_v49 = vpop.f32.mrf.mxu1  ;;  %v2056_v58 = vadd.f32 %v2050_v44, %v1965_v52 }
 0x3e9   : > { %v2203_v50 = vpop.f32.mrf.mxu0  ;;  %v2123_v4 = vadd.f32 %v2116_v49, %v2055_v57 }
 0x3ea   : > { %v2118_v55 = vpop.f32.mrf.mxu1  ;;  %v3177_v59 = vadd.f32 %v2203_v50, %v2121_v53 }
 0x3eb   : > { %v2205_v56 = vpop.f32.mrf.mxu0  ;;  %v2124_v62 = vadd.f32 %v2118_v55, %v2056_v58 }
 0x3ec   : > { %v3179_v60 = vadd.f32 %v2205_v56, %v2122_v54 }
 0x3ed   : > { %v2207_v61 = vpop.f32.mrf.mxu0 }
 0x3ee   : > { %v2216_v63 = vadd.f32 %v3179_v60, %v3177_v59  ;;  %v2214_v2 = vadd.f32 %v2207_v61, %v2123_v4 }
 0x3ef   : > { %v2209_v28 = vpop.f32.mrf.mxu0 }
 0x3f0   : > { %v2215_v3 = vadd.f32 %v2209_v28, %v2124_v62  ;;  %2217 = vadd.xlane.f32.xlu1 %v2216_v63 }
 0x3f2   : > { %v2219_v7 = vadd.f32 %v2215_v3, %v2214_v2 }
 0x3f4   : > { %2220 = vadd.xlane.f32.xlu0 %v2219_v7 }
 0x479   : > { %v2218_v32 = vpop.xlane.xlu1 %2217 }
 0x47a   : > { %v2223_v9 = vmul.f32 0.00390625, %v2218_v32 }
 0x47d   : > { %v2221_v5 = vpop.xlane.xlu0 %2220 }
 0x47e   : > { %v2224_v6 = vmul.f32 0.00390625, %v2221_v5 }
 0x480   : > { %2650 = vmatpush3.msra.mxu1 %v2224_v6 }
 0x481   : > { %2651 = vmatprep.subr.mxu1 %v2748_v8 }
 0x482   : > { %2652 = vmatpush3.msra.mxu1 %v2223_v9 }
 0x483   : > { %2654 = vmatmul.mubr.msk.f32.vlgmr.msra.gmra.mxu1 %vm408_vm1, %v2225_v11 }
 0x484   : > { %2658 = vmatprep.mubr.msk.f32.mxu1 %vm2305_vm13, %v2301_v10 }
 0x543   : > { %v2296_v12 = vpop.f32.mrf.mxu1 }
 0x544   : > { %v2297_v1 = vadd.f32 %v2296_v12, %v2226_v0 }
 0x545   : > { %v2655_v13 = vpop.f32.mrf.mxu1 }
 0x546   : > { %v2300_v14 = vmax.f32 %v2297_v1, 0.0 }
 0x548   : > { %2656 = vmatprep.subr.msk.mxu1 %vm2312_vm14, %v2300_v14 }
 0x549   : > { %2657 = vmatpush3.msk.msra.mxu1 %vm2312_vm14, %v2300_v14 }
 0x54a   : > { %2659 = vmatmul.mubr.msk.f32.vlgmr.msra.gmra.mxu1 %vm2305_vm13, %v2302_v15 }
 0x60a   : > { %v2660_v30 = vpop.f32.mrf.mxu1 }
 0x60b   : > { %v2388_v18 = vadd.f32 %v2660_v30, %v2304_v16 }
 0x60c   : > { %v2382_v19 = vpop.f32.mrf.mxu1 }
 0x60d   : > { %v2632_v20 = vmul.f32 -1.442695, %v2388_v18  ;;  %v2383_v21 = vadd.f32 %v2382_v19, %v2303_v17 }
 0x60f   : > { %2716 = vpow2.f32 %v2632_v20  ;;  %v2631_v22 = vmul.f32 -1.442695, %v2383_v21 }
 0x611   : > { %2718 = vpow2.f32 %v2631_v22 }
 0x61c   : > { %v2717_v23 = vpop.eup %2716 }
 0x61d   : > { %v2398_v24 = vadd.f32 1.0, %v2717_v23 }
 0x61e   : > { %v2719_v25 = vpop.eup %2718 }
 0x61f   : > { %2720 = vrcp.f32 %v2398_v24  ;;  %v2397_v26 = vadd.f32 1.0, %v2719_v25 }
 0x621   : > { %2722 = vrcp.f32 %v2397_v26 }
 0x62c   : > { %v2721_v27 = vpop.eup %2720 }
 0x62d   : > { %2410 = vperm.xlu1 %2688, %v2721_v27  }
 0x62e   : > { %v2723_v35 = vpop.eup %2722 }
 0x62f   : > { %2405 = vperm.xlu0 %2687, %v2723_v35  }
 0x6a8   : > { %v2411_v36 = vpop.permute.xlu1 %2410 }
 0x6a9   : > { %v2415_v37 = vmul.f32 %v2411_v36, %v2214_v2  ;;  %v2416_v38 = vmul.f32 %v2411_v36, %v2215_v3 }
 0x6aa   : > { %v2406_v40 = vpop.permute.xlu0 %2405 }
 0x6ab   : > { %v2419_v43 = vadd.f32 %v2415_v37, %v3020_v33  ;;  %v2420_v41 = vadd.f32 %v2416_v38, %v3022_v34  ;;  %v2413_v45 = vmul.f32 %v2406_v40, %v3177_v59  ;;  %v2414_v44 = vmul.f32 %v2406_v40, %v3179_v60 }
 0x6ad   : > { %v2642_v46 = vpack.c.bf16 %v2420_v41, %v2419_v43  ;;  %v2417_v47 = vadd.f32 %v2413_v45, %v3016_v29  ;;  %v2418_v48 = vadd.f32 %v2414_v44, %v3018_v31 }
 0x6af   : > { %2434 = vst [vmem:[%s387_s21 + $0x8] sm:$0xff] %v2642_v46  ;;  %v2641_v39 = vpack.c.bf16 %v2418_v48, %v2417_v47 }
 0x6b1   : > { %2433 = vst [vmem:[%s387_s21] sm:$0xff] %v2641_v39 }
 0x6b2 PF: > { %s22_s19 = sadd.s32 1, %s2730_s19  }
 0x6b3   : > { %p19_p4 = scmp.ge.s32.totalorder %s22_s19, 4  }
 0x6b5   :  { %21 = sbr.rel (!%p19_p4) target bundleno = 2 (0x2), region = 110 }

// kernel: encoder_forward.13
= control target key start
LH: loop header
LB: loop body
LE: loop exit
PB: predicated region body
PF: predicated region fallthrough
CT: control target
= control target key end

     0   :  { %s381_s9 = smov 0   ;;  %s404_s0 = inlined_call_operand.vmem [shape: bf16[2,24,16], index: 0, kind: input, shape index: {}]   ;;  %s405_s1 = inlined_call_operand.vmem [shape: bf16[32,24], index: 1, kind: input, shape index: {}]   ;;  %s406_s2 = inlined_call_operand.vmem [shape: bf16[2,32,16], index: 2, kind: output, shape index: {}]  }
   0x1 LB: > { %s307_s10 = sadd.s32 4294967295, %s364_s9   ;;  %p311_p0 = scmp.ge.s32.totalorder %s364_s9, 1  ;;  %s364_s9 = sphi %s381_s9, %s12_s9  }
   0x2   : > { %p112_p1 = scmp.lt.s32.totalorder %s364_s9, 3 }
   0x4   : > { %p113_p2 = pnand %p311_p0, %p112_p1 }
   0x5   : > { %p134_p3 = scmp.lt.s32.totalorder (!%p113_p2), %s307_s10, 1 }
   0x6   : > { %116 = sbr.rel (%p113_p2) target bundleno = 226 (0xe2), region = 28 }
   0xb   : > { %v356_v0 = vld [vmem:[%s405_s1] sm:$0xff]   ;;  %vm171_vm0 = vcmask 195584   ;;  %s408_s10 = smov (!%p134_p3, %s307_s10), 1  ;;  %vm178_vm1 = vcmask 1043456   ;;  %v357_v4 = vld [vmem:[%s405_s1 + $0x8] sm:$0xff]   ;;  %vm247_vm2 = vcmask 125952  }
   0xc   : > { %340 = vmatprep.mubr.msk.bf16.mxu0 %vm171_vm0, %v356_v0  ;;  %s345_s13 = smul.u32 12, %s408_s10  ;;  %s327_s19 = sshll.u32 %s408_s10, 4 }
   0xd   : > { %s143_s22 = scalar_lea.vmem %s406_s2, %s327_s19 }
   0xe   : > { %s138_s16 = scalar_lea.vmem %s404_s0, %s345_s13 }
   0xf   : > { %v354_v1 = vld [vmem:[%s138_s16 + $0x8] ss:$0 sps:$4 sm:$0xff]   ;;  %v355_v2 = vld [vmem:[%s138_s16] sm:$0xff]  }
  0x10   : > { %344 = vmatprep.subr.msk.bf16.mxu0 %vm178_vm1, %v354_v1  ;;  %v180_v3 = vsel %vm178_vm1, %v354_v1, 0 }
  0x11   : > { %337 = vmatpush3.bf16.msra.mxu0 %v180_v3 }
  0x12   : > { %338 = vmatprep.subr.bf16.mxu0 %v355_v2 }
  0x15   : > { %339 = vmatpush3.bf16.msra.mxu0 %v355_v2 }
  0x18   : > { %341 = vmatmul.mubr.msk.bf16.vlgmr.msra.gmra.mxu0 %vm171_vm0, %v357_v4 }
  0xd8   : > { %v342_v5 = vpop.f32.mrf.mxu0 }
  0xd9   : > { %v330_v6 = vpack.c.bf16 %v342_v5, %v342_v5 }
  0xda   : > { %v216_v7 = vpop.f32.mrf.mxu0 }
  0xdb   : > { %250 = vst.msk [vmem:[%s143_s22 + $0x8] sm:$0xf] %vm247_vm2, %v330_v6  ;;  %v328_v8 = vpack.c.bf16 %v216_v7, %v216_v7 }
  0xdc   : > { %v343_v9 = vpop.f32.mrf.mxu0 }
  0xdd   : > { %248 = vst.msk [vmem:[%s143_s22] sm:$0xf] %vm247_vm2, %v328_v8  ;;  %v331_v10 = vpack.c.bf16 %v343_v9, %v343_v9 }
  0xde   : > { %v219_v11 = vpop.f32.mrf.mxu0 }
  0xdf   : > { %251 = vst.msk [vmem:[%s143_s22 + $0xc] sm:$0xf] %vm247_vm2, %v331_v10  ;;  %v329_v12 = vpack.c.bf16 %v219_v11, %v219_v11 }
  0xe1   : > { %249 = vst.msk [vmem:[%s143_s22 + $0x4] sm:$0xf] %vm247_vm2, %v329_v12 }
  0xe2 PF: > { %s12_s9 = sadd.s32 1, %s364_s9  }
  0xe3   : > { %p9_p4 = scmp.ge.s32.totalorder %s12_s9, 4  }
  0xe5   :  { %11 = sbr.rel (!%p9_p4) target bundleno = 1 (0x1), region = 58 }

// kernel: encoder_forward.11
= control target key start
LH: loop header
LB: loop body
LE: loop exit
PB: predicated region body
PF: predicated region fallthrough
CT: control target
= control target key end

     0   :  { %s3047_s19 = smov 0   ;;  %s3401_s0 = inlined_call_operand.vmem [shape: bf16[2,24,64], index: 0, kind: input, shape index: {}]   ;;  %s3402_s1 = inlined_call_operand.vmem [shape: bf16[1,64], index: 1, kind: input, shape index: {}]   ;;  %s3403_s2 = inlined_call_operand.vmem [shape: bf16[1,64], index: 2, kind: input, shape index: {}]   ;;  %s3404_s3 = inlined_call_operand.vmem [shape: bf16[24,24], index: 3, kind: input, shape index: {}]   ;;  %s3405_s4 = inlined_call_operand.vmem [shape: bf16[9,24,24], index: 4, kind: input, shape index: {}]   ;;  %s3406_s5 = inlined_call_operand.<no memory space> [shape: f32[1], index: 5, kind: input, shape index: {}]   ;;  %s3407_s6 = inlined_call_operand.vmem [shape: bf16[9,24,24], index: 6, kind: input, shape index: {}]   ;;  %s3408_s7 = inlined_call_operand.vmem [shape: f32[6,24], index: 7, kind: input, shape index: {}]   ;;  %s3409_s8 = inlined_call_operand.vmem [shape: f32[6,1], index: 8, kind: input, shape index: {}]   ;;  %s3410_s9 = inlined_call_operand.vmem [shape: f32[24,6], index: 9, kind: input, shape index: {}]   ;;  %s3411_s10 = inlined_call_operand.vmem [shape: f32[24,1], index: 10, kind: input, shape index: {}]   ;;  %s3412_s11 = inlined_call_operand.vmem [shape: bf16[2,24,64], index: 11, kind: output, shape index: {}]  }
   0x1   :  { %16 = sst [smem:[#allocation3]] %s3406_s5 }
   0x2 LB: > { %s2416_s20 = sadd.s32 4294967295, %s2965_s19   ;;  %p2420_p0 = scmp.ge.s32.totalorder %s2965_s19, 1  ;;  %s2965_s19 = sphi %s3047_s19, %s22_s19  }
   0x3   : > { %p338_p1 = scmp.lt.s32.totalorder %s2965_s19, 3 }
   0x5   : > { %p339_p2 = pnand %p2420_p0, %p338_p1 }
   0x6   : > { %p378_p3 = scmp.lt.s32.totalorder (!%p339_p2), %s2416_s20, 1  ;;  %s2968_s30 = smov (!%p339_p2), 9  }
   0x7   : > { %342 = sbr.rel (%p339_p2) target bundleno = 1691 (0x69b), region = 64  ;;  %s2969_s12 = smov (!%p339_p2), 2  }
   0x8   : > { %s2970_s15 = smov (!%p339_p2), 10   ;;  %s2971_s16 = smov (!%p339_p2), 8  }
   0x9   : > { %s2972_s17 = smov (!%p339_p2), 18   ;;  %s2973_s18 = smov (!%p339_p2), 16  }
   0xa   : > { %s2974_s25 = smov (!%p339_p2), 127   ;;  %s2975_s26 = smov (!%p339_p2), 126  }
   0xb   : > { %s2976_s29 = smov (!%p339_p2), 120   ;;  %s2977_s21 = smov (!%p339_p2), 119  }
   0xc   : > { %v495_v0 = vlaneseq  ;;  %v665_v1 = vld [vmem:[%s3403_s2] sm:$0x1]  ;;  %vm471_vm0 = vcmask 666624   ;;  %s3428_s20 = smov (!%p378_p3, %s2416_s20), 1  ;;  %v2967_v5 = vmov 0   ;;  %vm419_vm1 = vcmask 1043456  }
   0xd   : > { %v491_v2 = vld [vmem:[%s3402_s1] sm:$0x1]  ;;  %v667_v4 = vpack.i.b16 %v665_v1, %v665_v1  ;;  %474 = vst.msk [vmem:[#allocation2 + $0x8] sm:$0xf] %vm471_vm0, %v2967_v5  ;;  %472 = vst.msk [vmem:[#allocation2] sm:$0xf] %vm471_vm0, %v2967_v5  ;;  %2904 = vset.pattern.permute.xlu0 %v2967_v5  ;;  %2905 = vset.pattern.permute.xlu1 %v2967_v5 }
   0xe   : > { %v496_v3 = vshrl.u32 %v495_v0, 7  ;;  %473 = vst.msk [vmem:[#allocation2 + $0x4] sm:$0xf] %vm471_vm0, %v2967_v5  ;;  %s3413_s24 = smul.u32 12, %s3428_s20  ;;  %v493_v7 = vpack.i.b16 %v491_v2, %v491_v2  ;;  %v2907_v9 = vld [vmem:[%s3404_s3] sm:$0xff]   ;;  %vm412_vm2 = vcmask 195584  }
   0xf   : > { %2691 = vmatprep.mubr.msk.bf16.mxu0 %vm412_vm2, %v2907_v9  ;;  %v2908_v19 = vld [vmem:[%s3404_s3 + $0x8] ss:$0 sps:$4 sm:$0xff]   ;;  %vm484_vm3 = vcmask 592968   ;;  %v2909_v23 = vld [vmem:[%s3405_s4 + $0xc] sm:$0xff]   ;;  %v2910_v24 = vld [vmem:[%s3405_s4] sm:$0xff]   ;;  %s3420_s22 = smov 118  }
  0x10   : > { %v3064_v6 = vsub.s32 0, %v496_v3  ;;  %s382_s27 = scalar_lea.vmem %s3401_s0, %s3413_s24  ;;  %2699 = vmatprep.mubr.msk.bf16.mxu1 %vm412_vm2, %v2909_v23  ;;  %v2912_v48 = vld [vmem:[%s3405_s4 + $0x8] ss:$0 sps:$4 sm:$0xff]   ;;  %s3418_s5 = smov 112   ;;  %vm2115_vm7 = vcmask 523264   ;;  %vm2983_vm8 = vmmov 0  }
  0x11   : > { %v391_v10 = vld [vmem:[%s382_s27 + $0x8] sm:$0xf]  ;;  %v390_v11 = vld [vmem:[%s382_s27 + $0x4] sm:$0xf]  ;;  %v389_v12 = vld [vmem:[%s382_s27] sm:$0xf] }
  0x12   : > { %v672_v8 = vrot.slane %v667_v4, %v3064_v6  ;;  %479 = vrot.lane.b32.xlu0 %v391_v10, %s2968_s30  ;;  %477 = vrot.lane.b32.xlu1 %v390_v11, %s2968_s30  ;;  %v498_v14 = vrot.slane %v493_v7, %v3064_v6  ;;  %v2426_v15 = vcombine.low %v391_v10, %v391_v10  ;;  %v2914_v49 = vld [vmem:[%s3405_s4 + $0x24] sm:$0xff]   ;;  %s3416_s23 = smov 111   ;;  %s3414_s27 = smov 110   ;;  %vm2221_vm9 = vcmask 1045504  }
  0x13   : > { %v2425_v16 = vcombine.low %v389_v12, %v390_v11  ;;  %vm2211_vm10 = vcmask 48128   ;;  %vm2357_vm11 = vcmask 519168  }
  0x14   : > { %v2445_v13 = vcombine.low %v672_v8, %v672_v8  ;;  %2859 = vmatprep.subr.msk.bf16.mxu0 %vm419_vm1, %v2426_v15  ;;  %v421_v17 = vsel %vm419_vm1, %v2426_v15, 0  ;;  %v2429_v18 = vcombine.low %v498_v14, %v498_v14 }
  0x15   : > { %2688 = vmatpush3.bf16.msra.mxu0 %v421_v17 }
  0x16   : > { %676 = vrot.lane.b32.xlu1 %v2445_v13, %s2969_s12  ;;  %475 = vrot.lane.b32.xlu0 %v389_v12, %s2968_s30  ;;  %v2911_v12 = vld [vmem:[%s3405_s4 + $0x14] ss:$0 sps:$4 sm:$0xff]  }
  0x17   : > { %2689 = vmatprep.subr.bf16.mxu0 %v2425_v16 }
  0x19   : > { %2690 = vmatpush3.bf16.msra.mxu0 %v2425_v16 }
  0x1a   : > { %935 = vrot.lane.b32.xlu1 %v2445_v13, %s2970_s15  ;;  %767 = vrot.lane.b32.xlu0 %v2429_v18, %s2971_s16 }
  0x1c   : > { %2692 = vmatmul.mubr.msk.bf16.vlgmr.msra.gmra.mxu0 %vm412_vm2, %v2908_v19 }
  0x1d   : > { %2707 = vmatprep.mubr.msk.bf16.mxu0 %vm412_vm2, %v2910_v24  ;;  %v2918_v24 = vld [vmem:[%s3405_s4 + $0x3c] sm:$0xff]  }
  0x1e   : > { %1194 = vrot.lane.b32.xlu1 %v2445_v13, %s2972_s17  ;;  %1026 = vrot.lane.b32.xlu0 %v2429_v18, %s2973_s18  ;;  %v2913_v13 = vld [vmem:[%s3405_s4 + $0x18] sm:$0xff]  }
  0x84   : > { %v480_v20 = vpop.permute.xlu0 %479  ;;  %v478_v21 = vpop.permute.xlu1 %477 }
  0x85   : > { %487 = vst.msk [vmem:[#allocation2 + $0x8] sm:$0xf] %vm484_vm3, %v480_v20  ;;  %486 = vst.msk [vmem:[#allocation2 + $0x4] sm:$0xf] %vm484_vm3, %v478_v21  ;;  %v2916_v20 = vld [vmem:[%s3405_s4 + $0x2c] ss:$0 sps:$4 sm:$0xff]  }
  0x86   : > { %v2915_v21 = vld [vmem:[%s3405_s4 + $0x20] ss:$0 sps:$4 sm:$0xff]  }
  0x88   : > { %v476_v22 = vpop.permute.xlu0 %475  ;;  %v677_v26 = vpop.permute.xlu1 %676 }
  0x89   : > { %485 = vst.msk [vmem:[#allocation2] sm:$0xf] %vm484_vm3, %v476_v22  ;;  %v2917_v22 = vld [vmem:[%s3405_s4 + $0x30] sm:$0xff]  }
  0x8c   : > { %v490_v25 = vld [vmem:[#allocation2 + $0x8] sm:$0xf]  ;;  %v3102_v27 = vld [vmem:[#allocation2 + $0x4] sm:$0xf]  ;;  %v768_v31 = vpop.permute.xlu0 %767  ;;  %v936_v46 = vpop.permute.xlu1 %935 }
  0x8d   : > { %v681_v28 = vmul.bf16 %v677_v26, %v490_v25  ;;  %v2436_v29 = vcombine.low %v490_v25, %v490_v25  ;;  %v505_v30 = vmul.bf16 %v2429_v18, %v490_v25  ;;  %v504_v34 = vmul.bf16 %v2429_v18, %v3102_v27 }
  0x8e   : > { %v680_v35 = vmul.bf16 %v677_v26, %v3102_v27  ;;  %v772_v36 = vmul.bf16 %v768_v31, %v490_v25  ;;  %v771_v44 = vmul.bf16 %v768_v31, %v3102_v27  ;;  %v940_v50 = vmul.bf16 %v936_v46, %v490_v25 }
  0x8f   : > { %531 = vrot.lane.b32.xlu0 %v2436_v29, %s2974_s25  ;;  %v2442_v33 = vcombine.low %v505_v30, %v505_v30  ;;  %v2452_v37 = vcombine.low %v681_v28, %v681_v28  ;;  %v939_v54 = vmul.bf16 %v936_v46, %v3102_v27  ;;  %v2920_v30 = vld [vmem:[%s3405_s4 + $0x44] ss:$0 sps:$4 sm:$0xff]  }
  0x90   : > { %v3104_v32 = vld [vmem:[#allocation2] sm:$0xf]  ;;  %v2461_v45 = vcombine.low %v772_v36, %v772_v36  ;;  %v1027_v52 = vpop.permute.xlu0 %1026  ;;  %v2477_v55 = vcombine.low %v940_v50, %v940_v50  ;;  %v1195_v61 = vpop.permute.xlu1 %1194 }
  0x91   : > { %2861 = vmatprep.subr.msk.bf16.mxu0 %vm419_vm1, %v2442_v33  ;;  %v615_v38 = vsel %vm419_vm1, %v2442_v33, 0  ;;  %v2435_v39 = vcombine.low %v3104_v32, %v3102_v27  ;;  %v503_v40 = vmul.bf16 %v2429_v18, %v3104_v32  ;;  %v679_v41 = vmul.bf16 %v677_v26, %v3104_v32 }
  0x92   : > { %2704 = vmatpush3.bf16.msra.mxu0 %v615_v38  ;;  %v770_v43 = vmul.bf16 %v768_v31, %v3104_v32  ;;  %v938_v53 = vmul.bf16 %v936_v46, %v3104_v32  ;;  %v1031_v56 = vmul.bf16 %v1027_v52, %v490_v25  ;;  %v1029_v58 = vmul.bf16 %v1027_v52, %v3104_v32  ;;  %v2919_v31 = vld [vmem:[%s3405_s4 + $0x38] ss:$0 sps:$4 sm:$0xff]  }
  0x93   : > { %704 = vrot.lane.b32.xlu0 %v2452_v37, %s2975_s26  ;;  %529 = vrot.lane.b32.xlu1 %v2435_v39, %s2974_s25  ;;  %v2441_v42 = vcombine.low %v503_v40, %v504_v34  ;;  %v2451_v47 = vcombine.low %v679_v41, %v680_v35  ;;  %v1030_v59 = vmul.bf16 %v1027_v52, %v3102_v27  ;;  %v2922_v34 = vld [vmem:[%s3405_s4 + $0x54] sm:$0xff]   ;;  %v2924_v40 = vld [vmem:[%s3405_s4 + $0x5c] ss:$0 sps:$4 sm:$0xff]  }
  0x94   : > { %v2460_v51 = vcombine.low %v770_v43, %v771_v44  ;;  %v2476_v57 = vcombine.low %v938_v53, %v939_v54  ;;  %v2486_v60 = vcombine.low %v1031_v56, %v1031_v56  ;;  %v1199_v62 = vmul.bf16 %v1195_v61, %v490_v25  ;;  %v2923_v41 = vld [vmem:[%s3405_s4 + $0x50] ss:$0 sps:$4 sm:$0xff]  }
  0x95   : > { %2705 = vmatprep.subr.bf16.mxu0 %v2441_v42  ;;  %v2485_v63 = vcombine.low %v1029_v58, %v1030_v59  ;;  %v1197_v0 = vmul.bf16 %v1195_v61, %v3104_v32  ;;  %v1198_v1 = vmul.bf16 %v1195_v61, %v3102_v27  ;;  %v2921_v32 = vld [vmem:[%s3405_s4 + $0x48] sm:$0xff]  }
  0x96   : > { %2706 = vmatpush3.bf16.msra.mxu0 %v2441_v42  ;;  %v2502_v2 = vcombine.low %v1199_v62, %v1199_v62  ;;  %v2925_v42 = vld [vmem:[%s3405_s4 + $0x60] sm:$0xff]  }
  0x97   : > { %795 = vrot.lane.b32.xlu0 %v2461_v45, %s2976_s29  ;;  %702 = vrot.lane.b32.xlu1 %v2451_v47, %s2975_s26  ;;  %v2501_v3 = vcombine.low %v1197_v0, %v1198_v1  ;;  %v2926_v45 = vld [vmem:[%s3405_s4 + $0x68] ss:$0 sps:$4 sm:$0xff]  }
  0x99   : > { %2708 = vmatmul.mubr.msk.bf16.vlgmr.msra.gmra.mxu0 %vm412_vm2, %v2912_v48 }
  0x9a   : > { %2723 = vmatprep.mubr.msk.bf16.mxu0 %vm412_vm2, %v2914_v49 }
  0x9b   : > { %793 = vrot.lane.b32.xlu0 %v2460_v51, %s2976_s29  ;;  %872 = vrot.lane.b32.xlu1 %v2436_v29, %s2977_s21 }
  0x9f   : > { %963 = vrot.lane.b32.xlu0 %v2477_v55, %s3420_s22  ;;  %870 = vrot.lane.b32.xlu1 %v2435_v39, %s2977_s21 }
  0xa3   : > { %961 = vrot.lane.b32.xlu0 %v2476_v57, %s3420_s22  ;;  %1054 = vrot.lane.b32.xlu1 %v2486_v60, %s3418_s5  ;;  %s1285_s22 = sld [smem:[#allocation3]] }
  0xa7   : > { %1131 = vrot.lane.b32.xlu0 %v2436_v29, %s3416_s23  ;;  %1052 = vrot.lane.b32.xlu1 %v2485_v63, %s3418_s5 }
  0xab   : > { %1129 = vrot.lane.b32.xlu0 %v2435_v39, %s3416_s23  ;;  %1222 = vrot.lane.b32.xlu1 %v2502_v2, %s3414_s27 }
  0xaf   : > { %1220 = vrot.lane.b32.xlu1 %v2501_v3, %s3414_s27 }
  0xdc   : > { %v3146_v4 = vpop.f32.mrf.mxu0 }
  0xde   : > { %v3148_v5 = vpop.f32.mrf.mxu0 }
  0xe0   : > { %v2694_v7 = vpop.f32.mrf.mxu0 }
  0xe2   : > { %v3222_v46 = vpop.f32.mrf.mxu0 }
 0x101   : > { %v532_v8 = vpop.permute.xlu0 %531 }
 0x102   : > { %2860 = vmatprep.subr.msk.bf16.mxu1 %vm419_vm1, %v532_v8  ;;  %v541_v9 = vsel %vm419_vm1, %v532_v8, 0 }
 0x103   : > { %2696 = vmatpush3.bf16.msra.mxu1 %v541_v9 }
 0x105   : > { %v705_v10 = vpop.permute.xlu0 %704  ;;  %v530_v11 = vpop.permute.xlu1 %529 }
 0x106   : > { %2697 = vmatprep.subr.bf16.mxu1 %v530_v11  ;;  %v714_v17 = vsel %vm419_vm1, %v705_v10, 0 }
 0x107   : > { %2698 = vmatpush3.bf16.msra.mxu1 %v530_v11 }
 0x108   : > { %2862 = vmatprep.subr.msk.bf16.mxu1 %vm419_vm1, %v705_v10 }
 0x109   : > { %v796_v14 = vpop.permute.xlu0 %795  ;;  %v703_v15 = vpop.permute.xlu1 %702 }
 0x10a   : > { %v805_v16 = vsel %vm419_vm1, %v796_v14, 0  ;;  %2863 = vmatprep.subr.msk.bf16.mxu0 %vm419_vm1, %v796_v14  ;;  %2700 = vmatmul.mubr.msk.bf16.vlgmr.msra.gmra.mxu1 %vm412_vm2, %v2911_v12 }
 0x10b   : > { %2720 = vmatpush3.bf16.msra.mxu0 %v805_v16  ;;  %2712 = vmatpush3.bf16.msra.mxu1 %v714_v17 }
 0x10c   : > { %2715 = vmatprep.mubr.msk.bf16.mxu1 %vm412_vm2, %v2913_v13  ;;  %2713 = vmatprep.subr.bf16.mxu1 %v703_v15 }
 0x10d   : > { %v794_v18 = vpop.permute.xlu0 %793  ;;  %v873_v19 = vpop.permute.xlu1 %872 }
 0x10e   : > { %2721 = vmatprep.subr.bf16.mxu0 %v794_v18  ;;  %v882_v27 = vsel %vm419_vm1, %v873_v19, 0 }
 0x10f   : > { %2722 = vmatpush3.bf16.msra.mxu0 %v794_v18  ;;  %2714 = vmatpush3.bf16.msra.mxu1 %v703_v15 }
 0x110   : > { %2864 = vmatprep.subr.msk.bf16.mxu1 %vm419_vm1, %v873_v19 }
 0x111   : > { %v964_v23 = vpop.permute.xlu0 %963  ;;  %v871_v25 = vpop.permute.xlu1 %870 }
 0x112   : > { %v973_v26 = vsel %vm419_vm1, %v964_v23, 0  ;;  %2724 = vmatmul.mubr.msk.bf16.vlgmr.msra.gmra.mxu0 %vm412_vm2, %v2916_v20  ;;  %2865 = vmatprep.subr.msk.bf16.mxu0 %vm419_vm1, %v964_v23 }
 0x113   : > { %2716 = vmatmul.mubr.msk.bf16.vlgmr.msra.gmra.mxu1 %vm412_vm2, %v2915_v21  ;;  %2736 = vmatpush3.bf16.msra.mxu0 %v973_v26 }
 0x114   : > { %2728 = vmatpush3.bf16.msra.mxu1 %v882_v27  ;;  %2731 = vmatprep.mubr.msk.bf16.mxu1 %vm412_vm2, %v2917_v22 }
 0x115   : > { %2729 = vmatprep.subr.bf16.mxu1 %v871_v25  ;;  %v962_v28 = vpop.permute.xlu0 %961  ;;  %2739 = vmatprep.mubr.msk.bf16.mxu0 %vm412_vm2, %v2918_v24  ;;  %v1055_v29 = vpop.permute.xlu1 %1054 }
 0x116   : > { %2737 = vmatprep.subr.bf16.mxu0 %v962_v28  ;;  %v1064_v37 = vsel %vm419_vm1, %v1055_v29, 0 }
 0x117   : > { %2738 = vmatpush3.bf16.msra.mxu0 %v962_v28 }
 0x118   : > { %2730 = vmatpush3.bf16.msra.mxu1 %v871_v25 }
 0x119   : > { %2866 = vmatprep.subr.msk.bf16.mxu1 %vm419_vm1, %v1055_v29  ;;  %v1132_v33 = vpop.permute.xlu0 %1131  ;;  %v1053_v35 = vpop.permute.xlu1 %1052 }
 0x11a   : > { %v1141_v36 = vsel %vm419_vm1, %v1132_v33, 0  ;;  %2740 = vmatmul.mubr.msk.bf16.vlgmr.msra.gmra.mxu0 %vm412_vm2, %v2920_v30  ;;  %2867 = vmatprep.subr.msk.bf16.mxu0 %vm419_vm1, %v1132_v33 }
 0x11b   : > { %2732 = vmatmul.mubr.msk.bf16.vlgmr.msra.gmra.mxu1 %vm412_vm2, %v2919_v31  ;;  %2752 = vmatpush3.bf16.msra.mxu0 %v1141_v36 }
 0x11c   : > { %2744 = vmatpush3.bf16.msra.mxu1 %v1064_v37  ;;  %2747 = vmatprep.mubr.msk.bf16.mxu1 %vm412_vm2, %v2921_v32  ;;  %v1289_v37 = vstv %s1285_s22 }
 0x11d   : > { %2745 = vmatprep.subr.bf16.mxu1 %v1053_v35  ;;  %v1130_v38 = vpop.permute.xlu0 %1129  ;;  %2755 = vmatprep.mubr.msk.bf16.mxu0 %vm412_vm2, %v2922_v34  ;;  %v1223_v39 = vpop.permute.xlu1 %1222 }
 0x11e   : > { %2753 = vmatprep.subr.bf16.mxu0 %v1130_v38  ;;  %v1232_v43 = vsel %vm419_vm1, %v1223_v39, 0 }
 0x11f   : > { %2754 = vmatpush3.bf16.msra.mxu0 %v1130_v38 }
 0x120   : > { %2746 = vmatpush3.bf16.msra.mxu1 %v1053_v35  ;;  %v1495_v35 = vld [vmem:[%s3403_s2] sm:$0x1] }
 0x121   : > { %2868 = vmatprep.subr.msk.bf16.mxu1 %vm419_vm1, %v1223_v39  ;;  %v1221_v44 = vpop.permute.xlu1 %1220 }
 0x122   : > { %2756 = vmatmul.mubr.msk.bf16.vlgmr.msra.gmra.mxu0 %vm412_vm2, %v2924_v40 }
 0x123   : > { %2748 = vmatmul.mubr.msk.bf16.vlgmr.msra.gmra.mxu1 %vm412_vm2, %v2923_v41 }
 0x124   : > { %2760 = vmatpush3.bf16.msra.mxu1 %v1232_v43  ;;  %2763 = vmatprep.mubr.msk.bf16.mxu1 %vm412_vm2, %v2925_v42  ;;  %v1497_v42 = vpack.i.b16 %v1495_v35, %v1495_v35 }
 0x125   : > { %2761 = vmatprep.subr.bf16.mxu1 %v1221_v44 }
 0x128   : > { %2762 = vmatpush3.bf16.msra.mxu1 %v1221_v44 }
 0x12b   : > { %2764 = vmatmul.mubr.msk.bf16.vlgmr.msra.gmra.mxu1 %vm412_vm2, %v2926_v45  ;;  %v1321_v45 = vld [vmem:[%s3402_s1] sm:$0x1] }
 0x159   : > { %v2709_v47 = vpop.f32.mrf.mxu0 }
 0x15b   : > { %v651_v48 = vpop.f32.mrf.mxu0 }
 0x15d   : > { %v2710_v49 = vpop.f32.mrf.mxu0 }
 0x15f   : > { %v654_v52 = vpop.f32.mrf.mxu0 }
 0x1ca   : > { %v2701_v50 = vpop.f32.mrf.mxu1 }
 0x1cb   : > { %v660_v61 = vadd.f32 %v2709_v47, %v2701_v50 }
 0x1cc   : > { %v577_v51 = vpop.f32.mrf.mxu1 }
 0x1cd   : > { %v652_v0 = vadd.f32 %v651_v48, %v577_v51 }
 0x1ce   : > { %v2702_v53 = vpop.f32.mrf.mxu1 }
 0x1d0   : > { %v580_v54 = vpop.f32.mrf.mxu1 }
 0x1d1   : > { %v655_v10 = vadd.f32 %v654_v52, %v580_v54  ;;  %v1502_v54 = vrot.slane %v1497_v42, %v3064_v6 }
 0x1d2   : > { %v2725_v55 = vpop.f32.mrf.mxu0 }
 0x1d3   : > { %v2717_v56 = vpop.f32.mrf.mxu1 }
 0x1d4   : > { %v841_v57 = vpop.f32.mrf.mxu0  ;;  %v766_v1 = vadd.f32 %v2717_v56, %v660_v61 }
 0x1d5   : > { %v750_v58 = vpop.f32.mrf.mxu1 }
 0x1d6   : > { %v2726_v59 = vpop.f32.mrf.mxu0  ;;  %v764_v7 = vadd.f32 %v750_v58, %v652_v0  ;;  %v857_v11 = vadd.f32 %v2725_v55, %v766_v1  ;;  %v1323_v55 = vpack.i.b16 %v1321_v45, %v1321_v45 }
 0x1d7   : > { %v2718_v60 = vpop.f32.mrf.mxu1 }
 0x1d8   : > { %v844_v62 = vpop.f32.mrf.mxu0  ;;  %v855_v14 = vadd.f32 %v841_v57, %v764_v7  ;;  %v2524_v60 = vcombine.low %v1502_v54, %v1502_v54  ;;  %v1328_v61 = vrot.slane %v1323_v55, %v3064_v6  ;;  %v2930_v7 = vld [vmem:[%s3407_s6 + $0xc] sm:$0xff]  }
 0x1d9   : > { %v753_v63 = vpop.f32.mrf.mxu1  ;;  %2771 = vmatprep.mubr.msk.bf16.mxu0 %vm412_vm2, %v2930_v7  ;;  %v2938_v7 = vld [vmem:[%s3407_s6 + $0x30] sm:$0xff]  }
 0x1da   : > { %v2741_v2 = vpop.f32.mrf.mxu0  ;;  %v765_v15 = vadd.f32 %v753_v63, %v655_v10  ;;  %v2508_v0 = vcombine.low %v1328_v61, %v1328_v61 }
 0x1db   : > { %v2733_v3 = vpop.f32.mrf.mxu1 }
 0x1dc   : > { %v1009_v8 = vpop.f32.mrf.mxu0  ;;  %v934_v16 = vadd.f32 %v2733_v3, %v857_v11  ;;  %v856_v22 = vadd.f32 %v844_v62, %v765_v15  ;;  %v2929_v3 = vld [vmem:[%s3407_s6] sm:$0xff]  }
 0x1dd   : > { %v918_v9 = vpop.f32.mrf.mxu1  ;;  %2779 = vmatprep.mubr.msk.bf16.mxu1 %vm412_vm2, %v2929_v3 }
 0x1de   : > { %v2742_v12 = vpop.f32.mrf.mxu0  ;;  %v932_v19 = vadd.f32 %v918_v9, %v855_v14  ;;  %v1025_v23 = vadd.f32 %v2741_v2, %v934_v16 }
 0x1df   : > { %v2734_v13 = vpop.f32.mrf.mxu1 }
 0x1e0   : > { %v1012_v17 = vpop.f32.mrf.mxu0  ;;  %v1023_v26 = vadd.f32 %v1009_v8, %v932_v19 }
 0x1e1   : > { %v921_v18 = vpop.f32.mrf.mxu1 }
 0x1e2   : > { %v2757_v20 = vpop.f32.mrf.mxu0  ;;  %v933_v27 = vadd.f32 %v921_v18, %v856_v22 }
 0x1e3   : > { %v2749_v21 = vpop.f32.mrf.mxu1 }
 0x1e4   : > { %v1177_v24 = vpop.f32.mrf.mxu0  ;;  %v1116_v28 = vadd.f32 %v2749_v21, %v1025_v23  ;;  %v1024_v33 = vadd.f32 %v1012_v17, %v933_v27 }
 0x1e5   : > { %v1100_v25 = vpop.f32.mrf.mxu1 }
 0x1e6   : > { %v2758_v29 = vpop.f32.mrf.mxu0  ;;  %v1114_v31 = vadd.f32 %v1100_v25, %v1023_v26  ;;  %v1193_v34 = vadd.f32 %v2757_v20, %v1116_v28 }
 0x1e7   : > { %v2750_v30 = vpop.f32.mrf.mxu1 }
 0x1e8   : > { %v1191_v38 = vadd.f32 %v1177_v24, %v1114_v31  ;;  %v1180_v47 = vpop.f32.mrf.mxu0  ;;  %v2931_v31 = vld [vmem:[%s3407_s6 + $0x8] ss:$0 sps:$4 sm:$0xff]  }
 0x1e9   : > { %v1103_v32 = vpop.f32.mrf.mxu1 }
 0x1ea   : > { %v1115_v39 = vadd.f32 %v1103_v32, %v1024_v33 }
 0x1eb   : > { %v2765_v36 = vpop.f32.mrf.mxu1 }
 0x1ec   : > { %v1284_v40 = vadd.f32 %v2765_v36, %v1193_v34  ;;  %v1192_v49 = vadd.f32 %v1180_v47, %v1115_v39  ;;  %v2933_v34 = vld [vmem:[%s3407_s6 + $0x24] sm:$0xff]  }
 0x1ed   : > { %v1268_v41 = vpop.f32.mrf.mxu1 }
 0x1ee   : > { %vm1288_vm4 = vcmp.ge.f32.partialorder %v1284_v40, 0.0  ;;  %v1292_v43 = vmul.f32 %v1289_v37, %v1284_v40  ;;  %v1282_v44 = vadd.f32 %v1268_v41, %v1191_v38 }
 0x1ef   : > { %v2766_v48 = vpop.f32.mrf.mxu1 }
 0x1f0   : > { %vm1286_vm5 = vcmp.ge.f32.partialorder %v1282_v44, 0.0  ;;  %v1290_v50 = vmul.f32 %v1289_v37, %v1282_v44  ;;  %v1295_v51 = vsel %vm1288_vm4, %v1284_v40, %v1292_v43 }
 0x1f1   : > { %v1271_v52 = vpop.f32.mrf.mxu1  ;;  %v2599_v53 = vpack.c.bf16 %v1295_v51, %v1295_v51 }
 0x1f2   : > { %v1283_v56 = vadd.f32 %v1271_v52, %v1192_v49  ;;  %v1293_v57 = vsel %vm1286_vm5, %v1282_v44, %v1290_v50 }
 0x1f3   : > { %1310 = vrot.lane.b32.xlu0 %v2599_v53, %s2968_s30  ;;  %v2597_v58 = vpack.c.bf16 %v1293_v57, %v1293_v57  ;;  %v2932_v57 = vld [vmem:[%s3407_s6 + $0x14] ss:$0 sps:$4 sm:$0xff]  }
 0x1f4   : > { %vm1287_vm6 = vcmp.ge.f32.partialorder %v1283_v56, 0.0  ;;  %v1291_v59 = vmul.f32 %v1289_v37, %v1283_v56 }
 0x1f5   : > { %1306 = vrot.lane.b32.xlu1 %v2597_v58, %s2968_s30 }
 0x1f6   : > { %v1294_v62 = vsel %vm1287_vm6, %v1283_v56, %v1291_v59 }
 0x1f7   : > { %v2598_v63 = vpack.c.bf16 %v1294_v62, %v1294_v62 }
 0x1f9   : > { %1308 = vrot.lane.b32.xlu0 %v2598_v63, %s2968_s30  ;;  %1506 = vrot.lane.b32.xlu1 %v2524_v60, %s2969_s12  ;;  %v2935_v63 = vld [vmem:[%s3407_s6 + $0x2c] ss:$0 sps:$4 sm:$0xff]   ;;  %s3426_s12 = smul.u32 12, %s3428_s20 }
 0x1fd   : > { %1597 = vrot.lane.b32.xlu0 %v2508_v0, %s2971_s16  ;;  %1765 = vrot.lane.b32.xlu1 %v2524_v60, %s2970_s15 }
 0x201   : > { %1856 = vrot.lane.b32.xlu0 %v2508_v0, %s2973_s18  ;;  %2024 = vrot.lane.b32.xlu1 %v2524_v60, %s2972_s17  ;;  %v2934_v60 = vld [vmem:[%s3407_s6 + $0x18] sm:$0xff]   ;;  %s387_s17 = scalar_lea.vmem %s3412_s11, %s3426_s12 }
 0x265   : > { %v1311_v1 = vpop.permute.xlu0 %1310 }
 0x266   : > { %1317 = vst.msk [vmem:[#allocation2 + $0x8] sm:$0xf] %vm484_vm3, %v1311_v1  ;;  %v2937_v1 = vld [vmem:[%s3407_s6 + $0x3c] sm:$0xff]  }
 0x267   : > { %v1307_v2 = vpop.permute.xlu1 %1306 }
 0x268   : > { %1315 = vst.msk [vmem:[#allocation2] sm:$0xf] %vm484_vm3, %v1307_v2 }
 0x26b   : > { %v1309_v6 = vpop.permute.xlu0 %1308  ;;  %v1507_v9 = vpop.permute.xlu1 %1506 }
 0x26c   : > { %1316 = vst.msk [vmem:[#allocation2 + $0x4] sm:$0xf] %vm484_vm3, %v1309_v6  ;;  %v2936_v6 = vld [vmem:[%s3407_s6 + $0x20] ss:$0 sps:$4 sm:$0xff]  }
 0x26d   : > { %v1320_v8 = vld [vmem:[#allocation2 + $0x8] sm:$0xf] }
 0x26e   : > { %v2515_v10 = vcombine.low %v1320_v8, %v1320_v8  ;;  %v1335_v11 = vmul.bf16 %v2508_v0, %v1320_v8  ;;  %v1511_v12 = vmul.bf16 %v1507_v9, %v1320_v8 }
 0x26f   : > { %v1598_v13 = vpop.permute.xlu0 %1597  ;;  %v1318_v15 = vld [vmem:[#allocation2] sm:$0xf]  ;;  %v1766_v27 = vpop.permute.xlu1 %1765 }
 0x270   : > { %1361 = vrot.lane.b32.xlu0 %v2515_v10, %s2974_s25  ;;  %v2521_v14 = vcombine.low %v1335_v11, %v1335_v11  ;;  %v1602_v17 = vmul.bf16 %v1598_v13, %v1320_v8  ;;  %v2531_v19 = vcombine.low %v1511_v12, %v1511_v12  ;;  %v1333_v22 = vmul.bf16 %v2508_v0, %v1318_v15  ;;  %v2939_v11 = vld [vmem:[%s3407_s6 + $0x44] ss:$0 sps:$4 sm:$0xff]  }
 0x271   : > { %v1509_v26 = vmul.bf16 %v1507_v9, %v1318_v15  ;;  %v1600_v29 = vmul.bf16 %v1598_v13, %v1318_v15  ;;  %v1770_v32 = vmul.bf16 %v1766_v27, %v1320_v8  ;;  %v1768_v38 = vmul.bf16 %v1766_v27, %v1318_v15 }
 0x272   : > { %2870 = vmatprep.subr.msk.bf16.mxu1 %vm419_vm1, %v2521_v14  ;;  %v1445_v18 = vsel %vm419_vm1, %v2521_v14, 0  ;;  %v2540_v25 = vcombine.low %v1602_v17, %v1602_v17  ;;  %v2941_v17 = vld [vmem:[%s3407_s6 + $0x48] sm:$0xff]  }
 0x273   : > { %v1319_v16 = vld [vmem:[#allocation2 + $0x4] sm:$0xf]  ;;  %2776 = vmatpush3.bf16.msra.mxu1 %v1445_v18  ;;  %v1857_v36 = vpop.permute.xlu0 %1856  ;;  %v2556_v37 = vcombine.low %v1770_v32, %v1770_v32  ;;  %v2025_v44 = vpop.permute.xlu1 %2024 }
 0x274   : > { %1534 = vrot.lane.b32.xlu0 %v2531_v19, %s2975_s26  ;;  %v1510_v20 = vmul.bf16 %v1507_v9, %v1319_v16  ;;  %v2514_v21 = vcombine.low %v1318_v15, %v1319_v16  ;;  %v1334_v23 = vmul.bf16 %v2508_v0, %v1319_v16  ;;  %v1601_v24 = vmul.bf16 %v1598_v13, %v1319_v16  ;;  %v2942_v13 = vld [vmem:[%s3407_s6 + $0x54] sm:$0xff]  }
 0x275   : > { %v1769_v35 = vmul.bf16 %v1766_v27, %v1319_v16  ;;  %v1861_v39 = vmul.bf16 %v1857_v36, %v1320_v8  ;;  %v1859_v41 = vmul.bf16 %v1857_v36, %v1318_v15  ;;  %v1860_v42 = vmul.bf16 %v1857_v36, %v1319_v16  ;;  %v2946_v27 = vld [vmem:[%s3407_s6 + $0x68] ss:$0 sps:$4 sm:$0xff]  }
 0x276   : > { %1359 = vrot.lane.b32.xlu1 %v2514_v21, %s2974_s25  ;;  %v2520_v28 = vcombine.low %v1333_v22, %v1334_v23  ;;  %v2530_v30 = vcombine.low %v1509_v26, %v1510_v20  ;;  %v2539_v33 = vcombine.low %v1600_v29, %v1601_v24  ;;  %s3422_s25 = smov 118   ;;  %v2029_v45 = vmul.bf16 %v2025_v44, %v1320_v8  ;;  %v2943_v23 = vld [vmem:[%s3407_s6 + $0x50] ss:$0 sps:$4 sm:$0xff]   ;;  %v2945_v24 = vld [vmem:[%s3407_s6 + $0x60] sm:$0xff]  }
 0x277   : > { %v2555_v40 = vcombine.low %v1768_v38, %v1769_v35  ;;  %v2565_v43 = vcombine.low %v1861_v39, %v1861_v39  ;;  %v2564_v47 = vcombine.low %v1859_v41, %v1860_v42  ;;  %v2027_v48 = vmul.bf16 %v2025_v44, %v1318_v15  ;;  %v2940_v15 = vld [vmem:[%s3407_s6 + $0x38] ss:$0 sps:$4 sm:$0xff]  }
 0x278   : > { %1625 = vrot.lane.b32.xlu0 %v2540_v25, %s2976_s29  ;;  %2777 = vmatprep.subr.bf16.mxu1 %v2520_v28  ;;  %v2028_v49 = vmul.bf16 %v2025_v44, %v1319_v16  ;;  %v2581_v50 = vcombine.low %v2029_v45, %v2029_v45 }
 0x279   : > { %2778 = vmatpush3.bf16.msra.mxu1 %v2520_v28 }
 0x27a   : > { %1532 = vrot.lane.b32.xlu1 %v2530_v30, %s2975_s26  ;;  %s3423_s26 = smov 112   ;;  %v2580_v51 = vcombine.low %v2027_v48, %v2028_v49 }
 0x27c   : > { %1623 = vrot.lane.b32.xlu0 %v2539_v33, %s2976_s29  ;;  %2780 = vmatmul.mubr.msk.bf16.vlgmr.msra.gmra.mxu1 %vm412_vm2, %v2931_v31  ;;  %s3424_s29 = smov 111  }
 0x27d   : > { %2795 = vmatprep.mubr.msk.bf16.mxu1 %vm412_vm2, %v2933_v34 }
 0x27e   : > { %1702 = vrot.lane.b32.xlu1 %v2515_v10, %s2977_s21 }
 0x280   : > { %1793 = vrot.lane.b32.xlu0 %v2556_v37, %s3422_s25 }
 0x282   : > { %1700 = vrot.lane.b32.xlu1 %v2514_v21, %s2977_s21  ;;  %s3425_s21 = smov 110  }
 0x284   : > { %1791 = vrot.lane.b32.xlu0 %v2555_v40, %s3422_s25 }
 0x286   : > { %1884 = vrot.lane.b32.xlu1 %v2565_v43, %s3423_s26 }
 0x288   : > { %1961 = vrot.lane.b32.xlu0 %v2515_v10, %s3424_s29 }
 0x28a   : > { %1882 = vrot.lane.b32.xlu1 %v2564_v47, %s3423_s26 }
 0x28c   : > { %1959 = vrot.lane.b32.xlu0 %v2514_v21, %s3424_s29  ;;  %v2944_v21 = vld [vmem:[%s3407_s6 + $0x5c] ss:$0 sps:$4 sm:$0xff]  }
 0x28e   : > { %2052 = vrot.lane.b32.xlu1 %v2581_v50, %s3425_s21 }
 0x292   : > { %2050 = vrot.lane.b32.xlu1 %v2580_v51, %s3425_s21 }
 0x2e2   : > { %v1362_v52 = vpop.permute.xlu0 %1361 }
 0x2e3   : > { %v1371_v53 = vsel %vm419_vm1, %v1362_v52, 0  ;;  %2869 = vmatprep.subr.msk.bf16.mxu0 %vm419_vm1, %v1362_v52 }
 0x2e4   : > { %2768 = vmatpush3.bf16.msra.mxu0 %v1371_v53 }
 0x2e6   : > { %v1535_v54 = vpop.permute.xlu0 %1534 }
 0x2e7   : > { %v1544_v61 = vsel %vm419_vm1, %v1535_v54, 0 }
 0x2e8   : > { %v1360_v55 = vpop.permute.xlu1 %1359 }
 0x2e9   : > { %2769 = vmatprep.subr.bf16.mxu0 %v1360_v55 }
 0x2ea   : > { %v1626_v56 = vpop.permute.xlu0 %1625  ;;  %2770 = vmatpush3.bf16.msra.mxu0 %v1360_v55 }
 0x2eb   : > { %v1635_v58 = vsel %vm419_vm1, %v1626_v56, 0  ;;  %2872 = vmatprep.subr.msk.bf16.mxu1 %vm419_vm1, %v1626_v56  ;;  %2871 = vmatprep.subr.msk.bf16.mxu0 %vm419_vm1, %v1535_v54 }
 0x2ec   : > { %2792 = vmatpush3.bf16.msra.mxu1 %v1635_v58  ;;  %v1533_v59 = vpop.permute.xlu1 %1532 }
 0x2ed   : > { %2772 = vmatmul.mubr.msk.bf16.vlgmr.msra.gmra.mxu0 %vm412_vm2, %v2932_v57 }
 0x2ee   : > { %v1624_v62 = vpop.permute.xlu0 %1623  ;;  %2784 = vmatpush3.bf16.msra.mxu0 %v1544_v61  ;;  %2787 = vmatprep.mubr.msk.bf16.mxu0 %vm412_vm2, %v2934_v60 }
 0x2ef   : > { %2793 = vmatprep.subr.bf16.mxu1 %v1624_v62  ;;  %2785 = vmatprep.subr.bf16.mxu0 %v1533_v59 }
 0x2f0   : > { %2794 = vmatpush3.bf16.msra.mxu1 %v1624_v62  ;;  %v1703_v0 = vpop.permute.xlu1 %1702 }
 0x2f1   : > { %v1712_v9 = vsel %vm419_vm1, %v1703_v0, 0 }
 0x2f2   : > { %v1794_v2 = vpop.permute.xlu0 %1793  ;;  %2786 = vmatpush3.bf16.msra.mxu0 %v1533_v59 }
 0x2f3   : > { %v1803_v3 = vsel %vm419_vm1, %v1794_v2, 0  ;;  %2874 = vmatprep.subr.msk.bf16.mxu1 %vm419_vm1, %v1794_v2  ;;  %2873 = vmatprep.subr.msk.bf16.mxu0 %vm419_vm1, %v1703_v0 }
 0x2f4   : > { %2796 = vmatmul.mubr.msk.bf16.vlgmr.msra.gmra.mxu1 %vm412_vm2, %v2935_v63  ;;  %v1701_v8 = vpop.permute.xlu1 %1700 }
 0x2f5   : > { %2808 = vmatpush3.bf16.msra.mxu1 %v1803_v3  ;;  %2811 = vmatprep.mubr.msk.bf16.mxu1 %vm412_vm2, %v2937_v1 }
 0x2f6   : > { %2788 = vmatmul.mubr.msk.bf16.vlgmr.msra.gmra.mxu0 %vm412_vm2, %v2936_v6  ;;  %v1792_v10 = vpop.permute.xlu0 %1791 }
 0x2f7   : > { %2800 = vmatpush3.bf16.msra.mxu0 %v1712_v9  ;;  %2809 = vmatprep.subr.bf16.mxu1 %v1792_v10 }
 0x2f8   : > { %2801 = vmatprep.subr.bf16.mxu0 %v1701_v8  ;;  %2803 = vmatprep.mubr.msk.bf16.mxu0 %vm412_vm2, %v2938_v7  ;;  %v1885_v12 = vpop.permute.xlu1 %1884 }
 0x2f9   : > { %2810 = vmatpush3.bf16.msra.mxu1 %v1792_v10  ;;  %v1894_v19 = vsel %vm419_vm1, %v1885_v12, 0 }
 0x2fa   : > { %v1962_v14 = vpop.permute.xlu0 %1961 }
 0x2fb   : > { %v1971_v16 = vsel %vm419_vm1, %v1962_v14, 0  ;;  %2802 = vmatpush3.bf16.msra.mxu0 %v1701_v8  ;;  %2876 = vmatprep.subr.msk.bf16.mxu1 %vm419_vm1, %v1962_v14 }
 0x2fc   : > { %2875 = vmatprep.subr.msk.bf16.mxu0 %vm419_vm1, %v1885_v12  ;;  %2812 = vmatmul.mubr.msk.bf16.vlgmr.msra.gmra.mxu1 %vm412_vm2, %v2939_v11  ;;  %v1883_v18 = vpop.permute.xlu1 %1882 }
 0x2fd   : > { %2824 = vmatpush3.bf16.msra.mxu1 %v1971_v16  ;;  %2827 = vmatprep.mubr.msk.bf16.mxu1 %vm412_vm2, %v2942_v13 }
 0x2fe   : > { %2804 = vmatmul.mubr.msk.bf16.vlgmr.msra.gmra.mxu0 %vm412_vm2, %v2940_v15  ;;  %v1960_v20 = vpop.permute.xlu0 %1959 }
 0x2ff   : > { %2816 = vmatpush3.bf16.msra.mxu0 %v1894_v19  ;;  %2825 = vmatprep.subr.bf16.mxu1 %v1960_v20 }
 0x300   : > { %2817 = vmatprep.subr.bf16.mxu0 %v1883_v18  ;;  %2819 = vmatprep.mubr.msk.bf16.mxu0 %vm412_vm2, %v2941_v17  ;;  %v2053_v22 = vpop.permute.xlu1 %2052 }
 0x301   : > { %2826 = vmatpush3.bf16.msra.mxu1 %v1960_v20  ;;  %v2062_v25 = vsel %vm419_vm1, %v2053_v22, 0 }
 0x303   : > { %2818 = vmatpush3.bf16.msra.mxu0 %v1883_v18 }
 0x304   : > { %2877 = vmatprep.subr.msk.bf16.mxu0 %vm419_vm1, %v2053_v22  ;;  %2828 = vmatmul.mubr.msk.bf16.vlgmr.msra.gmra.mxu1 %vm412_vm2, %v2944_v21  ;;  %v2051_v26 = vpop.permute.xlu1 %2050 }
 0x306   : > { %2820 = vmatmul.mubr.msk.bf16.vlgmr.msra.gmra.mxu0 %vm412_vm2, %v2943_v23 }
 0x307   : > { %2832 = vmatpush3.bf16.msra.mxu0 %v2062_v25  ;;  %2835 = vmatprep.mubr.msk.bf16.mxu0 %vm412_vm2, %v2945_v24 }
 0x308   : > { %2833 = vmatprep.subr.bf16.mxu0 %v2051_v26 }
 0x30b   : > { %2834 = vmatpush3.bf16.msra.mxu0 %v2051_v26 }
 0x30e   : > { %2836 = vmatmul.mubr.msk.bf16.vlgmr.msra.gmra.mxu0 %vm412_vm2, %v2946_v27 }
 0x33c   : > { %v2781_v28 = vpop.f32.mrf.mxu1 }
 0x33e   : > { %v1481_v29 = vpop.f32.mrf.mxu1 }
 0x340   : > { %v2782_v30 = vpop.f32.mrf.mxu1 }
 0x341   : > { %v2982_v30 = vmov 0.0  }
 0x342   : > { %v1484_v33 = vpop.f32.mrf.mxu1  ;;  %2839 = vmatprep.subr.mxu0 %v2982_v30  ;;  %2848 = vmatprep.subr.mxu1 %v2982_v30 }
 0x343   : > { %2845 = vmatprep.mubr.msk.f32.mxu0 %vm2983_vm8, %v2982_v30  ;;  %2850 = vmatprep.mubr.msk.f32.mxu1 %vm2983_vm8, %v2982_v30 }
 0x3ad   : > { %v2773_v31 = vpop.f32.mrf.mxu0 }
 0x3ae   : > { %v1490_v43 = vadd.f32 %v2781_v28, %v2773_v31 }
 0x3af   : > { %v1407_v32 = vpop.f32.mrf.mxu0 }
 0x3b0   : > { %v1482_v47 = vadd.f32 %v1481_v29, %v1407_v32 }
 0x3b1   : > { %v2774_v34 = vpop.f32.mrf.mxu0 }
 0x3b3   : > { %v1410_v35 = vpop.f32.mrf.mxu0 }
 0x3b4   : > { %v2797_v36 = vpop.f32.mrf.mxu1  ;;  %v1485_v54 = vadd.f32 %v1484_v33, %v1410_v35 }
 0x3b6   : > { %v2789_v37 = vpop.f32.mrf.mxu0  ;;  %v1671_v38 = vpop.f32.mrf.mxu1 }
 0x3b7   : > { %v1596_v48 = vadd.f32 %v2789_v37, %v1490_v43  ;;  %v2129_v37 = vld [vmem:[%s3408_s7] sm:$0x3f] }
 0x3b8   : > { %v1580_v39 = vpop.f32.mrf.mxu0  ;;  %v2798_v40 = vpop.f32.mrf.mxu1  ;;  %v2205_v43 = vld [vmem:[%s3410_s9] sm:$0xff] }
 0x3b9   : > { %v1594_v51 = vadd.f32 %v1580_v39, %v1482_v47  ;;  %v1687_v55 = vadd.f32 %v2797_v36, %v1596_v48  ;;  %v2208_v47 = vld [vmem:[%s3411_s10] sm:$0xff] }
 0x3ba   : > { %v2790_v41 = vpop.f32.mrf.mxu0  ;;  %v1674_v42 = vpop.f32.mrf.mxu1 }
 0x3bb   : > { %v1685_v58 = vadd.f32 %v1671_v38, %v1594_v51  ;;  %v2130_v38 = vld [vmem:[%s3409_s8] sm:$0x3f]  ;;  %v2209_v51 = vld [vmem:[%s3411_s10 + $0x8] sm:$0xff] }
 0x3bc   : > { %v1583_v44 = vpop.f32.mrf.mxu0  ;;  %v2813_v45 = vpop.f32.mrf.mxu1 }
 0x3bd   : > { %v1595_v59 = vadd.f32 %v1583_v44, %v1485_v54  ;;  %v2206_v44 = vld [vmem:[%s3410_s9 + $0x8] sm:$0xff] }
 0x3be   : > { %v2805_v49 = vpop.f32.mrf.mxu0  ;;  %v1839_v50 = vpop.f32.mrf.mxu1 }
 0x3bf   : > { %v1764_v60 = vadd.f32 %v2805_v49, %v1687_v55  ;;  %v1686_v2 = vadd.f32 %v1674_v42, %v1595_v59 }
 0x3c0   : > { %v1748_v52 = vpop.f32.mrf.mxu0  ;;  %v2814_v53 = vpop.f32.mrf.mxu1 }
 0x3c1   : > { %v1762_v63 = vadd.f32 %v1748_v52, %v1685_v58  ;;  %v1855_v6 = vadd.f32 %v2813_v45, %v1764_v60  ;;  %v2207_v45 = vld [vmem:[%s3410_s9 + $0x10] sm:$0xff] }
 0x3c2   : > { %v2806_v56 = vpop.f32.mrf.mxu0  ;;  %v1842_v57 = vpop.f32.mrf.mxu1 }
 0x3c3   : > { %v1853_v8 = vadd.f32 %v1839_v50, %v1762_v63  ;;  %v2210_v56 = vld [vmem:[%s3411_s10 + $0x10] sm:$0xff] }
 0x3c4   : > { %v1751_v61 = vpop.f32.mrf.mxu0  ;;  %v2829_v62 = vpop.f32.mrf.mxu1 }
 0x3c5   : > { %v1763_v9 = vadd.f32 %v1751_v61, %v1686_v2 }
 0x3c6   : > { %v2821_v0 = vpop.f32.mrf.mxu0  ;;  %v2007_v1 = vpop.f32.mrf.mxu1 }
 0x3c7   : > { %v1946_v10 = vadd.f32 %v2821_v0, %v1855_v6  ;;  %v1854_v14 = vadd.f32 %v1842_v57, %v1763_v9 }
 0x3c8   : > { %v1930_v3 = vpop.f32.mrf.mxu0  ;;  %v2830_v7 = vpop.f32.mrf.mxu1 }
 0x3c9   : > { %v1944_v12 = vadd.f32 %v1930_v3, %v1853_v8  ;;  %v2023_v15 = vadd.f32 %v2829_v62, %v1946_v10 }
 0x3ca   : > { %v2822_v11 = vpop.f32.mrf.mxu0  ;;  %v2010_v23 = vpop.f32.mrf.mxu1 }
 0x3cb   : > { %v2021_v17 = vadd.f32 %v2007_v1, %v1944_v12 }
 0x3cc   : > { %v1933_v13 = vpop.f32.mrf.mxu0 }
 0x3cd   : > { %v1945_v18 = vadd.f32 %v1933_v13, %v1854_v14 }
 0x3ce   : > { %v2837_v16 = vpop.f32.mrf.mxu0 }
 0x3cf   : > { %v3349_v19 = vadd.f32 %v2837_v16, %v2023_v15  ;;  %v2022_v25 = vadd.f32 %v2010_v23, %v1945_v18 }
 0x3d0   : > { %v2098_v20 = vpop.f32.mrf.mxu0 }
 0x3d1   : > { %v3351_v21 = vadd.f32 %v2098_v20, %v2021_v17  ;;  %v2122_v22 = vsel %vm2115_vm7, %v3349_v19, 0.0 }
 0x3d2   : > { %2123 = vadd.xlane.f32.xlu0 %v2122_v22  ;;  %v2838_v24 = vpop.f32.mrf.mxu0 }
 0x3d3   : > { %v2116_v28 = vsel %vm2115_vm7, %v3351_v21, 0.0 }
 0x3d4   : > { %v2101_v26 = vpop.f32.mrf.mxu0 }
 0x3d5   : > { %v3354_v27 = vadd.f32 %v2101_v26, %v2022_v25 }
 0x3d6   : > { %2117 = vadd.xlane.f32.xlu0 %v2116_v28 }
 0x3d7   : > { %v2119_v29 = vsel %vm2115_vm7, %v3354_v27, 0.0 }
 0x3d8   : > { %2120 = vadd.xlane.f32.xlu1 %v2119_v29 }
 0x45b   : > { %v2124_v31 = vpop.xlane.xlu0 %2123 }
 0x45c   : > { %v2128_v32 = vmul.f32 0.015625, %v2124_v31 }
 0x45e   : > { %2840 = vmatpush3.msra.mxu0 %v2128_v32 }
 0x45f   : > { %2841 = vmatprep.subr.mxu0 %v2982_v30  ;;  %v2118_v33 = vpop.xlane.xlu0 %2117 }
 0x460   : > { %v2126_v36 = vmul.f32 0.015625, %v2118_v33 }
 0x461   : > { %v2121_v34 = vpop.xlane.xlu1 %2120 }
 0x462   : > { %v2127_v35 = vmul.f32 0.015625, %v2121_v34 }
 0x464   : > { %2842 = vmatpush3.msra.mxu0 %v2127_v35 }
 0x465   : > { %2843 = vmatprep.subr.mxu0 %v2982_v30 }
 0x466   : > { %2844 = vmatpush3.msra.mxu0 %v2126_v36 }
 0x467   : > { %2846 = vmatmul.mubr.msk.f32.vlgmr.msra.gmra.mxu0 %vm412_vm2, %v2129_v37 }
 0x527   : > { %v2200_v39 = vpop.f32.mrf.mxu0 }
 0x528   : > { %v2201_v40 = vadd.f32 %v2200_v39, %v2130_v38 }
 0x529   : > { %v2847_v41 = vpop.f32.mrf.mxu0 }
 0x52a   : > { %v2204_v42 = vmax.f32 %v2201_v40, 0.0 }
 0x52c   : > { %2849 = vmatpush3.msk.msra.mxu1 %vm2221_vm9, %v2204_v42 }
 0x52d   : > { %2851 = vmatmul.mubr.msk.f32.vlgmr.msra.gmra.mxu1 %vm2211_vm10, %v2205_v43 }
 0x52e   : > { %2853 = vmatprep.mubr.msk.f32.mxu1 %vm2983_vm8, %v2982_v30 }
 0x531   : > { %2854 = vmatmul.mubr.msk.f32.gmra.mxu1 %vm2211_vm10, %v2206_v44 }
 0x532   : > { %2856 = vmatprep.mubr.msk.f32.mxu1 %vm2983_vm8, %v2982_v30 }
 0x535   : > { %2857 = vmatmul.mubr.msk.f32.gmra.mxu1 %vm2211_vm10, %v2207_v45 }
 0x5ed   : > { %v2291_v48 = vpop.f32.mrf.mxu1 }
 0x5ee   : > { %v2292_v49 = vadd.f32 %v2291_v48, %v2208_v47 }
 0x5ef   : > { %v2852_v50 = vpop.f32.mrf.mxu1 }
 0x5f0   : > { %v2589_v52 = vmul.f32 -1.442695, %v2292_v49 }
 0x5f1   : > { %v2296_v53 = vpop.f32.mrf.mxu1 }
 0x5f2   : > { %2947 = vpow2.f32 %v2589_v52  ;;  %v2297_v54 = vadd.f32 %v2296_v53, %v2209_v51 }
 0x5f3   : > { %v2855_v55 = vpop.f32.mrf.mxu1 }
 0x5f4   : > { %v2590_v57 = vmul.f32 -1.442695, %v2297_v54 }
 0x5f5   : > { %v2301_v58 = vpop.f32.mrf.mxu1 }
 0x5f6   : > { %2949 = vpow2.f32 %v2590_v57  ;;  %v2302_v59 = vadd.f32 %v2301_v58, %v2210_v56 }
 0x5f7   : > { %v2858_v60 = vpop.f32.mrf.mxu1 }
 0x5f8   : > { %v2591_v61 = vmul.f32 -1.442695, %v2302_v59 }
 0x5fa   : > { %2951 = vpow2.f32 %v2591_v61 }
 0x5ff   : > { %v2948_v62 = vpop.eup %2947 }
 0x600   : > { %v2314_v63 = vadd.f32 1.0, %v2948_v62 }
 0x602   : > { %2953 = vrcp.f32 %v2314_v63 }
 0x603   : > { %v2950_v0 = vpop.eup %2949 }
 0x604   : > { %v2315_v1 = vadd.f32 1.0, %v2950_v0 }
 0x606   : > { %2955 = vrcp.f32 %v2315_v1 }
 0x607   : > { %v2952_v2 = vpop.eup %2951 }
 0x608   : > { %v2316_v6 = vadd.f32 1.0, %v2952_v2 }
 0x60a   : > { %2957 = vrcp.f32 %v2316_v6 }
 0x60f   : > { %v2954_v3 = vpop.eup %2953 }
 0x610   : > { %2325 = vperm.xlu0 %2904, %v2954_v3  }
 0x613   : > { %v2956_v7 = vpop.eup %2955 }
 0x614   : > { %2330 = vperm.xlu1 %2905, %v2956_v7  }
 0x617   : > { %v2958_v8 = vpop.eup %2957 }
 0x618   : > { %2335 = vperm.xlu1 %2905, %v2958_v8  }
 0x68b   : > { %v2326_v9 = vpop.permute.xlu0 %2325 }
 0x68c   : > { %v2338_v10 = vmul.f32 %v2326_v9, %v3351_v21 }
 0x68e   : > { %v2341_v11 = vadd.f32 %v2338_v10, %v3148_v5 }
 0x68f   : > { %v2331_v12 = vpop.permute.xlu1 %2330 }
 0x690   : > { %v2600_v13 = vpack.c.bf16 %v2341_v11, %v2341_v11  ;;  %v2339_v14 = vmul.f32 %v2331_v12, %v3354_v27 }
 0x692   : > { %2358 = vst.msk [vmem:[%s387_s17] sm:$0xf] %vm2357_vm11, %v2600_v13  ;;  %v2342_v15 = vadd.f32 %v2339_v14, %v3222_v46 }
 0x693   : > { %v2336_v16 = vpop.permute.xlu1 %2335 }
 0x694   : > { %v2601_v17 = vpack.c.bf16 %v2342_v15, %v2342_v15  ;;  %v2340_v18 = vmul.f32 %v2336_v16, %v3349_v19 }
 0x696   : > { %2359 = vst.msk [vmem:[%s387_s17 + $0x4] sm:$0xf] %vm2357_vm11, %v2601_v17  ;;  %v2343_v5 = vadd.f32 %v3146_v4, %v2340_v18 }
 0x698   : > { %v2602_v20 = vpack.c.bf16 %v2343_v5, %v2343_v5 }
 0x69a   : > { %2360 = vst.msk [vmem:[%s387_s17 + $0x8] sm:$0xf] %vm2357_vm11, %v2602_v20 }
 0x69b PF: > { %s22_s19 = sadd.s32 1, %s2965_s19  }
 0x69c   : > { %p19_p4 = scmp.ge.s32.totalorder %s22_s19, 4  }
 0x69e   :  { %21 = sbr.rel (!%p19_p4) target bundleno = 2 (0x2), region = 110 }

// kernel: encoder_forward.14
= control target key start
LH: loop header
LB: loop body
LE: loop exit
PB: predicated region body
PF: predicated region fallthrough
CT: control target
= control target key end

     0   :  { %s3196_s19 = smov 0   ;;  %s3584_s0 = inlined_call_operand.vmem [shape: bf16[2,32,16], index: 0, kind: input, shape index: {}]   ;;  %s3585_s1 = inlined_call_operand.vmem [shape: bf16[1,16], index: 1, kind: input, shape index: {}]   ;;  %s3586_s2 = inlined_call_operand.vmem [shape: bf16[1,16], index: 2, kind: input, shape index: {}]   ;;  %s3587_s3 = inlined_call_operand.vmem [shape: bf16[32,32], index: 3, kind: input, shape index: {}]   ;;  %s3588_s4 = inlined_call_operand.vmem [shape: bf16[9,32,32], index: 4, kind: input, shape index: {}]   ;;  %s3589_s5 = inlined_call_operand.<no memory space> [shape: f32[1], index: 5, kind: input, shape index: {}]   ;;  %s3590_s6 = inlined_call_operand.vmem [shape: bf16[9,32,32], index: 6, kind: input, shape index: {}]   ;;  %s3591_s7 = inlined_call_operand.vmem [shape: f32[8,32], index: 7, kind: input, shape index: {}]   ;;  %s3592_s8 = inlined_call_operand.vmem [shape: f32[8,1], index: 8, kind: input, shape index: {}]   ;;  %s3593_s9 = inlined_call_operand.vmem [shape: f32[32,8], index: 9, kind: input, shape index: {}]   ;;  %s3594_s10 = inlined_call_operand.vmem [shape: f32[32,1], index: 10, kind: input, shape index: {}]   ;;  %s3595_s11 = inlined_call_operand.vmem [shape: bf16[2,32,16], index: 11, kind: output, shape index: {}]  }
   0x1   :  { %16 = sst [smem:[#allocation3]] %s3589_s5 }
   0x2 LB: > { %s2553_s20 = sadd.s32 4294967295, %s3114_s19   ;;  %p2557_p0 = scmp.ge.s32.totalorder %s3114_s19, 1  ;;  %s3114_s19 = sphi %s3196_s19, %s22_s19  }
   0x3   : > { %p338_p1 = scmp.lt.s32.totalorder %s3114_s19, 3 }
   0x5   : > { %p339_p2 = pnand %p2557_p0, %p338_p1 }
   0x6   : > { %p378_p3 = scmp.lt.s32.totalorder (!%p339_p2), %s2553_s20, 1  ;;  %s3117_s28 = smov (!%p339_p2), 5  }
   0x7   : > { %342 = sbr.rel (%p339_p2) target bundleno = 1702 (0x6a6), region = 64  ;;  %s3118_s14 = smov (!%p339_p2), 2  }
   0x8   : > { %s3119_s15 = smov (!%p339_p2), 4   ;;  %s3120_s16 = smov (!%p339_p2), 6  }
   0x9   : > { %s3121_s17 = smov (!%p339_p2), 8   ;;  %s3122_s18 = smov (!%p339_p2), 10  }
   0xa   : > { %s3123_s25 = smov (!%p339_p2), 127   ;;  %s3124_s26 = smov (!%p339_p2), 126  }
   0xb   : > { %s3125_s13 = smov (!%p339_p2), 123   ;;  %s3126_s21 = smov (!%p339_p2), 124  }
   0xc   : > { %v505_v0 = vlaneseq  ;;  %v684_v1 = vld [vmem:[%s3586_s2] sm:$0x1]  ;;  %vm475_vm0 = vcmask 207872   ;;  %s3611_s20 = smov (!%p378_p3, %s2553_s20), 1  ;;  %v3116_v4 = vmov 0   ;;  %vm419_vm1 = vcmask 261120  }
   0xd   : > { %v501_v2 = vld [vmem:[%s3585_s1] sm:$0x1]  ;;  %478 = vst.msk [vmem:[#allocation2 + $0x8] sm:$0xf] %vm475_vm0, %v3116_v4  ;;  %476 = vst.msk [vmem:[#allocation2] sm:$0xf] %vm475_vm0, %v3116_v4  ;;  %3048 = vset.pattern.permute.xlu0 %v3116_v4  ;;  %3047 = vset.pattern.permute.xlu1 %v3116_v4  ;;  %v686_v5 = vpack.i.b16 %v684_v1, %v684_v1 }
   0xe   : > { %v506_v3 = vshrl.u32 %v505_v0, 7  ;;  %477 = vst.msk [vmem:[#allocation2 + $0x4] sm:$0xf] %vm475_vm0, %v3116_v4  ;;  %479 = vst.msk [vmem:[#allocation2 + $0xc] sm:$0xf] %vm475_vm0, %v3116_v4  ;;  %v503_v6 = vpack.i.b16 %v501_v2, %v501_v2  ;;  %s3596_s24 = sshll.u32 %s3611_s20, 4 }
   0xf   : > { %s382_s27 = scalar_lea.vmem %s3584_s0, %s3596_s24  ;;  %v3052_v18 = vld [vmem:[%s3587_s3] sm:$0xff]   ;;  %v3053_v19 = vld [vmem:[%s3587_s3 + $0x8] sm:$0xff]   ;;  %vm492_vm2 = vcmask 166952   ;;  %v3054_v25 = vld [vmem:[%s3588_s4 + $0x10] sm:$0xff]   ;;  %s3603_s22 = smov 122   ;;  %vm2225_vm7 = vcmask 130048  }
  0x10   : > { %v3213_v7 = vsub.s32 0, %v506_v3  ;;  %v391_v8 = vld [vmem:[%s382_s27 + $0x8] sm:$0xf]  ;;  %v389_v9 = vld [vmem:[%s382_s27] sm:$0xf]  ;;  %2855 = vmatprep.mubr.msk.bf16.mxu0 %vm419_vm1, %v3052_v18  ;;  %2863 = vmatprep.mubr.msk.bf16.mxu1 %vm419_vm1, %v3054_v25  ;;  %v3059_v54 = vld [vmem:[%s3588_s4 + $0x30] sm:$0xff]  }
  0x11   : > { %v390_v10 = vld [vmem:[%s382_s27 + $0x4] sm:$0xf]  ;;  %484 = vrot.lane.b32.xlu0 %v391_v8, %s3117_s28  ;;  %480 = vrot.lane.b32.xlu1 %v389_v9, %s3117_s28  ;;  %v392_v11 = vld [vmem:[%s382_s27 + $0xc] sm:$0xf]  ;;  %s3601_s5 = smov 120   ;;  %s3599_s23 = smov 119  }
  0x12   : > { %v691_v12 = vrot.slane %v686_v5, %v3213_v7  ;;  %v508_v13 = vrot.slane %v503_v6, %v3213_v7  ;;  %v2565_v14 = vcombine.low %v391_v8, %v392_v11  ;;  %v2564_v15 = vcombine.low %v389_v9, %v390_v10  ;;  %v3055_v28 = vld [vmem:[%s3588_s4] sm:$0xff]   ;;  %v3057_v52 = vld [vmem:[%s3588_s4 + $0x8] sm:$0xff]   ;;  %s3597_s27 = smov 118   ;;  %s3609_s30 = sshll.u32 %s3611_s20, 4 }
  0x13   : > { %vm3132_vm8 = vmmov 0   ;;  %vm2327_vm9 = vcmask 64512   ;;  %vm2493_vm10 = vcmask 125952  }
  0x14   : > { %2851 = vmatprep.subr.bf16.mxu0 %v2565_v14  ;;  %v2585_v16 = vcombine.low %v691_v12, %v691_v12  ;;  %v2568_v17 = vcombine.low %v508_v13, %v508_v13 }
  0x15   : > { %486 = vrot.lane.b32.xlu0 %v392_v11, %s3117_s28  ;;  %482 = vrot.lane.b32.xlu1 %v390_v10, %s3117_s28 }
  0x16   : > { %2852 = vmatpush3.bf16.msra.mxu0 %v2565_v14 }
  0x17   : > { %2853 = vmatprep.subr.bf16.mxu0 %v2564_v15 }
  0x19   : > { %695 = vrot.lane.b32.xlu0 %v2585_v16, %s3118_s14  ;;  %792 = vrot.lane.b32.xlu1 %v2568_v17, %s3119_s15 }
  0x1a   : > { %2854 = vmatpush3.bf16.msra.mxu0 %v2564_v15 }
  0x1d   : > { %969 = vrot.lane.b32.xlu0 %v2585_v16, %s3120_s16  ;;  %1066 = vrot.lane.b32.xlu1 %v2568_v17, %s3121_s17 }
  0x1e   : > { %2856 = vmatmul.mubr.msk.bf16.vlgmr.msra.gmra.mxu0 %vm419_vm1, %v3053_v19 }
  0x1f   : > { %2871 = vmatprep.mubr.msk.bf16.mxu0 %vm419_vm1, %v3055_v28 }
  0x21   : > { %1243 = vrot.lane.b32.xlu0 %v2585_v16, %s3122_s18  ;;  %v3056_v16 = vld [vmem:[%s3588_s4 + $0x18] sm:$0xff]  }
  0x83   : > { %v485_v20 = vpop.permute.xlu0 %484  ;;  %v481_v21 = vpop.permute.xlu1 %480 }
  0x84   : > { %495 = vst.msk [vmem:[#allocation2 + $0x8] sm:$0xf] %vm492_vm2, %v485_v20  ;;  %493 = vst.msk [vmem:[#allocation2] sm:$0xf] %vm492_vm2, %v481_v21 }
  0x87   : > { %v487_v22 = vpop.permute.xlu0 %486  ;;  %v483_v23 = vpop.permute.xlu1 %482 }
  0x88   : > { %496 = vst.msk [vmem:[#allocation2 + $0xc] sm:$0xf] %vm492_vm2, %v487_v22  ;;  %494 = vst.msk [vmem:[#allocation2 + $0x4] sm:$0xf] %vm492_vm2, %v483_v23  ;;  %v3060_v22 = vld [vmem:[%s3588_s4 + $0x28] sm:$0xff]   ;;  %v3061_v23 = vld [vmem:[%s3588_s4 + $0x38] sm:$0xff]  }
  0x8b   : > { %v3243_v24 = vld [vmem:[#allocation2 + $0x8] sm:$0xf]  ;;  %v3248_v26 = vld [vmem:[#allocation2] sm:$0xf]  ;;  %v696_v30 = vpop.permute.xlu0 %695  ;;  %v793_v42 = vpop.permute.xlu1 %792 }
  0x8c   : > { %v698_v31 = vmul.bf16 %v696_v30, %v3248_v26  ;;  %v515_v33 = vmul.bf16 %v2568_v17, %v3243_v24  ;;  %v513_v38 = vmul.bf16 %v2568_v17, %v3248_v26  ;;  %v700_v39 = vmul.bf16 %v696_v30, %v3243_v24 }
  0x8d   : > { %v797_v47 = vmul.bf16 %v793_v42, %v3243_v24  ;;  %v795_v48 = vmul.bf16 %v793_v42, %v3248_v26 }
  0x8f   : > { %v3250_v27 = vld [vmem:[#allocation2 + $0x4] sm:$0xf]  ;;  %v3255_v29 = vld [vmem:[#allocation2 + $0xc] sm:$0xf]  ;;  %v970_v50 = vpop.permute.xlu0 %969  ;;  %v1067_v53 = vpop.permute.xlu1 %1066 }
  0x90   : > { %v699_v32 = vmul.bf16 %v696_v30, %v3250_v27  ;;  %v701_v34 = vmul.bf16 %v696_v30, %v3255_v29  ;;  %v3265_v35 = vcombine.low %v3243_v24, %v3255_v29  ;;  %v3269_v36 = vcombine.low %v3248_v26, %v3250_v27 }
  0x91   : > { %v516_v37 = vmul.bf16 %v2568_v17, %v3255_v29  ;;  %v514_v41 = vmul.bf16 %v2568_v17, %v3250_v27  ;;  %v798_v43 = vmul.bf16 %v793_v42, %v3255_v29  ;;  %v796_v49 = vmul.bf16 %v793_v42, %v3250_v27  ;;  %v3058_v17 = vld [vmem:[%s3588_s4 + $0x20] sm:$0xff]  }
  0x92   : > { %548 = vrot.lane.b32.xlu1 %v3265_v35, %s3123_s25  ;;  %546 = vrot.lane.b32.xlu0 %v3269_v36, %s3123_s25  ;;  %v2593_v44 = vcombine.low %v700_v39, %v701_v34  ;;  %v2592_v45 = vcombine.low %v698_v31, %v699_v32  ;;  %v974_v55 = vmul.bf16 %v970_v50, %v3243_v24  ;;  %v3065_v31 = vld [vmem:[%s3588_s4 + $0x58] sm:$0xff]   ;;  %v3067_v34 = vld [vmem:[%s3588_s4 + $0x70] sm:$0xff]  }
  0x93   : > { %v2582_v40 = vcombine.low %v515_v33, %v516_v37  ;;  %v2581_v46 = vcombine.low %v513_v38, %v514_v41  ;;  %v2603_v51 = vcombine.low %v797_v47, %v798_v43  ;;  %v975_v56 = vmul.bf16 %v970_v50, %v3255_v29  ;;  %v1244_v2 = vpop.permute.xlu0 %1243  ;;  %v3066_v33 = vld [vmem:[%s3588_s4 + $0x60] sm:$0xff]   ;;  %v3068_v37 = vld [vmem:[%s3588_s4 + $0x68] sm:$0xff]   ;;  %v3069_v38 = vld [vmem:[%s3588_s4 + $0x78] sm:$0xff]  }
  0x94   : > { %v1071_v57 = vmul.bf16 %v1067_v53, %v3243_v24  ;;  %v1072_v58 = vmul.bf16 %v1067_v53, %v3255_v29  ;;  %v2602_v59 = vcombine.low %v795_v48, %v796_v49  ;;  %v972_v60 = vmul.bf16 %v970_v50, %v3248_v26  ;;  %v3070_v39 = vld [vmem:[%s3588_s4 + $0x80] sm:$0xff]   ;;  %v3071_v41 = vld [vmem:[%s3588_s4 + $0x88] sm:$0xff]  }
  0x95   : > { %2867 = vmatprep.subr.bf16.mxu0 %v2582_v40  ;;  %v973_v61 = vmul.bf16 %v970_v50, %v3250_v27  ;;  %v1069_v62 = vmul.bf16 %v1067_v53, %v3248_v26  ;;  %v1070_v63 = vmul.bf16 %v1067_v53, %v3250_v27  ;;  %v2621_v0 = vcombine.low %v974_v55, %v975_v56 }
  0x96   : > { %2868 = vmatpush3.bf16.msra.mxu0 %v2582_v40  ;;  %729 = vrot.lane.b32.xlu1 %v2593_v44, %s3124_s26  ;;  %v2631_v1 = vcombine.low %v1071_v57, %v1072_v58  ;;  %v1248_v3 = vmul.bf16 %v1244_v2, %v3243_v24  ;;  %v1249_v4 = vmul.bf16 %v1244_v2, %v3255_v29  ;;  %v3064_v29 = vld [vmem:[%s3588_s4 + $0x48] sm:$0xff]  }
  0x97   : > { %727 = vrot.lane.b32.xlu0 %v2592_v45, %s3124_s26  ;;  %2869 = vmatprep.subr.bf16.mxu0 %v2581_v46  ;;  %v2620_v5 = vcombine.low %v972_v60, %v973_v61  ;;  %v2630_v6 = vcombine.low %v1069_v62, %v1070_v63  ;;  %v1246_v8 = vmul.bf16 %v1244_v2, %v3248_v26  ;;  %v3062_v26 = vld [vmem:[%s3588_s4 + $0x40] sm:$0xff]  }
  0x98   : > { %v1247_v9 = vmul.bf16 %v1244_v2, %v3250_v27  ;;  %v2649_v10 = vcombine.low %v1248_v3, %v1249_v4  ;;  %v3063_v27 = vld [vmem:[%s3588_s4 + $0x50] sm:$0xff]  }
  0x9a   : > { %2870 = vmatpush3.bf16.msra.mxu0 %v2581_v46  ;;  %826 = vrot.lane.b32.xlu1 %v2603_v51, %s3126_s21  ;;  %v2648_v11 = vcombine.low %v1246_v8, %v1247_v9 }
  0x9b   : > { %906 = vrot.lane.b32.xlu0 %v3265_v35, %s3125_s13 }
  0x9d   : > { %2872 = vmatmul.mubr.msk.bf16.vlgmr.msra.gmra.mxu0 %vm419_vm1, %v3057_v52 }
  0x9e   : > { %2887 = vmatprep.mubr.msk.bf16.mxu0 %vm419_vm1, %v3059_v54  ;;  %824 = vrot.lane.b32.xlu1 %v2602_v59, %s3126_s21 }
  0x9f   : > { %904 = vrot.lane.b32.xlu0 %v3269_v36, %s3125_s13 }
  0xa2   : > { %1003 = vrot.lane.b32.xlu1 %v2621_v0, %s3603_s22 }
  0xa3   : > { %1100 = vrot.lane.b32.xlu0 %v2631_v1, %s3601_s5 }
  0xa6   : > { %1001 = vrot.lane.b32.xlu1 %v2620_v5, %s3603_s22 }
  0xa7   : > { %1098 = vrot.lane.b32.xlu0 %v2630_v6, %s3601_s5 }
  0xaa   : > { %1180 = vrot.lane.b32.xlu1 %v3265_v35, %s3599_s23 }
  0xab   : > { %1277 = vrot.lane.b32.xlu0 %v2649_v10, %s3597_s27 }
  0xae   : > { %1178 = vrot.lane.b32.xlu1 %v3269_v36, %s3599_s23  ;;  %s1340_s23 = sld [smem:[#allocation3]] }
  0xaf   : > { %1275 = vrot.lane.b32.xlu0 %v2648_v11, %s3597_s27 }
  0xde   : > { %v3377_v42 = vpop.f32.mrf.mxu0 }
  0xe0   : > { %v3379_v43 = vpop.f32.mrf.mxu0 }
  0xe2   : > { %v3381_v44 = vpop.f32.mrf.mxu0 }
  0xe4   : > { %v3383_v45 = vpop.f32.mrf.mxu0 }
 0x104   : > { %v547_v12 = vpop.permute.xlu0 %546  ;;  %v549_v13 = vpop.permute.xlu1 %548 }
 0x105   : > { %2859 = vmatprep.subr.bf16.mxu1 %v549_v13 }
 0x106   : > { %2860 = vmatpush3.bf16.msra.mxu1 %v549_v13 }
 0x107   : > { %2861 = vmatprep.subr.bf16.mxu1 %v547_v12 }
 0x108   : > { %v730_v15 = vpop.permute.xlu1 %729 }
 0x109   : > { %v728_v14 = vpop.permute.xlu0 %727 }
 0x10a   : > { %2862 = vmatpush3.bf16.msra.mxu1 %v547_v12 }
 0x10b   : > { %2875 = vmatprep.subr.bf16.mxu1 %v730_v15 }
 0x10c   : > { %v827_v19 = vpop.permute.xlu1 %826 }
 0x10d   : > { %v907_v18 = vpop.permute.xlu0 %906  ;;  %2864 = vmatmul.mubr.msk.bf16.vlgmr.msra.gmra.mxu1 %vm419_vm1, %v3056_v16  ;;  %2883 = vmatprep.subr.bf16.mxu0 %v827_v19 }
 0x10e   : > { %2876 = vmatpush3.bf16.msra.mxu1 %v730_v15  ;;  %2884 = vmatpush3.bf16.msra.mxu0 %v827_v19 }
 0x10f   : > { %2877 = vmatprep.subr.bf16.mxu1 %v728_v14  ;;  %2879 = vmatprep.mubr.msk.bf16.mxu1 %vm419_vm1, %v3058_v17 }
 0x110   : > { %v825_v21 = vpop.permute.xlu1 %824 }
 0x111   : > { %v905_v20 = vpop.permute.xlu0 %904  ;;  %2885 = vmatprep.subr.bf16.mxu0 %v825_v21 }
 0x112   : > { %2878 = vmatpush3.bf16.msra.mxu1 %v728_v14  ;;  %2886 = vmatpush3.bf16.msra.mxu0 %v825_v21 }
 0x113   : > { %2891 = vmatprep.subr.bf16.mxu1 %v907_v18 }
 0x114   : > { %v1004_v25 = vpop.permute.xlu1 %1003 }
 0x115   : > { %v1101_v24 = vpop.permute.xlu0 %1100  ;;  %2880 = vmatmul.mubr.msk.bf16.vlgmr.msra.gmra.mxu1 %vm419_vm1, %v3060_v22  ;;  %2888 = vmatmul.mubr.msk.bf16.vlgmr.msra.gmra.mxu0 %vm419_vm1, %v3061_v23 }
 0x116   : > { %2899 = vmatprep.subr.bf16.mxu0 %v1004_v25  ;;  %2892 = vmatpush3.bf16.msra.mxu1 %v907_v18 }
 0x117   : > { %2900 = vmatpush3.bf16.msra.mxu0 %v1004_v25  ;;  %2893 = vmatprep.subr.bf16.mxu1 %v905_v20 }
 0x118   : > { %v1002_v28 = vpop.permute.xlu1 %1001  ;;  %2895 = vmatprep.mubr.msk.bf16.mxu1 %vm419_vm1, %v3062_v26  ;;  %2903 = vmatprep.mubr.msk.bf16.mxu0 %vm419_vm1, %v3063_v27 }
 0x119   : > { %2901 = vmatprep.subr.bf16.mxu0 %v1002_v28  ;;  %v1099_v30 = vpop.permute.xlu0 %1098 }
 0x11a   : > { %2894 = vmatpush3.bf16.msra.mxu1 %v905_v20 }
 0x11b   : > { %2902 = vmatpush3.bf16.msra.mxu0 %v1002_v28  ;;  %2907 = vmatprep.subr.bf16.mxu1 %v1101_v24 }
 0x11c   : > { %v1181_v32 = vpop.permute.xlu1 %1180 }
 0x11d   : > { %2896 = vmatmul.mubr.msk.bf16.vlgmr.msra.gmra.mxu1 %vm419_vm1, %v3064_v29  ;;  %2915 = vmatprep.subr.bf16.mxu0 %v1181_v32  ;;  %v1278_v35 = vpop.permute.xlu0 %1277 }
 0x11e   : > { %2904 = vmatmul.mubr.msk.bf16.vlgmr.msra.gmra.mxu0 %vm419_vm1, %v3065_v31  ;;  %2908 = vmatpush3.bf16.msra.mxu1 %v1101_v24 }
 0x11f   : > { %2916 = vmatpush3.bf16.msra.mxu0 %v1181_v32  ;;  %2909 = vmatprep.subr.bf16.mxu1 %v1099_v30 }
 0x120   : > { %v1179_v36 = vpop.permute.xlu1 %1178  ;;  %2911 = vmatprep.mubr.msk.bf16.mxu1 %vm419_vm1, %v3066_v33  ;;  %2919 = vmatprep.mubr.msk.bf16.mxu0 %vm419_vm1, %v3067_v34 }
 0x121   : > { %2917 = vmatprep.subr.bf16.mxu0 %v1179_v36  ;;  %v1276_v40 = vpop.permute.xlu0 %1275 }
 0x122   : > { %2910 = vmatpush3.bf16.msra.mxu1 %v1099_v30 }
 0x123   : > { %2918 = vmatpush3.bf16.msra.mxu0 %v1179_v36  ;;  %2923 = vmatprep.subr.bf16.mxu1 %v1278_v35 }
 0x125   : > { %2912 = vmatmul.mubr.msk.bf16.vlgmr.msra.gmra.mxu1 %vm419_vm1, %v3068_v37 }
 0x126   : > { %2920 = vmatmul.mubr.msk.bf16.vlgmr.msra.gmra.mxu0 %vm419_vm1, %v3069_v38  ;;  %2924 = vmatpush3.bf16.msra.mxu1 %v1278_v35 }
 0x127   : > { %2925 = vmatprep.subr.bf16.mxu1 %v1276_v40  ;;  %2927 = vmatprep.mubr.msk.bf16.mxu1 %vm419_vm1, %v3070_v39 }
 0x12a   : > { %2926 = vmatpush3.bf16.msra.mxu1 %v1276_v40  ;;  %v1345_v40 = vstv %s1340_s23 }
 0x12d   : > { %2928 = vmatmul.mubr.msk.bf16.vlgmr.msra.gmra.mxu1 %vm419_vm1, %v3071_v41 }
 0x15d   : > { %v2873_v46 = vpop.f32.mrf.mxu0 }
 0x15f   : > { %v669_v47 = vpop.f32.mrf.mxu0 }
 0x161   : > { %v2874_v49 = vpop.f32.mrf.mxu0 }
 0x163   : > { %v672_v52 = vpop.f32.mrf.mxu0 }
 0x1cd   : > { %v2865_v48 = vpop.f32.mrf.mxu1 }
 0x1ce   : > { %v678_v60 = vadd.f32 %v2873_v46, %v2865_v48 }
 0x1cf   : > { %v592_v50 = vpop.f32.mrf.mxu1 }
 0x1d0   : > { %v670_v63 = vadd.f32 %v669_v47, %v592_v50  ;;  %v1569_v47 = vld [vmem:[%s3586_s2] sm:$0x1] }
 0x1d1   : > { %v2866_v51 = vpop.f32.mrf.mxu1 }
 0x1d2   : > { %v681_v2 = vadd.f32 %v2874_v49, %v2866_v51 }
 0x1d3   : > { %v595_v53 = vpop.f32.mrf.mxu1 }
 0x1d4   : > { %v673_v5 = vadd.f32 %v672_v52, %v595_v53 }
 0x1d5   : > { %v2881_v54 = vpop.f32.mrf.mxu1  ;;  %v2889_v55 = vpop.f32.mrf.mxu0 }
 0x1d6   : > { %v790_v0 = vadd.f32 %v2881_v54, %v678_v60 }
 0x1d7   : > { %v773_v56 = vpop.f32.mrf.mxu1  ;;  %v870_v57 = vpop.f32.mrf.mxu0 }
 0x1d8   : > { %v788_v3 = vadd.f32 %v773_v56, %v670_v63  ;;  %v887_v8 = vadd.f32 %v2889_v55, %v790_v0  ;;  %v1571_v55 = vpack.i.b16 %v1569_v47, %v1569_v47 }
 0x1d9   : > { %v2882_v58 = vpop.f32.mrf.mxu1  ;;  %v2890_v59 = vpop.f32.mrf.mxu0 }
 0x1da   : > { %v791_v9 = vadd.f32 %v2882_v58, %v681_v2  ;;  %v885_v13 = vadd.f32 %v870_v57, %v788_v3 }
 0x1db   : > { %v776_v61 = vpop.f32.mrf.mxu1  ;;  %v873_v62 = vpop.f32.mrf.mxu0 }
 0x1dc   : > { %v789_v11 = vadd.f32 %v776_v61, %v673_v5  ;;  %v888_v17 = vadd.f32 %v2890_v59, %v791_v9  ;;  %v1386_v59 = vld [vmem:[%s3585_s1] sm:$0x1] }
 0x1dd   : > { %v2897_v1 = vpop.f32.mrf.mxu1  ;;  %v1388_v2 = vpack.i.b16 %v1386_v59, %v1386_v59 }
 0x1de   : > { %v2905_v4 = vpop.f32.mrf.mxu0  ;;  %v967_v14 = vadd.f32 %v2897_v1, %v887_v8  ;;  %v886_v20 = vadd.f32 %v873_v62, %v789_v11  ;;  %v1576_v1 = vrot.slane %v1571_v55, %v3213_v7 }
 0x1df   : > { %v950_v6 = vpop.f32.mrf.mxu1 }
 0x1e0   : > { %v1047_v10 = vpop.f32.mrf.mxu0  ;;  %v965_v18 = vadd.f32 %v950_v6, %v885_v13  ;;  %v1064_v22 = vadd.f32 %v2905_v4, %v967_v14  ;;  %v2673_v9 = vcombine.low %v1576_v1, %v1576_v1 }
 0x1e1   : > { %v2898_v12 = vpop.f32.mrf.mxu1 }
 0x1e2   : > { %v2906_v15 = vpop.f32.mrf.mxu0  ;;  %v968_v23 = vadd.f32 %v2898_v12, %v888_v17  ;;  %v1062_v27 = vadd.f32 %v1047_v10, %v965_v18  ;;  %v1393_v10 = vrot.slane %v1388_v2, %v3213_v7  ;;  %v3075_v17 = vld [vmem:[%s3590_s6] sm:$0xff]  }
 0x1e3   : > { %v953_v16 = vpop.f32.mrf.mxu1  ;;  %2943 = vmatprep.mubr.msk.bf16.mxu1 %vm419_vm1, %v3075_v17  ;;  %v3080_v17 = vld [vmem:[%s3590_s6 + $0x28] sm:$0xff]  }
 0x1e4   : > { %v1050_v19 = vpop.f32.mrf.mxu0  ;;  %v966_v25 = vadd.f32 %v953_v16, %v886_v20  ;;  %v1065_v31 = vadd.f32 %v2906_v15, %v968_v23  ;;  %v2656_v12 = vcombine.low %v1393_v10, %v1393_v10  ;;  %v3074_v16 = vld [vmem:[%s3590_s6 + $0x10] sm:$0xff]  }
 0x1e5   : > { %v2913_v21 = vpop.f32.mrf.mxu1  ;;  %2935 = vmatprep.mubr.msk.bf16.mxu0 %vm419_vm1, %v3074_v16  ;;  %v3081_v16 = vld [vmem:[%s3590_s6 + $0x38] sm:$0xff]  }
 0x1e6   : > { %v2921_v24 = vpop.f32.mrf.mxu0  ;;  %v1161_v28 = vadd.f32 %v2913_v21, %v1064_v22  ;;  %v1063_v33 = vadd.f32 %v1050_v19, %v966_v25 }
 0x1e7   : > { %v1144_v26 = vpop.f32.mrf.mxu1 }
 0x1e8   : > { %v1224_v29 = vpop.f32.mrf.mxu0  ;;  %v1159_v32 = vadd.f32 %v1144_v26, %v1062_v27  ;;  %v1241_v35 = vadd.f32 %v2921_v24, %v1161_v28 }
 0x1e9   : > { %v2914_v30 = vpop.f32.mrf.mxu1 }
 0x1ea   : > { %v1162_v36 = vadd.f32 %v2914_v30, %v1065_v31  ;;  %v2922_v37 = vpop.f32.mrf.mxu0  ;;  %v1239_v41 = vadd.f32 %v1224_v29, %v1159_v32 }
 0x1eb   : > { %v1147_v34 = vpop.f32.mrf.mxu1 }
 0x1ec   : > { %v1160_v38 = vadd.f32 %v1147_v34, %v1063_v33  ;;  %v1242_v49 = vadd.f32 %v2922_v37, %v1162_v36  ;;  %v1227_v50 = vpop.f32.mrf.mxu0 }
 0x1ed   : > { %v2929_v39 = vpop.f32.mrf.mxu1 }
 0x1ee   : > { %v1338_v46 = vadd.f32 %v2929_v39, %v1241_v35  ;;  %v1240_v53 = vadd.f32 %v1227_v50, %v1160_v38 }
 0x1ef   : > { %v1321_v48 = vpop.f32.mrf.mxu1 }
 0x1f0   : > { %vm1343_vm3 = vcmp.ge.f32.partialorder %v1338_v46, 0.0  ;;  %v1348_v51 = vmul.f32 %v1345_v40, %v1338_v46  ;;  %v1336_v52 = vadd.f32 %v1321_v48, %v1239_v41  ;;  %v3077_v48 = vld [vmem:[%s3590_s6 + $0x8] sm:$0xff]  }
 0x1f1   : > { %v2930_v54 = vpop.f32.mrf.mxu1 }
 0x1f2   : > { %vm1341_vm4 = vcmp.ge.f32.partialorder %v1336_v52, 0.0  ;;  %v1346_v56 = vmul.f32 %v1345_v40, %v1336_v52  ;;  %v1339_v57 = vadd.f32 %v2930_v54, %v1242_v49  ;;  %v1352_v58 = vsel %vm1343_vm3, %v1338_v46, %v1348_v51  ;;  %v3078_v49 = vld [vmem:[%s3590_s6 + $0x30] sm:$0xff]  }
 0x1f3   : > { %v1324_v60 = vpop.f32.mrf.mxu1  ;;  %v2759_v61 = vpack.c.bf16 %v1352_v58, %v1352_v58 }
 0x1f4   : > { %vm1344_vm5 = vcmp.ge.f32.partialorder %v1339_v57, 0.0  ;;  %v1349_v62 = vmul.f32 %v1345_v40, %v1339_v57  ;;  %v1337_v63 = vadd.f32 %v1324_v60, %v1240_v53  ;;  %v1350_v0 = vsel %vm1341_vm4, %v1336_v52, %v1346_v56 }
 0x1f5   : > { %1370 = vrot.lane.b32.xlu1 %v2759_v61, %s3117_s28  ;;  %v2757_v6 = vpack.c.bf16 %v1350_v0, %v1350_v0 }
 0x1f6   : > { %vm1342_vm6 = vcmp.ge.f32.partialorder %v1337_v63, 0.0  ;;  %v1347_v3 = vmul.f32 %v1345_v40, %v1337_v63  ;;  %v1353_v4 = vsel %vm1344_vm5, %v1339_v57, %v1349_v62 }
 0x1f7   : > { %v2760_v5 = vpack.c.bf16 %v1353_v4, %v1353_v4 }
 0x1f8   : > { %v1351_v8 = vsel %vm1342_vm6, %v1337_v63, %v1347_v3 }
 0x1f9   : > { %1372 = vrot.lane.b32.xlu0 %v2760_v5, %s3117_s28  ;;  %1366 = vrot.lane.b32.xlu1 %v2757_v6, %s3117_s28  ;;  %v2758_v11 = vpack.c.bf16 %v1351_v8, %v1351_v8 }
 0x1fd   : > { %1368 = vrot.lane.b32.xlu0 %v2758_v11, %s3117_s28  ;;  %1580 = vrot.lane.b32.xlu1 %v2673_v9, %s3118_s14  ;;  %v3076_v11 = vld [vmem:[%s3590_s6 + $0x18] sm:$0xff]  }
 0x201   : > { %1677 = vrot.lane.b32.xlu0 %v2656_v12, %s3119_s15  ;;  %1854 = vrot.lane.b32.xlu1 %v2673_v9, %s3120_s16 }
 0x205   : > { %1951 = vrot.lane.b32.xlu0 %v2656_v12, %s3121_s17  ;;  %2128 = vrot.lane.b32.xlu1 %v2673_v9, %s3122_s18 }
 0x267   : > { %v1371_v13 = vpop.permute.xlu1 %1370 }
 0x268   : > { %1380 = vst.msk [vmem:[#allocation2 + $0x8] sm:$0xf] %vm492_vm2, %v1371_v13 }
 0x26b   : > { %v1373_v14 = vpop.permute.xlu0 %1372  ;;  %v1367_v15 = vpop.permute.xlu1 %1366 }
 0x26c   : > { %1381 = vst.msk [vmem:[#allocation2 + $0xc] sm:$0xf] %vm492_vm2, %v1373_v14  ;;  %1378 = vst.msk [vmem:[#allocation2] sm:$0xf] %vm492_vm2, %v1367_v15 }
 0x26f   : > { %v1369_v7 = vpop.permute.xlu0 %1368  ;;  %v3415_v19 = vld [vmem:[#allocation2 + $0x8] sm:$0xf]  ;;  %v1581_v20 = vpop.permute.xlu1 %1580 }
 0x270   : > { %1379 = vst.msk [vmem:[#allocation2 + $0x4] sm:$0xf] %vm492_vm2, %v1369_v7  ;;  %v1585_v27 = vmul.bf16 %v1581_v20, %v3415_v19  ;;  %v1400_v28 = vmul.bf16 %v2656_v12, %v3415_v19 }
 0x273   : > { %v3412_v18 = vld [vmem:[#allocation2 + $0xc] sm:$0xf]  ;;  %v1678_v24 = vpop.permute.xlu0 %1677  ;;  %v3422_v25 = vld [vmem:[#allocation2] sm:$0xf]  ;;  %v1855_v41 = vpop.permute.xlu1 %1854 }
 0x274   : > { %v1586_v21 = vmul.bf16 %v1581_v20, %v3412_v18  ;;  %v2664_v22 = vcombine.low %v3415_v19, %v3412_v18  ;;  %v1401_v23 = vmul.bf16 %v2656_v12, %v3412_v18  ;;  %v1682_v29 = vmul.bf16 %v1678_v24, %v3415_v19 }
 0x275   : > { %v1683_v30 = vmul.bf16 %v1678_v24, %v3412_v18  ;;  %v1398_v35 = vmul.bf16 %v2656_v12, %v3422_v25  ;;  %v1583_v37 = vmul.bf16 %v1581_v20, %v3422_v25  ;;  %v1680_v47 = vmul.bf16 %v1678_v24, %v3422_v25 }
 0x276   : > { %1433 = vrot.lane.b32.xlu0 %v2664_v22, %s3123_s25  ;;  %v2670_v31 = vcombine.low %v1400_v28, %v1401_v23  ;;  %v2681_v32 = vcombine.low %v1585_v27, %v1586_v21  ;;  %v1859_v50 = vmul.bf16 %v1855_v41, %v3415_v19  ;;  %v1860_v51 = vmul.bf16 %v1855_v41, %v3412_v18  ;;  %v3087_v28 = vld [vmem:[%s3590_s6 + $0x70] sm:$0xff]  }
 0x277   : > { %v1383_v26 = vld [vmem:[#allocation2 + $0x4] sm:$0xf]  ;;  %v2691_v40 = vcombine.low %v1682_v29, %v1683_v30  ;;  %v1952_v53 = vpop.permute.xlu0 %1951  ;;  %v1857_v58 = vmul.bf16 %v1855_v41, %v3422_v25  ;;  %v2129_v63 = vpop.permute.xlu1 %2128 }
 0x278   : > { %v1584_v33 = vmul.bf16 %v1581_v20, %v1383_v26  ;;  %v2663_v34 = vcombine.low %v3422_v25, %v1383_v26  ;;  %v1399_v36 = vmul.bf16 %v2656_v12, %v1383_v26  ;;  %2939 = vmatprep.subr.bf16.mxu1 %v2670_v31  ;;  %v1681_v39 = vmul.bf16 %v1678_v24, %v1383_v26  ;;  %v3079_v12 = vld [vmem:[%s3590_s6 + $0x20] sm:$0xff]   ;;  %v3085_v24 = vld [vmem:[%s3590_s6 + $0x58] sm:$0xff]  }
 0x279   : > { %2940 = vmatpush3.bf16.msra.mxu1 %v2670_v31  ;;  %v1858_v54 = vmul.bf16 %v1855_v41, %v1383_v26  ;;  %v2709_v55 = vcombine.low %v1859_v50, %v1860_v51  ;;  %v1956_v56 = vmul.bf16 %v1952_v53, %v3415_v19  ;;  %v1957_v57 = vmul.bf16 %v1952_v53, %v3412_v18  ;;  %v3083_v20 = vld [vmem:[%s3590_s6 + $0x40] sm:$0xff]  }
 0x27a   : > { %1614 = vrot.lane.b32.xlu0 %v2681_v32, %s3124_s26  ;;  %1431 = vrot.lane.b32.xlu1 %v2663_v34, %s3123_s25  ;;  %v2669_v38 = vcombine.low %v1398_v35, %v1399_v36  ;;  %v2680_v46 = vcombine.low %v1583_v37, %v1584_v33  ;;  %v2690_v52 = vcombine.low %v1680_v47, %v1681_v39  ;;  %s3605_s25 = smov 122   ;;  %v3089_v32 = vld [vmem:[%s3590_s6 + $0x78] sm:$0xff]   ;;  %v3088_v33 = vld [vmem:[%s3590_s6 + $0x68] sm:$0xff]  }
 0x27b   : > { %v2708_v59 = vcombine.low %v1857_v58, %v1858_v54  ;;  %v1954_v60 = vmul.bf16 %v1952_v53, %v3422_v25  ;;  %v1955_v61 = vmul.bf16 %v1952_v53, %v1383_v26  ;;  %v2719_v62 = vcombine.low %v1956_v56, %v1957_v57  ;;  %v3091_v36 = vld [vmem:[%s3590_s6 + $0x88] sm:$0xff]  }
 0x27c   : > { %2941 = vmatprep.subr.bf16.mxu1 %v2669_v38  ;;  %v2133_v0 = vmul.bf16 %v2129_v63, %v3415_v19  ;;  %v2134_v1 = vmul.bf16 %v2129_v63, %v3412_v18  ;;  %v2131_v3 = vmul.bf16 %v2129_v63, %v3422_v25  ;;  %v2132_v4 = vmul.bf16 %v2129_v63, %v1383_v26  ;;  %v3082_v18 = vld [vmem:[%s3590_s6 + $0x50] sm:$0xff]   ;;  %v3084_v25 = vld [vmem:[%s3590_s6 + $0x48] sm:$0xff]   ;;  %v3086_v26 = vld [vmem:[%s3590_s6 + $0x60] sm:$0xff]  }
 0x27d   : > { %2942 = vmatpush3.bf16.msra.mxu1 %v2669_v38  ;;  %v2718_v2 = vcombine.low %v1954_v60, %v1955_v61 }
 0x27e   : > { %1711 = vrot.lane.b32.xlu0 %v2691_v40, %s3126_s21  ;;  %1612 = vrot.lane.b32.xlu1 %v2680_v46, %s3124_s26  ;;  %s3606_s26 = smov 120   ;;  %v2737_v5 = vcombine.low %v2133_v0, %v2134_v1  ;;  %v2736_v6 = vcombine.low %v2131_v3, %v2132_v4 }
 0x280   : > { %2944 = vmatmul.mubr.msk.bf16.vlgmr.msra.gmra.mxu1 %vm419_vm1, %v3077_v48 }
 0x281   : > { %2959 = vmatprep.mubr.msk.bf16.mxu1 %vm419_vm1, %v3078_v49 }
 0x282   : > { %1709 = vrot.lane.b32.xlu0 %v2690_v52, %s3126_s21  ;;  %1791 = vrot.lane.b32.xlu1 %v2664_v22, %s3125_s13  ;;  %s3607_s21 = smov 119  }
 0x286   : > { %1888 = vrot.lane.b32.xlu0 %v2709_v55, %s3605_s25  ;;  %1789 = vrot.lane.b32.xlu1 %v2663_v34, %s3125_s13  ;;  %s3608_s13 = smov 118  }
 0x28a   : > { %1886 = vrot.lane.b32.xlu0 %v2708_v59, %s3605_s25  ;;  %1985 = vrot.lane.b32.xlu1 %v2719_v62, %s3606_s26 }
 0x28e   : > { %2065 = vrot.lane.b32.xlu0 %v2664_v22, %s3607_s21  ;;  %1983 = vrot.lane.b32.xlu1 %v2718_v2, %s3606_s26  ;;  %s387_s26 = scalar_lea.vmem %s3595_s11, %s3609_s30 }
 0x292   : > { %2063 = vrot.lane.b32.xlu0 %v2663_v34, %s3607_s21  ;;  %2162 = vrot.lane.b32.xlu1 %v2737_v5, %s3608_s13  ;;  %v3090_v34 = vld [vmem:[%s3590_s6 + $0x80] sm:$0xff]  }
 0x296   : > { %2160 = vrot.lane.b32.xlu1 %v2736_v6, %s3608_s13 }
 0x2e8   : > { %v1434_v8 = vpop.permute.xlu0 %1433 }
 0x2e9   : > { %2931 = vmatprep.subr.bf16.mxu0 %v1434_v8 }
 0x2ea   : > { %2932 = vmatpush3.bf16.msra.mxu0 %v1434_v8 }
 0x2ec   : > { %v1615_v9 = vpop.permute.xlu0 %1614  ;;  %v1432_v10 = vpop.permute.xlu1 %1431 }
 0x2ed   : > { %2933 = vmatprep.subr.bf16.mxu0 %v1432_v10 }
 0x2ee   : > { %2934 = vmatpush3.bf16.msra.mxu0 %v1432_v10 }
 0x2ef   : > { %2947 = vmatprep.subr.bf16.mxu0 %v1615_v9 }
 0x2f0   : > { %v1712_v13 = vpop.permute.xlu0 %1711  ;;  %v1613_v14 = vpop.permute.xlu1 %1612 }
 0x2f1   : > { %2955 = vmatprep.subr.bf16.mxu1 %v1712_v13  ;;  %2936 = vmatmul.mubr.msk.bf16.vlgmr.msra.gmra.mxu0 %vm419_vm1, %v3076_v11 }
 0x2f2   : > { %2956 = vmatpush3.bf16.msra.mxu1 %v1712_v13  ;;  %2948 = vmatpush3.bf16.msra.mxu0 %v1615_v9 }
 0x2f3   : > { %2951 = vmatprep.mubr.msk.bf16.mxu0 %vm419_vm1, %v3079_v12  ;;  %2949 = vmatprep.subr.bf16.mxu0 %v1613_v14 }
 0x2f4   : > { %v1710_v15 = vpop.permute.xlu0 %1709  ;;  %v1792_v7 = vpop.permute.xlu1 %1791 }
 0x2f5   : > { %2957 = vmatprep.subr.bf16.mxu1 %v1710_v15 }
 0x2f6   : > { %2958 = vmatpush3.bf16.msra.mxu1 %v1710_v15  ;;  %2950 = vmatpush3.bf16.msra.mxu0 %v1613_v14 }
 0x2f7   : > { %2963 = vmatprep.subr.bf16.mxu0 %v1792_v7 }
 0x2f8   : > { %v1889_v19 = vpop.permute.xlu0 %1888  ;;  %v1790_v21 = vpop.permute.xlu1 %1789 }
 0x2f9   : > { %2960 = vmatmul.mubr.msk.bf16.vlgmr.msra.gmra.mxu1 %vm419_vm1, %v3081_v16  ;;  %2971 = vmatprep.subr.bf16.mxu1 %v1889_v19 }
 0x2fa   : > { %2952 = vmatmul.mubr.msk.bf16.vlgmr.msra.gmra.mxu0 %vm419_vm1, %v3080_v17  ;;  %2972 = vmatpush3.bf16.msra.mxu1 %v1889_v19 }
 0x2fb   : > { %2964 = vmatpush3.bf16.msra.mxu0 %v1792_v7  ;;  %2975 = vmatprep.mubr.msk.bf16.mxu1 %vm419_vm1, %v3082_v18 }
 0x2fc   : > { %2965 = vmatprep.subr.bf16.mxu0 %v1790_v21  ;;  %v1887_v22 = vpop.permute.xlu0 %1886  ;;  %2967 = vmatprep.mubr.msk.bf16.mxu0 %vm419_vm1, %v3083_v20  ;;  %v1986_v23 = vpop.permute.xlu1 %1985 }
 0x2fd   : > { %2973 = vmatprep.subr.bf16.mxu1 %v1887_v22 }
 0x2fe   : > { %2974 = vmatpush3.bf16.msra.mxu1 %v1887_v22 }
 0x2ff   : > { %2966 = vmatpush3.bf16.msra.mxu0 %v1790_v21 }
 0x300   : > { %2979 = vmatprep.subr.bf16.mxu0 %v1986_v23  ;;  %v2066_v27 = vpop.permute.xlu0 %2065  ;;  %v1984_v29 = vpop.permute.xlu1 %1983 }
 0x301   : > { %2976 = vmatmul.mubr.msk.bf16.vlgmr.msra.gmra.mxu1 %vm419_vm1, %v3085_v24  ;;  %2987 = vmatprep.subr.bf16.mxu1 %v2066_v27 }
 0x302   : > { %2968 = vmatmul.mubr.msk.bf16.vlgmr.msra.gmra.mxu0 %vm419_vm1, %v3084_v25  ;;  %2988 = vmatpush3.bf16.msra.mxu1 %v2066_v27 }
 0x303   : > { %2980 = vmatpush3.bf16.msra.mxu0 %v1986_v23  ;;  %2983 = vmatprep.mubr.msk.bf16.mxu0 %vm419_vm1, %v3086_v26 }
 0x304   : > { %2981 = vmatprep.subr.bf16.mxu0 %v1984_v29  ;;  %v2064_v30 = vpop.permute.xlu0 %2063  ;;  %2991 = vmatprep.mubr.msk.bf16.mxu1 %vm419_vm1, %v3087_v28  ;;  %v2163_v31 = vpop.permute.xlu1 %2162 }
 0x305   : > { %2989 = vmatprep.subr.bf16.mxu1 %v2064_v30 }
 0x306   : > { %2990 = vmatpush3.bf16.msra.mxu1 %v2064_v30 }
 0x307   : > { %2982 = vmatpush3.bf16.msra.mxu0 %v1984_v29 }
 0x308   : > { %2995 = vmatprep.subr.bf16.mxu0 %v2163_v31  ;;  %v2161_v35 = vpop.permute.xlu1 %2160 }
 0x309   : > { %2992 = vmatmul.mubr.msk.bf16.vlgmr.msra.gmra.mxu1 %vm419_vm1, %v3089_v32 }
 0x30a   : > { %2984 = vmatmul.mubr.msk.bf16.vlgmr.msra.gmra.mxu0 %vm419_vm1, %v3088_v33 }
 0x30b   : > { %2996 = vmatpush3.bf16.msra.mxu0 %v2163_v31  ;;  %2999 = vmatprep.mubr.msk.bf16.mxu0 %vm419_vm1, %v3090_v34 }
 0x30c   : > { %2997 = vmatprep.subr.bf16.mxu0 %v2161_v35 }
 0x30f   : > { %2998 = vmatpush3.bf16.msra.mxu0 %v2161_v35 }
 0x312   : > { %3000 = vmatmul.mubr.msk.bf16.vlgmr.msra.gmra.mxu0 %vm419_vm1, %v3091_v36 }
 0x340   : > { %v2945_v37 = vpop.f32.mrf.mxu1 }
 0x342   : > { %v1554_v38 = vpop.f32.mrf.mxu1 }
 0x344   : > { %v2946_v39 = vpop.f32.mrf.mxu1 }
 0x346   : > { %v1557_v46 = vpop.f32.mrf.mxu1 }
 0x3b1   : > { %v2937_v40 = vpop.f32.mrf.mxu0 }
 0x3b2   : > { %v1563_v55 = vadd.f32 %v2945_v37, %v2937_v40 }
 0x3b3   : > { %v1477_v41 = vpop.f32.mrf.mxu0 }
 0x3b4   : > { %v1555_v10 = vadd.f32 %v1554_v38, %v1477_v41 }
 0x3b5   : > { %v2938_v47 = vpop.f32.mrf.mxu0 }
 0x3b6   : > { %v1566_v61 = vadd.f32 %v2946_v39, %v2938_v47 }
 0x3b7   : > { %v1480_v48 = vpop.f32.mrf.mxu0 }
 0x3b8   : > { %v1558_v0 = vadd.f32 %v1557_v46, %v1480_v48 }
 0x3b9   : > { %v2961_v49 = vpop.f32.mrf.mxu1 }
 0x3ba   : > { %v2953_v50 = vpop.f32.mrf.mxu0 }
 0x3bb   : > { %v1755_v51 = vpop.f32.mrf.mxu1  ;;  %v1675_v58 = vadd.f32 %v2953_v50, %v1563_v55 }
 0x3bc   : > { %v1658_v52 = vpop.f32.mrf.mxu0 }
 0x3bd   : > { %v2962_v53 = vpop.f32.mrf.mxu1  ;;  %v1772_v1 = vadd.f32 %v2961_v49, %v1675_v58  ;;  %v1673_v14 = vadd.f32 %v1658_v52, %v1555_v10 }
 0x3be   : > { %v2954_v54 = vpop.f32.mrf.mxu0 }
 0x3bf   : > { %v1758_v56 = vpop.f32.mrf.mxu1  ;;  %v1676_v2 = vadd.f32 %v2954_v54, %v1566_v61  ;;  %v1770_v22 = vadd.f32 %v1755_v51, %v1673_v14  ;;  %v2326_v14 = vld [vmem:[%s3594_s10 + $0x18] sm:$0xff] }
 0x3c0   : > { %v1661_v57 = vpop.f32.mrf.mxu0 }
 0x3c1   : > { %v2977_v59 = vpop.f32.mrf.mxu1  ;;  %v1674_v5 = vadd.f32 %v1661_v57, %v1558_v0  ;;  %v1773_v11 = vadd.f32 %v2962_v53, %v1676_v2  ;;  %v3131_v53 = vmov 0.0   ;;  %v2244_v0 = vld [vmem:[%s3592_s8] sm:$0xff] }
 0x3c2   : > { %v2969_v60 = vpop.f32.mrf.mxu0  ;;  %3003 = vmatprep.subr.mxu1 %v3131_v53  ;;  %3011 = vmatprep.mubr.msk.f32.mxu1 %vm3132_vm8, %v3131_v53 }
 0x3c3   : > { %v1932_v62 = vpop.f32.mrf.mxu1  ;;  %v1852_v6 = vadd.f32 %v2969_v60, %v1772_v1  ;;  %v1771_v15 = vadd.f32 %v1758_v56, %v1674_v5  ;;  %v2320_v5 = vld [vmem:[%s3593_s9 + $0x8] sm:$0xff] }
 0x3c4   : > { %v1835_v63 = vpop.f32.mrf.mxu0 }
 0x3c5   : > { %v2978_v3 = vpop.f32.mrf.mxu1  ;;  %v1949_v7 = vadd.f32 %v2977_v59, %v1852_v6  ;;  %v1850_v25 = vadd.f32 %v1835_v63, %v1770_v22  ;;  %v2319_v63 = vld [vmem:[%s3593_s9] sm:$0xff]  ;;  %v2321_v6 = vld [vmem:[%s3593_s9 + $0x10] sm:$0xff] }
 0x3c6   : > { %v2970_v4 = vpop.f32.mrf.mxu0 }
 0x3c7   : > { %v1935_v8 = vpop.f32.mrf.mxu1  ;;  %v1853_v16 = vadd.f32 %v2970_v4, %v1773_v11  ;;  %v1947_v34 = vadd.f32 %v1932_v62, %v1850_v25  ;;  %v2243_v62 = vld [vmem:[%s3591_s7] sm:$0xff] }
 0x3c8   : > { %v1838_v9 = vpop.f32.mrf.mxu0  ;;  %v2323_v11 = vld [vmem:[%s3594_s10] sm:$0xff] }
 0x3c9   : > { %v2993_v13 = vpop.f32.mrf.mxu1  ;;  %v1851_v18 = vadd.f32 %v1838_v9, %v1771_v15  ;;  %v1950_v23 = vadd.f32 %v2978_v3, %v1853_v16  ;;  %v2324_v9 = vld [vmem:[%s3594_s10 + $0x8] sm:$0xff] }
 0x3ca   : > { %v2985_v12 = vpop.f32.mrf.mxu0 }
 0x3cb   : > { %v2046_v19 = vadd.f32 %v2985_v12, %v1949_v7  ;;  %v2109_v20 = vpop.f32.mrf.mxu1  ;;  %v1948_v26 = vadd.f32 %v1935_v8, %v1851_v18  ;;  %v2322_v8 = vld [vmem:[%s3593_s9 + $0x18] sm:$0xff] }
 0x3cc   : > { %v2029_v17 = vpop.f32.mrf.mxu0 }
 0x3cd   : > { %v2126_v27 = vadd.f32 %v2993_v13, %v2046_v19  ;;  %v2994_v29 = vpop.f32.mrf.mxu1  ;;  %v2044_v39 = vadd.f32 %v2029_v17, %v1947_v34  ;;  %v2325_v17 = vld [vmem:[%s3594_s10 + $0x10] sm:$0xff] }
 0x3ce   : > { %v2986_v21 = vpop.f32.mrf.mxu0 }
 0x3cf   : > { %v2047_v28 = vadd.f32 %v2986_v21, %v1950_v23  ;;  %v2112_v37 = vpop.f32.mrf.mxu1  ;;  %v2124_v49 = vadd.f32 %v2109_v20, %v2044_v39 }
 0x3d0   : > { %v2032_v24 = vpop.f32.mrf.mxu0 }
 0x3d1   : > { %v2045_v31 = vadd.f32 %v2032_v24, %v1948_v26  ;;  %v2127_v35 = vadd.f32 %v2994_v29, %v2047_v28 }
 0x3d2   : > { %v3001_v30 = vpop.f32.mrf.mxu0 }
 0x3d3   : > { %v3521_v32 = vadd.f32 %v3001_v30, %v2126_v27  ;;  %v2125_v40 = vadd.f32 %v2112_v37, %v2045_v31 }
 0x3d4   : > { %v2206_v33 = vpop.f32.mrf.mxu0 }
 0x3d5   : > { %v2232_v36 = vsel %vm2225_vm7, %v3521_v32, 0.0  ;;  %v3531_v50 = vadd.f32 %v2206_v33, %v2124_v49 }
 0x3d6   : > { %2233 = vadd.xlane.f32.xlu1 %v2232_v36  ;;  %v3002_v38 = vpop.f32.mrf.mxu0 }
 0x3d7   : > { %v3525_v41 = vadd.f32 %v3002_v38, %v2127_v35  ;;  %v2226_v52 = vsel %vm2225_vm7, %v3531_v50, 0.0 }
 0x3d8   : > { %v2209_v46 = vpop.f32.mrf.mxu0 }
 0x3d9   : > { %v3527_v47 = vadd.f32 %v2209_v46, %v2125_v40  ;;  %v2235_v48 = vsel %vm2225_vm7, %v3525_v41, 0.0 }
 0x3da   : > { %2236 = vadd.xlane.f32.xlu0 %v2235_v48 }
 0x3db   : > { %v2229_v51 = vsel %vm2225_vm7, %v3527_v47, 0.0 }
 0x3de   : > { %2230 = vadd.xlane.f32.xlu0 %v2229_v51 }
 0x3e2   : > { %2227 = vadd.xlane.f32.xlu0 %v2226_v52 }
 0x45f   : > { %v2234_v54 = vpop.xlane.xlu1 %2233 }
 0x460   : > { %v2241_v57 = vmul.f32 0.0625, %v2234_v54 }
 0x463   : > { %v2237_v55 = vpop.xlane.xlu0 %2236 }
 0x464   : > { %v2242_v56 = vmul.f32 0.0625, %v2237_v55 }
 0x466   : > { %3004 = vmatpush3.msra.mxu1 %v2242_v56 }
 0x467   : > { %3005 = vmatprep.subr.mxu1 %v3131_v53  ;;  %v2231_v58 = vpop.xlane.xlu0 %2230 }
 0x468   : > { %v2240_v59 = vmul.f32 0.0625, %v2231_v58  ;;  %3006 = vmatpush3.msra.mxu1 %v2241_v57 }
 0x469   : > { %3007 = vmatprep.subr.mxu1 %v3131_v53 }
 0x46a   : > { %3008 = vmatpush3.msra.mxu1 %v2240_v59 }
 0x46b   : > { %v2228_v60 = vpop.xlane.xlu0 %2227  ;;  %3009 = vmatprep.subr.mxu1 %v3131_v53 }
 0x46c   : > { %v2239_v61 = vmul.f32 0.0625, %v2228_v60 }
 0x46e   : > { %3010 = vmatpush3.msra.mxu1 %v2239_v61 }
 0x46f   : > { %3012 = vmatmul.mubr.msk.f32.vlgmr.msra.gmra.mxu1 %vm419_vm1, %v2243_v62 }
 0x470   : > { %3016 = vmatprep.mubr.msk.f32.mxu1 %vm2327_vm9, %v2319_v63 }
 0x52f   : > { %v2314_v1 = vpop.f32.mrf.mxu1 }
 0x530   : > { %v2315_v2 = vadd.f32 %v2314_v1, %v2244_v0 }
 0x531   : > { %v3013_v3 = vpop.f32.mrf.mxu1 }
 0x532   : > { %v2318_v4 = vmax.f32 %v2315_v2, 0.0 }
 0x534   : > { %3014 = vmatprep.subr.mxu1 %v2318_v4 }
 0x535   : > { %3015 = vmatpush3.msra.mxu1 %v2318_v4 }
 0x536   : > { %3017 = vmatmul.mubr.msk.f32.vlgmr.msra.gmra.mxu1 %vm2327_vm9, %v2320_v5 }
 0x537   : > { %3019 = vmatprep.mubr.msk.f32.mxu1 %vm2327_vm9, %v2321_v6 }
 0x53a   : > { %3020 = vmatmul.mubr.msk.f32.gmra.mxu1 %vm2327_vm9, %v2322_v8 }
 0x5f6   : > { %v3018_v10 = vpop.f32.mrf.mxu1 }
 0x5f7   : > { %v2412_v12 = vadd.f32 %v3018_v10, %v2324_v9 }
 0x5f8   : > { %v2406_v13 = vpop.f32.mrf.mxu1 }
 0x5f9   : > { %v2746_v15 = vmul.f32 -1.442695, %v2412_v12  ;;  %v2407_v7 = vadd.f32 %v2406_v13, %v2323_v11 }
 0x5fa   : > { %v3021_v16 = vpop.f32.mrf.mxu1 }
 0x5fb   : > { %3092 = vpow2.f32 %v2746_v15  ;;  %v2745_v18 = vmul.f32 -1.442695, %v2407_v7  ;;  %v2422_v19 = vadd.f32 %v3021_v16, %v2326_v14 }
 0x5fc   : > { %v2416_v20 = vpop.f32.mrf.mxu1 }
 0x5fd   : > { %3094 = vpow2.f32 %v2745_v18  ;;  %v2748_v21 = vmul.f32 -1.442695, %v2422_v19  ;;  %v2417_v22 = vadd.f32 %v2416_v20, %v2325_v17 }
 0x5ff   : > { %v2747_v23 = vmul.f32 -1.442695, %v2417_v22  ;;  %3096 = vpow2.f32 %v2748_v21 }
 0x601   : > { %3098 = vpow2.f32 %v2747_v23 }
 0x608   : > { %v3093_v24 = vpop.eup %3092 }
 0x609   : > { %v2438_v25 = vadd.f32 1.0, %v3093_v24 }
 0x60a   : > { %v3095_v26 = vpop.eup %3094 }
 0x60b   : > { %3100 = vrcp.f32 %v2438_v25  ;;  %v2437_v27 = vadd.f32 1.0, %v3095_v26 }
 0x60c   : > { %v3097_v28 = vpop.eup %3096 }
 0x60d   : > { %3102 = vrcp.f32 %v2437_v27  ;;  %v2440_v31 = vadd.f32 1.0, %v3097_v28 }
 0x60e   : > { %v3099_v29 = vpop.eup %3098 }
 0x60f   : > { %v2439_v30 = vadd.f32 1.0, %v3099_v29 }
 0x611   : > { %3104 = vrcp.f32 %v2439_v30 }
 0x612   : > { %3106 = vrcp.f32 %v2440_v31 }
 0x618   : > { %v3101_v33 = vpop.eup %3100 }
 0x619   : > { %2456 = vperm.xlu0 %3048, %v3101_v33  }
 0x61a   : > { %v3103_v34 = vpop.eup %3102 }
 0x61b   : > { %2451 = vperm.xlu1 %3047, %v3103_v34  }
 0x61e   : > { %v3105_v35 = vpop.eup %3104 }
 0x61f   : > { %2461 = vperm.xlu1 %3047, %v3105_v35   ;;  %v3107_v36 = vpop.eup %3106 }
 0x623   : > { %2466 = vperm.xlu1 %3047, %v3107_v36  }
 0x694   : > { %v2457_v37 = vpop.permute.xlu0 %2456 }
 0x695   : > { %v2470_v38 = vmul.f32 %v2457_v37, %v3527_v47 }
 0x696   : > { %v2452_v39 = vpop.permute.xlu1 %2451 }
 0x697   : > { %v2474_v40 = vadd.f32 %v2470_v38, %v3383_v45  ;;  %v2469_v46 = vmul.f32 %v2452_v39, %v3531_v50 }
 0x699   : > { %v2762_v48 = vpack.c.bf16 %v2474_v40, %v2474_v40  ;;  %v2473_v49 = vadd.f32 %v2469_v46, %v3379_v43 }
 0x69a   : > { %v2462_v51 = vpop.permute.xlu1 %2461 }
 0x69b   : > { %2495 = vst.msk [vmem:[%s387_s26 + $0x4] sm:$0xf] %vm2493_vm10, %v2762_v48  ;;  %v2761_v52 = vpack.c.bf16 %v2473_v49, %v2473_v49  ;;  %v2471_v53 = vmul.f32 %v2462_v51, %v3521_v32 }
 0x69d   : > { %2494 = vst.msk [vmem:[%s387_s26] sm:$0xf] %vm2493_vm10, %v2761_v52  ;;  %v2475_v47 = vadd.f32 %v3377_v42, %v2471_v53 }
 0x69e   : > { %v2467_v45 = vpop.permute.xlu1 %2466 }
 0x69f   : > { %v2763_v54 = vpack.c.bf16 %v2475_v47, %v2475_v47  ;;  %v2472_v50 = vmul.f32 %v2467_v45, %v3525_v41 }
 0x6a1   : > { %2496 = vst.msk [vmem:[%s387_s26 + $0x8] sm:$0xf] %vm2493_vm10, %v2763_v54  ;;  %v2476_v55 = vadd.f32 %v3381_v44, %v2472_v50 }
 0x6a3   : > { %v2764_v56 = vpack.c.bf16 %v2476_v55, %v2476_v55 }
 0x6a5   : > { %2497 = vst.msk [vmem:[%s387_s26 + $0xc] sm:$0xf] %vm2493_vm10, %v2764_v56 }
 0x6a6 PF: > { %s22_s19 = sadd.s32 1, %s3114_s19  }
 0x6a7   : > { %p19_p4 = scmp.ge.s32.totalorder %s22_s19, 4  }
 0x6a9   :  { %21 = sbr.rel (!%p19_p4) target bundleno = 2 (0x2), region = 110 }

</bundles_post_ra>
